<compile_context>
chip_gen: v6e
topology: v6e:2x2x1
jax: 0.10.0
libtpu: 0.0.40
codegen_flags: <defaults>
</compile_context>

<pallas_src>
import functools
import re

import jax
import jax.numpy as jnp
from jax import lax
from jax.experimental import pallas as pl
from jax.experimental.pallas import tpu as pltpu

LANE = 128    # TPU lane width: every matmul N (output channels) is padded to this.
_TM_MAX = 512


def _tpu_version():
    try:
        kind = jax.devices()[0].device_kind          # e.g. "TPU v6e", "TPU v5 lite"
        m = re.search(r"v(\d+)", kind)
        return int(m.group(1)) if m else 0
    except Exception:                                 # pragma: no cover
        return 0


_TPU_VERSION = _tpu_version()
# bf16 VALUs exist on v6e/v7x; keep the pre-activation in f32 on older chips.
_ACT_DTYPE = jnp.bfloat16 if _TPU_VERSION >= 6 else jnp.float32


def _select_tiles(M, P):
    """Pick (Mp, TM): single M step per phase on 1-TC chips; >=2 even steps on v7x
       (2 TensorCores) when the phase axis alone cannot feed both cores."""
    Mp = max(8, -(-M // 8) * 8)
    TM = min(Mp, _TM_MAX)
    if _TPU_VERSION >= 7 and P == 1 and Mp >= 16 and Mp <= TM:
        TM = -(-(Mp // 2) // 8) * 8
    Mp = -(-Mp // TM) * TM
    return Mp, TM


def _vmem_limit(TM, K, NP, out_bytes, emit_stats):
    tile = (TM * K * 2                # x tile (bf16)
            + K * NP * 2              # weight tile (bf16)
            + TM * NP * out_bytes     # output tile
            + NP * 4                  # bias
            + (2 * NP * 4 if emit_stats else 0))
    need = 2 * tile + (4 << 20)       # double-buffered + scratch slack
    cap = (48 << 20) if _TPU_VERSION >= 7 else (100 << 20)
    return int(min(max(need, 32 << 20), cap))


# ----------------------------------------------------------------------------
# Fused conv-as-matmul Pallas kernel
# ----------------------------------------------------------------------------
def _fused_conv_matmul_kernel(x_ref, w_ref, b_ref, *out_refs, pre_act, post_act,
                              emit_stats, act_dtype):
    """One (phase, M-tile) grid step:
       pre-activation -> bf16 MXU matmul (f32 acc, producer-BN scale already
       folded into the weights) -> +bias -> [per-tile channel stats for the next
       BatchNorm] -> [tanh] -> store (bf16 or f32)."""
    y_ref = out_refs[0]
    x = x_ref[0]                                            # (TM, K) bf16
    if pre_act != "none":
        xa = x.astype(act_dtype)
        if pre_act == "leaky":
            xa = jnp.where(xa >= 0, xa, 0.2 * xa)
        else:                                               # "relu"
            xa = jnp.maximum(xa, 0.0)
        x = xa.astype(jnp.bfloat16)
    acc = jnp.dot(x, w_ref[0], preferred_element_type=jnp.float32)   # (TM, NP)
    y = acc + b_ref[...]
    if emit_stats:
        st_ref = out_refs[1]
        st_ref[0, 0, 0:1, :] = jnp.sum(y, axis=0, keepdims=True)
        st_ref[0, 0, 1:2, :] = jnp.sum(y * y, axis=0, keepdims=True)
    if post_act == "tanh":
        y = jnp.tanh(y)
    y_ref[0] = y.astype(y_ref.dtype)


def fused_conv_matmul(patches, wm, bias, pre_act, post_act, emit_stats, out_dtype):
    """patches: (P, M, K) bf16 im2col rows (zero rows/cols are semantic zeros);
       wm:      (P, K, Cout) f32 weights with the producer-BN scale pre-folded;
       bias:    (Cout,) f32.
       Returns y (P, M, Cout) in out_dtype and per-tile stats (P, mt, 2, Cout)
       f32 (or None when emit_stats=False)."""
    P, M, K = patches.shape
    Cout = wm.shape[-1]
    NP = -(-Cout // LANE) * LANE

    Mp, TM = _select_tiles(M, P)
    mt = Mp // TM

    xpad = jnp.pad(patches, ((0, 0), (0, Mp - M), (0, 0)))
    wpad = jnp.pad(wm.astype(jnp.bfloat16), ((0, 0), (0, 0), (0, NP - Cout)))
    bpad = jnp.pad(bias.astype(jnp.float32), (0, NP - Cout)).reshape(1, NP)

    out_bytes = jnp.dtype(out_dtype).itemsize
    out_shape = [jax.ShapeDtypeStruct((P, Mp, NP), out_dtype)]
    out_specs = [pl.BlockSpec((1, TM, NP), lambda p, i: (p, i, 0))]
    if emit_stats:
        out_shape.append(jax.ShapeDtypeStruct((P, mt, 2, NP), jnp.float32))
        out_specs.append(pl.BlockSpec((1, 1, 2, NP), lambda p, i: (p, i, 0, 0)))

    kernel = functools.partial(_fused_conv_matmul_kernel,
                               pre_act=pre_act, post_act=post_act,
                               emit_stats=emit_stats, act_dtype=_ACT_DTYPE)
    outs = pl.pallas_call(
        kernel,
        out_shape=tuple(out_shape),
        grid=(P, mt),
        in_specs=[
            pl.BlockSpec((1, TM, K), lambda p, i: (p, i, 0)),
            pl.BlockSpec((1, K, NP), lambda p, i: (p, 0, 0)),
            pl.BlockSpec((1, NP), lambda p, i: (0, 0)),
        ],
        out_specs=tuple(out_specs),
        compiler_params=pltpu.CompilerParams(
            dimension_semantics=("parallel", "parallel"),
            vmem_limit_bytes=_vmem_limit(TM, K, NP, out_bytes, emit_stats)),
        cost_estimate=pl.CostEstimate(
            flops=2 * P * Mp * K * NP,
            transcendentals=(P * Mp * NP) if post_act == "tanh" else 0,
            bytes_accessed=(xpad.size * 2 + wpad.size * 2 + bpad.size * 4
                            + P * Mp * NP * out_bytes
                            + (P * mt * 2 * NP * 4 if emit_stats else 0))),
    )(xpad, wpad, bpad)

    if not isinstance(outs, (tuple, list)):
        outs = (outs,)
    y = outs[0][:, :M, :Cout]
    stats = outs[1][..., :Cout] if emit_stats else None
    return y, stats


# ----------------------------------------------------------------------------
# BatchNorm (training mode) as a deferred per-channel affine
# ----------------------------------------------------------------------------
def bn_affine_from_stats(stats, count, gamma, beta, eps=1e-5):
    """stats: (P, mt, 2, C) per-tile (sum, sumsq) produced by the matmul kernel.
       Returns (scale, shift/scale) so the consumer computes
       act(scale * (raw + shift/scale)) == act(BN(raw)).  Requires gamma > 0
       (true for this script's gamma=1 initialization)."""
    s = jnp.sum(stats[:, :, 0, :], axis=(0, 1))
    sq = jnp.sum(stats[:, :, 1, :], axis=(0, 1))
    mean = s / count
    var = jnp.maximum(sq / count - mean * mean, 0.0)   # biased variance (torch BN)
    scale = gamma * lax.rsqrt(var + eps)
    shift = beta - mean * scale
    return scale, shift / scale


# ----------------------------------------------------------------------------
# Conv layers = thin im2col glue + fused Pallas matmul
# ----------------------------------------------------------------------------
def conv_down_fused(x, chan_scale, w, pre_act, emit_stats):
    """Conv2d(k=4, s=2, p=1, bias=False); producer BN scale folded into the
       weights, preceding activation fused in-kernel.
       x: NHWC (shifted raw map), w: (Cout, Cin, 4, 4) torch layout."""
    N, H, W, C = x.shape
    Ho, Wo = H // 2, W // 2
    xp = jnp.pad(x.astype(jnp.bfloat16), ((0, 0), (1, 1), (1, 1), (0, 0)))
    taps = [xp[:, ky:ky + 2 * Ho:2, kx:kx + 2 * Wo:2, :]
            for ky in range(4) for kx in range(4)]
    patches = jnp.stack(taps, axis=3).reshape(1, N * Ho * Wo, 16 * C)
    Cout = w.shape[0]
    # Fold producer-BN scale into the Cin axis of the weights (scale > 0 required).
    w_s = w * chan_scale[None, :, None, None]
    wm = jnp.transpose(w_s, (2, 3, 1, 0)).reshape(1, 16 * C, Cout)
    bias = jnp.zeros((Cout,), jnp.float32)
    y, stats = fused_conv_matmul(patches, wm, bias, pre_act, "none",
                                 emit_stats, jnp.bfloat16)
    return y.reshape(N, Ho, Wo, Cout), stats, N * Ho * Wo


_KTAP = ((3, 1), (2, 0))  # kernel tap index for (output parity, 2x2 offset)


def conv_up_fused(x, chan_scale, w, bias, post_act, emit_stats):
    """ConvTranspose2d(k=4, s=2, p=1) via 4 parity phases (2x2 taps each, no
       zero-insertion waste); ReLU pre-act fused in-kernel, producer BN scale
       folded into the weights.  x: NHWC, w: (Cin, Cout, 4, 4) torch layout."""
    N, H, W, C = x.shape
    Cout = w.shape[1]
    xp = jnp.pad(x.astype(jnp.bfloat16), ((0, 0), (1, 1), (1, 1), (0, 0)))
    w_s = w * chan_scale[:, None, None, None]           # fold scale (scale > 0)
    phase_patches, phase_w = [], []
    for py in range(2):
        for px in range(2):
            taps = [xp[:, py + dy:py + dy + H, px + dx:px + dx + W, :]
                    for dy in range(2) for dx in range(2)]
            phase_patches.append(jnp.stack(taps, axis=3).reshape(N * H * W, 4 * C))
            wt = jnp.stack(
                [jnp.stack([w_s[:, :, _KTAP[py][dy], _KTAP[px][dx]]
                            for dx in range(2)], axis=0)
                 for dy in range(2)], axis=0)            # (dy, dx, Cin, Cout)
            phase_w.append(wt.reshape(4 * C, Cout))
    patches = jnp.stack(phase_patches, axis=0)           # (4, M, 4C)
    wm = jnp.stack(phase_w, axis=0)                      # (4, 4C, Cout)
    out_dtype = jnp.float32 if post_act == "tanh" else jnp.bfloat16
    y, stats = fused_conv_matmul(patches, wm, bias, "relu", post_act,
                                 emit_stats, out_dtype)
    y = (y.reshape(2, 2, N, H, W, Cout)
          .transpose(2, 3, 0, 4, 1, 5)
          .reshape(N, 2 * H, 2 * W, Cout))
    return y, stats, 4 * N * H * W


# ----------------------------------------------------------------------------
# U-Net blocks
# ----------------------------------------------------------------------------
def unet_block_forward(block, h_shifted, h_scale):
    """Block input is represented as (h_shifted, h_scale): semantic value
       = h_scale * h_shifted, with zeros staying semantic zeros so conv zero
       padding stays exact.  The leading LeakyReLU / ReLU of each path and the
       h_scale multiply both run inside the fused conv kernels."""
    p = block["params"]
    inner_nc = p["down_w"].shape[0]

    # down: [LeakyReLU] -> Conv2d -> [BatchNorm]
    pre = "none" if block["outermost"] else "leaky"
    need_dn_stats = not (block["outermost"] or block["innermost"])
    y_down, d_stats, d_count = conv_down_fused(h_shifted, h_scale, p["down_w"],
                                               pre, need_dn_stats)
    if need_dn_stats:
        a_dn, sos_dn = bn_affine_from_stats(d_stats, d_count,
                                            p["dn_gamma"], p["dn_beta"])
        d_shifted = y_down + sos_dn.astype(y_down.dtype)
        d_scale = a_dn
    else:
        d_shifted, d_scale = y_down, jnp.ones((inner_nc,), jnp.float32)

    # submodule
    if block["innermost"]:
        up_in_shifted, up_in_scale = d_shifted, d_scale
    else:
        up_in_shifted, up_in_scale = unet_block_forward(block["submodule"],
                                                        d_shifted, d_scale)

    # up: ReLU -> ConvTranspose2d -> [BatchNorm | Tanh]
    post = "tanh" if block["outermost"] else "none"
    need_up_stats = not block["outermost"]
    y_up, u_stats, u_count = conv_up_fused(up_in_shifted, up_in_scale,
                                           p["up_w"], p["up_b"], post,
                                           need_up_stats)
    if block["outermost"]:
        return y_up

    a_un, sos_un = bn_affine_from_stats(u_stats, u_count,
                                        p["un_gamma"], p["un_beta"])
    # TODO(synk): nn.Dropout(0.5) (training-mode, stochastic) for the num_downs-5
    # middle blocks is not modeled; none exist at num_downs=5.
    # Skip = torch.cat([leaky_relu(x) (inplace), up path], 1).  Carrying the raw
    # shifted input is exact because the parent applies ReLU before its upconv and
    # relu(leaky_relu(v)) == relu(v).
    return (jnp.concatenate([h_shifted, y_up + sos_un.astype(y_up.dtype)], axis=-1),
            jnp.concatenate([h_scale, a_un], axis=0))


def _rand_w(key, shape, scale=0.05):
    return (scale * jax.random.normal(key, shape)).astype(jnp.float32)


def make_block(key, outer_nc, inner_nc, input_nc=None, submodule=None,
               outermost=False, innermost=False, use_dropout=False):
    if input_nc is None:
        input_nc = outer_nc
    k1, k2, k3 = jax.random.split(key, 3)
    p = {}
    # downconv: Conv2d(input_nc, inner_nc, 4, 2, 1, bias=False)  (BatchNorm => no bias)
    p["down_w"] = _rand_w(k1, (inner_nc, input_nc, 4, 4))
    up_in = inner_nc if innermost else inner_nc * 2
    # upconv: ConvTranspose2d(up_in, outer_nc, 4, 2, 1); only the outermost has bias.
    p["up_w"] = _rand_w(k2, (up_in, outer_nc, 4, 4))
    p["up_b"] = _rand_w(k3, (outer_nc,)) if outermost \
        else jnp.zeros((outer_nc,), jnp.float32)
    if (not outermost) and (not innermost):
        p["dn_gamma"] = jnp.ones((inner_nc,), jnp.float32)
        p["dn_beta"] = jnp.zeros((inner_nc,), jnp.float32)
    if not outermost:
        p["un_gamma"] = jnp.ones((outer_nc,), jnp.float32)
        p["un_beta"] = jnp.zeros((outer_nc,), jnp.float32)
    return {"params": p, "submodule": submodule, "outermost": outermost,
            "innermost": innermost, "use_dropout": use_dropout}


def make_unet_generator(key, input_nc=6, output_nc=3, num_downs=5, ngf=8,
                        use_dropout=True):
    keys = iter(jax.random.split(key, num_downs + 1))
    block = make_block(next(keys), ngf * 8, ngf * 8, innermost=True)
    for _ in range(num_downs - 5):
        block = make_block(next(keys), ngf * 8, ngf * 8, submodule=block,
                           use_dropout=use_dropout)
    block = make_block(next(keys), ngf * 4, ngf * 8, submodule=block)
    block = make_block(next(keys), ngf * 2, ngf * 4, submodule=block)
    block = make_block(next(keys), ngf, ngf * 2, submodule=block)
    block = make_block(next(keys), output_nc, ngf, input_nc=input_nc,
                       submodule=block, outermost=True)
    return block


def unet_generator_forward(block, x_nchw):
    x = jnp.transpose(x_nchw, (0, 2, 3, 1)).astype(jnp.float32)   # NCHW -> NHWC
    ones = jnp.ones((x.shape[-1],), jnp.float32)
    y = unet_block_forward(block, x, ones)
    return jnp.transpose(y, (0, 3, 1, 2))                          # NHWC -> NCHW


# ----------------------------------------------------------------------------
if __name__ == "__main__":
    key = jax.random.PRNGKey(0)
    kp, kx = jax.random.split(key)

    # num_downs=5 (minimum the constructor supports), ngf=8, 32x32 -> 1x1 bottleneck.
    net = make_unet_generator(kp, input_nc=6, output_nc=3, num_downs=5, ngf=8,
                              use_dropout=True)

    x = jax.random.normal(kx, (2, 6, 32, 32), dtype=jnp.float32)

    fwd = jax.jit(lambda inp: unet_generator_forward(net, inp))
    y = fwd(x)
    jax.block_until_ready(y)

    assert y.shape == (2, 3, 32, 32), y.shape
    assert bool(jnp.all(jnp.isfinite(y)))
    print("KERNEL_OK")
</pallas_src>

<mosaic_0001>
module attributes {stable_mosaic.version = 11 : i64} {
  func.func @_fused_conv_matmul_kernel(%arg0: i32, %arg1: i32, %arg2: memref<1x512x96xbf16, #tpu.memory_space<vmem>>, %arg3: memref<1x96x128xbf16, #tpu.memory_space<vmem>>, %arg4: memref<1x128xf32, #tpu.memory_space<vmem>>, %arg5: memref<1x512x128xbf16, #tpu.memory_space<vmem>>) attributes {dimension_semantics = [#tpu.dimension_semantics<parallel>, #tpu.dimension_semantics<parallel>], iteration_bounds = array<i64: 1, 1>, scalar_prefetch = 0 : i64, scratch_operands = 0 : i64, tpu.core_type = #tpu.core_type<tc>, window_params = [{transform_indices = @transform_0, window_bounds = array<i64: 1, 512, 96>}, {transform_indices = @transform_1, window_bounds = array<i64: 1, 96, 128>}, {pipeline_mode = #tpu.pipeline_mode<synchronous>, transform_indices = @transform_2, window_bounds = array<i64: 1, 128>}, {transform_indices = @transform_3, window_bounds = array<i64: 1, 512, 128>}]} {
    %c0 = arith.constant 0 : index
    %c0_0 = arith.constant 0 : index
    %c0_1 = arith.constant 0 : index
    %0 = vector.load %arg2[%c0, %c0_0, %c0_1] : memref<1x512x96xbf16, #tpu.memory_space<vmem>>, vector<1x512x96xbf16>
    %1 = vector.shape_cast %0 : vector<1x512x96xbf16> to vector<512x96xbf16>
    %c0_2 = arith.constant 0 : index
    %c0_3 = arith.constant 0 : index
    %c0_4 = arith.constant 0 : index
    %2 = vector.load %arg3[%c0_2, %c0_3, %c0_4] : memref<1x96x128xbf16, #tpu.memory_space<vmem>>, vector<1x96x128xbf16>
    %3 = vector.shape_cast %2 : vector<1x96x128xbf16> to vector<96x128xbf16>
    %cst = arith.constant dense<0.000000e+00> : vector<512x128xf32>
    %4 = tpu.matmul %1, %3, %cst {dimension_numbers = #tpu.dot_dimension_numbers<[1], [0], [0], [1], [0, 0, 1, 1], [], []>} : vector<512x96xbf16>, vector<96x128xbf16>, vector<512x128xf32> -> vector<512x128xf32>
    %c0_5 = arith.constant 0 : index
    %c0_6 = arith.constant 0 : index
    %5 = vector.load %arg4[%c0_5, %c0_6] : memref<1x128xf32, #tpu.memory_space<vmem>>, vector<1x128xf32>
    %6 = vector.broadcast %5 : vector<1x128xf32> to vector<512x128xf32>
    %7 = arith.addf %4, %6 : vector<512x128xf32>
    %8 = arith.truncf %7 : vector<512x128xf32> to vector<512x128xbf16>
    %c0_7 = arith.constant 0 : index
    %c0_8 = arith.constant 0 : index
    %c0_9 = arith.constant 0 : index
    %9 = vector.load %arg5[%c0_7, %c0_8, %c0_9] : memref<1x512x128xbf16, #tpu.memory_space<vmem>>, vector<1x512x128xbf16>
    %10 = vector.shape_cast %9 : vector<1x512x128xbf16> to vector<512x128xbf16>
    %11 = vector.shape_cast %8 : vector<512x128xbf16> to vector<1x512x128xbf16>
    tpu.vector_store %arg5[%c0_7, %c0_8, %c0_9], %11 {strides = array<i32>} : memref<1x512x128xbf16, #tpu.memory_space<vmem>>, vector<1x512x128xbf16>,
    return
  }
  func.func @transform_0(%arg0: i32, %arg1: i32) -> (i32, i32, i32) {
    %c0_i32 = arith.constant 0 : i32
    %c0_i32_0 = arith.constant 0 : i32
    return %arg0, %arg1, %c0_i32 : i32, i32, i32
  }
  func.func @transform_1(%arg0: i32, %arg1: i32) -> (i32, i32, i32) {
    %c0_i32 = arith.constant 0 : i32
    %c0_i32_0 = arith.constant 0 : i32
    %c0_i32_1 = arith.constant 0 : i32
    return %arg0, %c0_i32, %c0_i32_0 : i32, i32, i32
  }
  func.func @transform_2(%arg0: i32, %arg1: i32) -> (i32, i32) {
    %c0_i32 = arith.constant 0 : i32
    %c0_i32_0 = arith.constant 0 : i32
    %c0_i32_1 = arith.constant 0 : i32
    return %c0_i32, %c0_i32_0 : i32, i32
  }
  func.func @transform_3(%arg0: i32, %arg1: i32) -> (i32, i32, i32) {
    %c0_i32 = arith.constant 0 : i32
    %c0_i32_0 = arith.constant 0 : i32
    return %arg0, %arg1, %c0_i32 : i32, i32, i32
  }
}

module attributes {stable_mosaic.version = 11 : i64} {
  func.func @_fused_conv_matmul_kernel(%arg0: i32, %arg1: i32, %arg2: memref<1x128x128xbf16, #tpu.memory_space<vmem>>, %arg3: memref<1x128x128xbf16, #tpu.memory_space<vmem>>, %arg4: memref<1x128xf32, #tpu.memory_space<vmem>>, %arg5: memref<1x128x128xbf16, #tpu.memory_space<vmem>>, %arg6: memref<1x1x2x128xf32, #tpu.memory_space<vmem>>) attributes {dimension_semantics = [#tpu.dimension_semantics<parallel>, #tpu.dimension_semantics<parallel>], iteration_bounds = array<i64: 1, 1>, scalar_prefetch = 0 : i64, scratch_operands = 0 : i64, tpu.core_type = #tpu.core_type<tc>, window_params = [{transform_indices = @transform_0, window_bounds = array<i64: 1, 128, 128>}, {transform_indices = @transform_1, window_bounds = array<i64: 1, 128, 128>}, {pipeline_mode = #tpu.pipeline_mode<synchronous>, transform_indices = @transform_2, window_bounds = array<i64: 1, 128>}, {transform_indices = @transform_3, window_bounds = array<i64: 1, 128, 128>}, {transform_indices = @transform_4, window_bounds = array<i64: 1, 1, 2, 128>}]} {
    %c0 = arith.constant 0 : index
    %c0_0 = arith.constant 0 : index
    %c0_1 = arith.constant 0 : index
    %0 = vector.load %arg2[%c0, %c0_0, %c0_1] : memref<1x128x128xbf16, #tpu.memory_space<vmem>>, vector<1x128x128xbf16>
    %1 = vector.shape_cast %0 : vector<1x128x128xbf16> to vector<128x128xbf16>
    %2 = arith.extf %1 : vector<128x128xbf16> to vector<128x128xf32>
    %cst = arith.constant 0.000000e+00 : f32
    %3 = vector.broadcast %cst : f32 to vector<128x128xf32>
    %4 = arith.cmpf oge, %2, %3 : vector<128x128xf32>
    %cst_2 = arith.constant 2.000000e-01 : f32
    %5 = vector.broadcast %cst_2 : f32 to vector<128x128xf32>
    %6 = arith.mulf %5, %2 : vector<128x128xf32>
    %7 = arith.select %4, %2, %6 : vector<128x128xi1>, vector<128x128xf32>
    %8 = arith.truncf %7 : vector<128x128xf32> to vector<128x128xbf16>
    %c0_3 = arith.constant 0 : index
    %c0_4 = arith.constant 0 : index
    %c0_5 = arith.constant 0 : index
    %9 = vector.load %arg3[%c0_3, %c0_4, %c0_5] : memref<1x128x128xbf16, #tpu.memory_space<vmem>>, vector<1x128x128xbf16>
    %10 = vector.shape_cast %9 : vector<1x128x128xbf16> to vector<128x128xbf16>
    %cst_6 = arith.constant dense<0.000000e+00> : vector<128x128xf32>
    %11 = tpu.matmul %8, %10, %cst_6 {dimension_numbers = #tpu.dot_dimension_numbers<[1], [0], [0], [1], [0, 0, 1, 1], [], []>} : vector<128x128xbf16>, vector<128x128xbf16>, vector<128x128xf32> -> vector<128x128xf32>
    %c0_7 = arith.constant 0 : index
    %c0_8 = arith.constant 0 : index
    %12 = vector.load %arg4[%c0_7, %c0_8] : memref<1x128xf32, #tpu.memory_space<vmem>>, vector<1x128xf32>
    %13 = vector.broadcast %12 : vector<1x128xf32> to vector<128x128xf32>
    %14 = arith.addf %11, %13 : vector<128x128xf32>
    %cst_9 = arith.constant dense<0.000000e+00> : vector<128xf32>
    %15 = vector.multi_reduction <add>, %14, %cst_9 [0] : vector<128x128xf32> to vector<128xf32>
    %16 = vector.shape_cast %15 : vector<128xf32> to vector<1x128xf32>
    %c0_10 = arith.constant 0 : index
    %c0_11 = arith.constant 0 : index
    %c0_12 = arith.constant 0 : index
    %c0_13 = arith.constant 0 : index
    %17 = vector.load %arg6[%c0_10, %c0_11, %c0_12, %c0_13] : memref<1x1x2x128xf32, #tpu.memory_space<vmem>>, vector<1x1x1x128xf32>
    %18 = vector.shape_cast %17 : vector<1x1x1x128xf32> to vector<1x128xf32>
    %19 = vector.shape_cast %16 : vector<1x128xf32> to vector<1x1x1x128xf32>
    tpu.vector_store %arg6[%c0_10, %c0_11, %c0_12, %c0_13], %19 {strides = array<i32>} : memref<1x1x2x128xf32, #tpu.memory_space<vmem>>, vector<1x1x1x128xf32>,
    %20 = arith.mulf %14, %14 : vector<128x128xf32>
    %cst_14 = arith.constant dense<0.000000e+00> : vector<128xf32>
    %21 = vector.multi_reduction <add>, %20, %cst_14 [0] : vector<128x128xf32> to vector<128xf32>
    %22 = vector.shape_cast %21 : vector<128xf32> to vector<1x128xf32>
    %c0_15 = arith.constant 0 : index
    %c0_16 = arith.constant 0 : index
    %c1 = arith.constant 1 : index
    %c0_17 = arith.constant 0 : index
    %23 = vector.load %arg6[%c0_15, %c0_16, %c1, %c0_17] : memref<1x1x2x128xf32, #tpu.memory_space<vmem>>, vector<1x1x1x128xf32>
    %24 = vector.shape_cast %23 : vector<1x1x1x128xf32> to vector<1x128xf32>
    %25 = vector.shape_cast %22 : vector<1x128xf32> to vector<1x1x1x128xf32>
    tpu.vector_store %arg6[%c0_15, %c0_16, %c1, %c0_17], %25 {strides = array<i32>} : memref<1x1x2x128xf32, #tpu.memory_space<vmem>>, vector<1x1x1x128xf32>,
    %26 = arith.truncf %14 : vector<128x128xf32> to vector<128x128xbf16>
    %c0_18 = arith.constant 0 : index
    %c0_19 = arith.constant 0 : index
    %c0_20 = arith.constant 0 : index
    %27 = vector.load %arg5[%c0_18, %c0_19, %c0_20] : memref<1x128x128xbf16, #tpu.memory_space<vmem>>, vector<1x128x128xbf16>
    %28 = vector.shape_cast %27 : vector<1x128x128xbf16> to vector<128x128xbf16>
    %29 = vector.shape_cast %26 : vector<128x128xbf16> to vector<1x128x128xbf16>
    tpu.vector_store %arg5[%c0_18, %c0_19, %c0_20], %29 {strides = array<i32>} : memref<1x128x128xbf16, #tpu.memory_space<vmem>>, vector<1x128x128xbf16>,
    return
  }
  func.func @transform_0(%arg0: i32, %arg1: i32) -> (i32, i32, i32) {
    %c0_i32 = arith.constant 0 : i32
    %c0_i32_0 = arith.constant 0 : i32
    return %arg0, %arg1, %c0_i32 : i32, i32, i32
  }
  func.func @transform_1(%arg0: i32, %arg1: i32) -> (i32, i32, i32) {
    %c0_i32 = arith.constant 0 : i32
    %c0_i32_0 = arith.constant 0 : i32
    %c0_i32_1 = arith.constant 0 : i32
    return %arg0, %c0_i32, %c0_i32_0 : i32, i32, i32
  }
  func.func @transform_2(%arg0: i32, %arg1: i32) -> (i32, i32) {
    %c0_i32 = arith.constant 0 : i32
    %c0_i32_0 = arith.constant 0 : i32
    %c0_i32_1 = arith.constant 0 : i32
    return %c0_i32, %c0_i32_0 : i32, i32
  }
  func.func @transform_3(%arg0: i32, %arg1: i32) -> (i32, i32, i32) {
    %c0_i32 = arith.constant 0 : i32
    %c0_i32_0 = arith.constant 0 : i32
    return %arg0, %arg1, %c0_i32 : i32, i32, i32
  }
  func.func @transform_4(%arg0: i32, %arg1: i32) -> (i32, i32, i32, i32) {
    %c0_i32 = arith.constant 0 : i32
    %c0_i32_0 = arith.constant 0 : i32
    %c0_i32_1 = arith.constant 0 : i32
    return %arg0, %arg1, %c0_i32, %c0_i32_0 : i32, i32, i32, i32
  }
}

module attributes {stable_mosaic.version = 11 : i64} {
  func.func @_fused_conv_matmul_kernel(%arg0: i32, %arg1: i32, %arg2: memref<1x32x256xbf16, #tpu.memory_space<vmem>>, %arg3: memref<1x256x128xbf16, #tpu.memory_space<vmem>>, %arg4: memref<1x128xf32, #tpu.memory_space<vmem>>, %arg5: memref<1x32x128xbf16, #tpu.memory_space<vmem>>, %arg6: memref<1x1x2x128xf32, #tpu.memory_space<vmem>>) attributes {dimension_semantics = [#tpu.dimension_semantics<parallel>, #tpu.dimension_semantics<parallel>], iteration_bounds = array<i64: 1, 1>, scalar_prefetch = 0 : i64, scratch_operands = 0 : i64, tpu.core_type = #tpu.core_type<tc>, window_params = [{transform_indices = @transform_0, window_bounds = array<i64: 1, 32, 256>}, {transform_indices = @transform_1, window_bounds = array<i64: 1, 256, 128>}, {pipeline_mode = #tpu.pipeline_mode<synchronous>, transform_indices = @transform_2, window_bounds = array<i64: 1, 128>}, {transform_indices = @transform_3, window_bounds = array<i64: 1, 32, 128>}, {transform_indices = @transform_4, window_bounds = array<i64: 1, 1, 2, 128>}]} {
    %c0 = arith.constant 0 : index
    %c0_0 = arith.constant 0 : index
    %c0_1 = arith.constant 0 : index
    %0 = vector.load %arg2[%c0, %c0_0, %c0_1] : memref<1x32x256xbf16, #tpu.memory_space<vmem>>, vector<1x32x256xbf16>
    %1 = vector.shape_cast %0 : vector<1x32x256xbf16> to vector<32x256xbf16>
    %2 = arith.extf %1 : vector<32x256xbf16> to vector<32x256xf32>
    %cst = arith.constant 0.000000e+00 : f32
    %3 = vector.broadcast %cst : f32 to vector<32x256xf32>
    %4 = arith.cmpf oge, %2, %3 : vector<32x256xf32>
    %cst_2 = arith.constant 2.000000e-01 : f32
    %5 = vector.broadcast %cst_2 : f32 to vector<32x256xf32>
    %6 = arith.mulf %5, %2 : vector<32x256xf32>
    %7 = arith.select %4, %2, %6 : vector<32x256xi1>, vector<32x256xf32>
    %8 = arith.truncf %7 : vector<32x256xf32> to vector<32x256xbf16>
    %c0_3 = arith.constant 0 : index
    %c0_4 = arith.constant 0 : index
    %c0_5 = arith.constant 0 : index
    %9 = vector.load %arg3[%c0_3, %c0_4, %c0_5] : memref<1x256x128xbf16, #tpu.memory_space<vmem>>, vector<1x256x128xbf16>
    %10 = vector.shape_cast %9 : vector<1x256x128xbf16> to vector<256x128xbf16>
    %cst_6 = arith.constant dense<0.000000e+00> : vector<32x128xf32>
    %11 = tpu.matmul %8, %10, %cst_6 {dimension_numbers = #tpu.dot_dimension_numbers<[1], [0], [0], [1], [0, 0, 1, 1], [], []>} : vector<32x256xbf16>, vector<256x128xbf16>, vector<32x128xf32> -> vector<32x128xf32>
    %c0_7 = arith.constant 0 : index
    %c0_8 = arith.constant 0 : index
    %12 = vector.load %arg4[%c0_7, %c0_8] : memref<1x128xf32, #tpu.memory_space<vmem>>, vector<1x128xf32>
    %13 = vector.broadcast %12 : vector<1x128xf32> to vector<32x128xf32>
    %14 = arith.addf %11, %13 : vector<32x128xf32>
    %cst_9 = arith.constant dense<0.000000e+00> : vector<128xf32>
    %15 = vector.multi_reduction <add>, %14, %cst_9 [0] : vector<32x128xf32> to vector<128xf32>
    %16 = vector.shape_cast %15 : vector<128xf32> to vector<1x128xf32>
    %c0_10 = arith.constant 0 : index
    %c0_11 = arith.constant 0 : index
    %c0_12 = arith.constant 0 : index
    %c0_13 = arith.constant 0 : index
    %17 = vector.load %arg6[%c0_10, %c0_11, %c0_12, %c0_13] : memref<1x1x2x128xf32, #tpu.memory_space<vmem>>, vector<1x1x1x128xf32>
    %18 = vector.shape_cast %17 : vector<1x1x1x128xf32> to vector<1x128xf32>
    %19 = vector.shape_cast %16 : vector<1x128xf32> to vector<1x1x1x128xf32>
    tpu.vector_store %arg6[%c0_10, %c0_11, %c0_12, %c0_13], %19 {strides = array<i32>} : memref<1x1x2x128xf32, #tpu.memory_space<vmem>>, vector<1x1x1x128xf32>,
    %20 = arith.mulf %14, %14 : vector<32x128xf32>
    %cst_14 = arith.constant dense<0.000000e+00> : vector<128xf32>
    %21 = vector.multi_reduction <add>, %20, %cst_14 [0] : vector<32x128xf32> to vector<128xf32>
    %22 = vector.shape_cast %21 : vector<128xf32> to vector<1x128xf32>
    %c0_15 = arith.constant 0 : index
    %c0_16 = arith.constant 0 : index
    %c1 = arith.constant 1 : index
    %c0_17 = arith.constant 0 : index
    %23 = vector.load %arg6[%c0_15, %c0_16, %c1, %c0_17] : memref<1x1x2x128xf32, #tpu.memory_space<vmem>>, vector<1x1x1x128xf32>
    %24 = vector.shape_cast %23 : vector<1x1x1x128xf32> to vector<1x128xf32>
    %25 = vector.shape_cast %22 : vector<1x128xf32> to vector<1x1x1x128xf32>
    tpu.vector_store %arg6[%c0_15, %c0_16, %c1, %c0_17], %25 {strides = array<i32>} : memref<1x1x2x128xf32, #tpu.memory_space<vmem>>, vector<1x1x1x128xf32>,
    %26 = arith.truncf %14 : vector<32x128xf32> to vector<32x128xbf16>
    %c0_18 = arith.constant 0 : index
    %c0_19 = arith.constant 0 : index
    %c0_20 = arith.constant 0 : index
    %27 = vector.load %arg5[%c0_18, %c0_19, %c0_20] : memref<1x32x128xbf16, #tpu.memory_space<vmem>>, vector<1x32x128xbf16>
    %28 = vector.shape_cast %27 : vector<1x32x128xbf16> to vector<32x128xbf16>
    %29 = vector.shape_cast %26 : vector<32x128xbf16> to vector<1x32x128xbf16>
    tpu.vector_store %arg5[%c0_18, %c0_19, %c0_20], %29 {strides = array<i32>} : memref<1x32x128xbf16, #tpu.memory_space<vmem>>, vector<1x32x128xbf16>,
    return
  }
  func.func @transform_0(%arg0: i32, %arg1: i32) -> (i32, i32, i32) {
    %c0_i32 = arith.constant 0 : i32
    %c0_i32_0 = arith.constant 0 : i32
    return %arg0, %arg1, %c0_i32 : i32, i32, i32
  }
  func.func @transform_1(%arg0: i32, %arg1: i32) -> (i32, i32, i32) {
    %c0_i32 = arith.constant 0 : i32
    %c0_i32_0 = arith.constant 0 : i32
    %c0_i32_1 = arith.constant 0 : i32
    return %arg0, %c0_i32, %c0_i32_0 : i32, i32, i32
  }
  func.func @transform_2(%arg0: i32, %arg1: i32) -> (i32, i32) {
    %c0_i32 = arith.constant 0 : i32
    %c0_i32_0 = arith.constant 0 : i32
    %c0_i32_1 = arith.constant 0 : i32
    return %c0_i32, %c0_i32_0 : i32, i32
  }
  func.func @transform_3(%arg0: i32, %arg1: i32) -> (i32, i32, i32) {
    %c0_i32 = arith.constant 0 : i32
    %c0_i32_0 = arith.constant 0 : i32
    return %arg0, %arg1, %c0_i32 : i32, i32, i32
  }
  func.func @transform_4(%arg0: i32, %arg1: i32) -> (i32, i32, i32, i32) {
    %c0_i32 = arith.constant 0 : i32
    %c0_i32_0 = arith.constant 0 : i32
    %c0_i32_1 = arith.constant 0 : i32
    return %arg0, %arg1, %c0_i32, %c0_i32_0 : i32, i32, i32, i32
  }
}

module attributes {stable_mosaic.version = 11 : i64} {
  func.func @_fused_conv_matmul_kernel(%arg0: i32, %arg1: i32, %arg2: memref<1x8x512xbf16, #tpu.memory_space<vmem>>, %arg3: memref<1x512x128xbf16, #tpu.memory_space<vmem>>, %arg4: memref<1x128xf32, #tpu.memory_space<vmem>>, %arg5: memref<1x8x128xbf16, #tpu.memory_space<vmem>>, %arg6: memref<1x1x2x128xf32, #tpu.memory_space<vmem>>) attributes {dimension_semantics = [#tpu.dimension_semantics<parallel>, #tpu.dimension_semantics<parallel>], iteration_bounds = array<i64: 1, 1>, scalar_prefetch = 0 : i64, scratch_operands = 0 : i64, tpu.core_type = #tpu.core_type<tc>, window_params = [{transform_indices = @transform_0, window_bounds = array<i64: 1, 8, 512>}, {transform_indices = @transform_1, window_bounds = array<i64: 1, 512, 128>}, {pipeline_mode = #tpu.pipeline_mode<synchronous>, transform_indices = @transform_2, window_bounds = array<i64: 1, 128>}, {transform_indices = @transform_3, window_bounds = array<i64: 1, 8, 128>}, {transform_indices = @transform_4, window_bounds = array<i64: 1, 1, 2, 128>}]} {
    %c0 = arith.constant 0 : index
    %c0_0 = arith.constant 0 : index
    %c0_1 = arith.constant 0 : index
    %0 = vector.load %arg2[%c0, %c0_0, %c0_1] : memref<1x8x512xbf16, #tpu.memory_space<vmem>>, vector<1x8x512xbf16>
    %1 = vector.shape_cast %0 : vector<1x8x512xbf16> to vector<8x512xbf16>
    %2 = arith.extf %1 : vector<8x512xbf16> to vector<8x512xf32>
    %cst = arith.constant 0.000000e+00 : f32
    %3 = vector.broadcast %cst : f32 to vector<8x512xf32>
    %4 = arith.cmpf oge, %2, %3 : vector<8x512xf32>
    %cst_2 = arith.constant 2.000000e-01 : f32
    %5 = vector.broadcast %cst_2 : f32 to vector<8x512xf32>
    %6 = arith.mulf %5, %2 : vector<8x512xf32>
    %7 = arith.select %4, %2, %6 : vector<8x512xi1>, vector<8x512xf32>
    %8 = arith.truncf %7 : vector<8x512xf32> to vector<8x512xbf16>
    %c0_3 = arith.constant 0 : index
    %c0_4 = arith.constant 0 : index
    %c0_5 = arith.constant 0 : index
    %9 = vector.load %arg3[%c0_3, %c0_4, %c0_5] : memref<1x512x128xbf16, #tpu.memory_space<vmem>>, vector<1x512x128xbf16>
    %10 = vector.shape_cast %9 : vector<1x512x128xbf16> to vector<512x128xbf16>
    %cst_6 = arith.constant dense<0.000000e+00> : vector<8x128xf32>
    %11 = tpu.matmul %8, %10, %cst_6 {dimension_numbers = #tpu.dot_dimension_numbers<[1], [0], [0], [1], [0, 0, 1, 1], [], []>} : vector<8x512xbf16>, vector<512x128xbf16>, vector<8x128xf32> -> vector<8x128xf32>
    %c0_7 = arith.constant 0 : index
    %c0_8 = arith.constant 0 : index
    %12 = vector.load %arg4[%c0_7, %c0_8] : memref<1x128xf32, #tpu.memory_space<vmem>>, vector<1x128xf32>
    %13 = vector.broadcast %12 : vector<1x128xf32> to vector<8x128xf32>
    %14 = arith.addf %11, %13 : vector<8x128xf32>
    %cst_9 = arith.constant dense<0.000000e+00> : vector<128xf32>
    %15 = vector.multi_reduction <add>, %14, %cst_9 [0] : vector<8x128xf32> to vector<128xf32>
    %16 = vector.shape_cast %15 : vector<128xf32> to vector<1x128xf32>
    %c0_10 = arith.constant 0 : index
    %c0_11 = arith.constant 0 : index
    %c0_12 = arith.constant 0 : index
    %c0_13 = arith.constant 0 : index
    %17 = vector.load %arg6[%c0_10, %c0_11, %c0_12, %c0_13] : memref<1x1x2x128xf32, #tpu.memory_space<vmem>>, vector<1x1x1x128xf32>
    %18 = vector.shape_cast %17 : vector<1x1x1x128xf32> to vector<1x128xf32>
    %19 = vector.shape_cast %16 : vector<1x128xf32> to vector<1x1x1x128xf32>
    tpu.vector_store %arg6[%c0_10, %c0_11, %c0_12, %c0_13], %19 {strides = array<i32>} : memref<1x1x2x128xf32, #tpu.memory_space<vmem>>, vector<1x1x1x128xf32>,
    %20 = arith.mulf %14, %14 : vector<8x128xf32>
    %cst_14 = arith.constant dense<0.000000e+00> : vector<128xf32>
    %21 = vector.multi_reduction <add>, %20, %cst_14 [0] : vector<8x128xf32> to vector<128xf32>
    %22 = vector.shape_cast %21 : vector<128xf32> to vector<1x128xf32>
    %c0_15 = arith.constant 0 : index
    %c0_16 = arith.constant 0 : index
    %c1 = arith.constant 1 : index
    %c0_17 = arith.constant 0 : index
    %23 = vector.load %arg6[%c0_15, %c0_16, %c1, %c0_17] : memref<1x1x2x128xf32, #tpu.memory_space<vmem>>, vector<1x1x1x128xf32>
    %24 = vector.shape_cast %23 : vector<1x1x1x128xf32> to vector<1x128xf32>
    %25 = vector.shape_cast %22 : vector<1x128xf32> to vector<1x1x1x128xf32>
    tpu.vector_store %arg6[%c0_15, %c0_16, %c1, %c0_17], %25 {strides = array<i32>} : memref<1x1x2x128xf32, #tpu.memory_space<vmem>>, vector<1x1x1x128xf32>,
    %26 = arith.truncf %14 : vector<8x128xf32> to vector<8x128xbf16>
    %c0_18 = arith.constant 0 : index
    %c0_19 = arith.constant 0 : index
    %c0_20 = arith.constant 0 : index
    %27 = vector.load %arg5[%c0_18, %c0_19, %c0_20] : memref<1x8x128xbf16, #tpu.memory_space<vmem>>, vector<1x8x128xbf16>
    %28 = vector.shape_cast %27 : vector<1x8x128xbf16> to vector<8x128xbf16>
    %29 = vector.shape_cast %26 : vector<8x128xbf16> to vector<1x8x128xbf16>
    tpu.vector_store %arg5[%c0_18, %c0_19, %c0_20], %29 {strides = array<i32>} : memref<1x8x128xbf16, #tpu.memory_space<vmem>>, vector<1x8x128xbf16>,
    return
  }
  func.func @transform_0(%arg0: i32, %arg1: i32) -> (i32, i32, i32) {
    %c0_i32 = arith.constant 0 : i32
    %c0_i32_0 = arith.constant 0 : i32
    return %arg0, %arg1, %c0_i32 : i32, i32, i32
  }
  func.func @transform_1(%arg0: i32, %arg1: i32) -> (i32, i32, i32) {
    %c0_i32 = arith.constant 0 : i32
    %c0_i32_0 = arith.constant 0 : i32
    %c0_i32_1 = arith.constant 0 : i32
    return %arg0, %c0_i32, %c0_i32_0 : i32, i32, i32
  }
  func.func @transform_2(%arg0: i32, %arg1: i32) -> (i32, i32) {
    %c0_i32 = arith.constant 0 : i32
    %c0_i32_0 = arith.constant 0 : i32
    %c0_i32_1 = arith.constant 0 : i32
    return %c0_i32, %c0_i32_0 : i32, i32
  }
  func.func @transform_3(%arg0: i32, %arg1: i32) -> (i32, i32, i32) {
    %c0_i32 = arith.constant 0 : i32
    %c0_i32_0 = arith.constant 0 : i32
    return %arg0, %arg1, %c0_i32 : i32, i32, i32
  }
  func.func @transform_4(%arg0: i32, %arg1: i32) -> (i32, i32, i32, i32) {
    %c0_i32 = arith.constant 0 : i32
    %c0_i32_0 = arith.constant 0 : i32
    %c0_i32_1 = arith.constant 0 : i32
    return %arg0, %arg1, %c0_i32, %c0_i32_0 : i32, i32, i32, i32
  }
}

module attributes {stable_mosaic.version = 11 : i64} {
  func.func @_fused_conv_matmul_kernel(%arg0: i32, %arg1: i32, %arg2: memref<1x8x1024xbf16, #tpu.memory_space<vmem>>, %arg3: memref<1x1024x128xbf16, #tpu.memory_space<vmem>>, %arg4: memref<1x128xf32, #tpu.memory_space<vmem>>, %arg5: memref<1x8x128xbf16, #tpu.memory_space<vmem>>) attributes {dimension_semantics = [#tpu.dimension_semantics<parallel>, #tpu.dimension_semantics<parallel>], iteration_bounds = array<i64: 1, 1>, scalar_prefetch = 0 : i64, scratch_operands = 0 : i64, tpu.core_type = #tpu.core_type<tc>, window_params = [{transform_indices = @transform_0, window_bounds = array<i64: 1, 8, 1024>}, {transform_indices = @transform_1, window_bounds = array<i64: 1, 1024, 128>}, {pipeline_mode = #tpu.pipeline_mode<synchronous>, transform_indices = @transform_2, window_bounds = array<i64: 1, 128>}, {transform_indices = @transform_3, window_bounds = array<i64: 1, 8, 128>}]} {
    %c0 = arith.constant 0 : index
    %c0_0 = arith.constant 0 : index
    %c0_1 = arith.constant 0 : index
    %0 = vector.load %arg2[%c0, %c0_0, %c0_1] : memref<1x8x1024xbf16, #tpu.memory_space<vmem>>, vector<1x8x1024xbf16>
    %1 = vector.shape_cast %0 : vector<1x8x1024xbf16> to vector<8x1024xbf16>
    %2 = arith.extf %1 : vector<8x1024xbf16> to vector<8x1024xf32>
    %cst = arith.constant 0.000000e+00 : f32
    %3 = vector.broadcast %cst : f32 to vector<8x1024xf32>
    %4 = arith.cmpf oge, %2, %3 : vector<8x1024xf32>
    %cst_2 = arith.constant 2.000000e-01 : f32
    %5 = vector.broadcast %cst_2 : f32 to vector<8x1024xf32>
    %6 = arith.mulf %5, %2 : vector<8x1024xf32>
    %7 = arith.select %4, %2, %6 : vector<8x1024xi1>, vector<8x1024xf32>
    %8 = arith.truncf %7 : vector<8x1024xf32> to vector<8x1024xbf16>
    %c0_3 = arith.constant 0 : index
    %c0_4 = arith.constant 0 : index
    %c0_5 = arith.constant 0 : index
    %9 = vector.load %arg3[%c0_3, %c0_4, %c0_5] : memref<1x1024x128xbf16, #tpu.memory_space<vmem>>, vector<1x1024x128xbf16>
    %10 = vector.shape_cast %9 : vector<1x1024x128xbf16> to vector<1024x128xbf16>
    %cst_6 = arith.constant dense<0.000000e+00> : vector<8x128xf32>
    %11 = tpu.matmul %8, %10, %cst_6 {dimension_numbers = #tpu.dot_dimension_numbers<[1], [0], [0], [1], [0, 0, 1, 1], [], []>} : vector<8x1024xbf16>, vector<1024x128xbf16>, vector<8x128xf32> -> vector<8x128xf32>
    %c0_7 = arith.constant 0 : index
    %c0_8 = arith.constant 0 : index
    %12 = vector.load %arg4[%c0_7, %c0_8] : memref<1x128xf32, #tpu.memory_space<vmem>>, vector<1x128xf32>
    %13 = vector.broadcast %12 : vector<1x128xf32> to vector<8x128xf32>
    %14 = arith.addf %11, %13 : vector<8x128xf32>
    %15 = arith.truncf %14 : vector<8x128xf32> to vector<8x128xbf16>
    %c0_9 = arith.constant 0 : index
    %c0_10 = arith.constant 0 : index
    %c0_11 = arith.constant 0 : index
    %16 = vector.load %arg5[%c0_9, %c0_10, %c0_11] : memref<1x8x128xbf16, #tpu.memory_space<vmem>>, vector<1x8x128xbf16>
    %17 = vector.shape_cast %16 : vector<1x8x128xbf16> to vector<8x128xbf16>
    %18 = vector.shape_cast %15 : vector<8x128xbf16> to vector<1x8x128xbf16>
    tpu.vector_store %arg5[%c0_9, %c0_10, %c0_11], %18 {strides = array<i32>} : memref<1x8x128xbf16, #tpu.memory_space<vmem>>, vector<1x8x128xbf16>,
    return
  }
  func.func @transform_0(%arg0: i32, %arg1: i32) -> (i32, i32, i32) {
    %c0_i32 = arith.constant 0 : i32
    %c0_i32_0 = arith.constant 0 : i32
    return %arg0, %arg1, %c0_i32 : i32, i32, i32
  }
  func.func @transform_1(%arg0: i32, %arg1: i32) -> (i32, i32, i32) {
    %c0_i32 = arith.constant 0 : i32
    %c0_i32_0 = arith.constant 0 : i32
    %c0_i32_1 = arith.constant 0 : i32
    return %arg0, %c0_i32, %c0_i32_0 : i32, i32, i32
  }
  func.func @transform_2(%arg0: i32, %arg1: i32) -> (i32, i32) {
    %c0_i32 = arith.constant 0 : i32
    %c0_i32_0 = arith.constant 0 : i32
    %c0_i32_1 = arith.constant 0 : i32
    return %c0_i32, %c0_i32_0 : i32, i32
  }
  func.func @transform_3(%arg0: i32, %arg1: i32) -> (i32, i32, i32) {
    %c0_i32 = arith.constant 0 : i32
    %c0_i32_0 = arith.constant 0 : i32
    return %arg0, %arg1, %c0_i32 : i32, i32, i32
  }
}

module attributes {stable_mosaic.version = 11 : i64} {
  func.func @_fused_conv_matmul_kernel(%arg0: i32, %arg1: i32, %arg2: memref<1x8x256xbf16, #tpu.memory_space<vmem>>, %arg3: memref<1x256x128xbf16, #tpu.memory_space<vmem>>, %arg4: memref<1x128xf32, #tpu.memory_space<vmem>>, %arg5: memref<1x8x128xbf16, #tpu.memory_space<vmem>>, %arg6: memref<1x1x2x128xf32, #tpu.memory_space<vmem>>) attributes {dimension_semantics = [#tpu.dimension_semantics<parallel>, #tpu.dimension_semantics<parallel>], iteration_bounds = array<i64: 4, 1>, scalar_prefetch = 0 : i64, scratch_operands = 0 : i64, tpu.core_type = #tpu.core_type<tc>, window_params = [{transform_indices = @transform_0, window_bounds = array<i64: 1, 8, 256>}, {transform_indices = @transform_1, window_bounds = array<i64: 1, 256, 128>}, {pipeline_mode = #tpu.pipeline_mode<synchronous>, transform_indices = @transform_2, window_bounds = array<i64: 1, 128>}, {transform_indices = @transform_3, window_bounds = array<i64: 1, 8, 128>}, {transform_indices = @transform_4, window_bounds = array<i64: 1, 1, 2, 128>}]} {
    %c0 = arith.constant 0 : index
    %c0_0 = arith.constant 0 : index
    %c0_1 = arith.constant 0 : index
    %0 = vector.load %arg2[%c0, %c0_0, %c0_1] : memref<1x8x256xbf16, #tpu.memory_space<vmem>>, vector<1x8x256xbf16>
    %1 = vector.shape_cast %0 : vector<1x8x256xbf16> to vector<8x256xbf16>
    %2 = arith.extf %1 : vector<8x256xbf16> to vector<8x256xf32>
    %cst = arith.constant 0.000000e+00 : f32
    %3 = vector.broadcast %cst : f32 to vector<8x256xf32>
    %4 = arith.maximumf %2, %3 : vector<8x256xf32>
    %5 = arith.truncf %4 : vector<8x256xf32> to vector<8x256xbf16>
    %c0_2 = arith.constant 0 : index
    %c0_3 = arith.constant 0 : index
    %c0_4 = arith.constant 0 : index
    %6 = vector.load %arg3[%c0_2, %c0_3, %c0_4] : memref<1x256x128xbf16, #tpu.memory_space<vmem>>, vector<1x256x128xbf16>
    %7 = vector.shape_cast %6 : vector<1x256x128xbf16> to vector<256x128xbf16>
    %cst_5 = arith.constant dense<0.000000e+00> : vector<8x128xf32>
    %8 = tpu.matmul %5, %7, %cst_5 {dimension_numbers = #tpu.dot_dimension_numbers<[1], [0], [0], [1], [0, 0, 1, 1], [], []>} : vector<8x256xbf16>, vector<256x128xbf16>, vector<8x128xf32> -> vector<8x128xf32>
    %c0_6 = arith.constant 0 : index
    %c0_7 = arith.constant 0 : index
    %9 = vector.load %arg4[%c0_6, %c0_7] : memref<1x128xf32, #tpu.memory_space<vmem>>, vector<1x128xf32>
    %10 = vector.broadcast %9 : vector<1x128xf32> to vector<8x128xf32>
    %11 = arith.addf %8, %10 : vector<8x128xf32>
    %cst_8 = arith.constant dense<0.000000e+00> : vector<128xf32>
    %12 = vector.multi_reduction <add>, %11, %cst_8 [0] : vector<8x128xf32> to vector<128xf32>
    %13 = vector.shape_cast %12 : vector<128xf32> to vector<1x128xf32>
    %c0_9 = arith.constant 0 : index
    %c0_10 = arith.constant 0 : index
    %c0_11 = arith.constant 0 : index
    %c0_12 = arith.constant 0 : index
    %14 = vector.load %arg6[%c0_9, %c0_10, %c0_11, %c0_12] : memref<1x1x2x128xf32, #tpu.memory_space<vmem>>, vector<1x1x1x128xf32>
    %15 = vector.shape_cast %14 : vector<1x1x1x128xf32> to vector<1x128xf32>
    %16 = vector.shape_cast %13 : vector<1x128xf32> to vector<1x1x1x128xf32>
    tpu.vector_store %arg6[%c0_9, %c0_10, %c0_11, %c0_12], %16 {strides = array<i32>} : memref<1x1x2x128xf32, #tpu.memory_space<vmem>>, vector<1x1x1x128xf32>,
    %17 = arith.mulf %11, %11 : vector<8x128xf32>
    %cst_13 = arith.constant dense<0.000000e+00> : vector<128xf32>
    %18 = vector.multi_reduction <add>, %17, %cst_13 [0] : vector<8x128xf32> to vector<128xf32>
    %19 = vector.shape_cast %18 : vector<128xf32> to vector<1x128xf32>
    %c0_14 = arith.constant 0 : index
    %c0_15 = arith.constant 0 : index
    %c1 = arith.constant 1 : index
    %c0_16 = arith.constant 0 : index
    %20 = vector.load %arg6[%c0_14, %c0_15, %c1, %c0_16] : memref<1x1x2x128xf32, #tpu.memory_space<vmem>>, vector<1x1x1x128xf32>
    %21 = vector.shape_cast %20 : vector<1x1x1x128xf32> to vector<1x128xf32>
    %22 = vector.shape_cast %19 : vector<1x128xf32> to vector<1x1x1x128xf32>
    tpu.vector_store %arg6[%c0_14, %c0_15, %c1, %c0_16], %22 {strides = array<i32>} : memref<1x1x2x128xf32, #tpu.memory_space<vmem>>, vector<1x1x1x128xf32>,
    %23 = arith.truncf %11 : vector<8x128xf32> to vector<8x128xbf16>
    %c0_17 = arith.constant 0 : index
    %c0_18 = arith.constant 0 : index
    %c0_19 = arith.constant 0 : index
    %24 = vector.load %arg5[%c0_17, %c0_18, %c0_19] : memref<1x8x128xbf16, #tpu.memory_space<vmem>>, vector<1x8x128xbf16>
    %25 = vector.shape_cast %24 : vector<1x8x128xbf16> to vector<8x128xbf16>
    %26 = vector.shape_cast %23 : vector<8x128xbf16> to vector<1x8x128xbf16>
    tpu.vector_store %arg5[%c0_17, %c0_18, %c0_19], %26 {strides = array<i32>} : memref<1x8x128xbf16, #tpu.memory_space<vmem>>, vector<1x8x128xbf16>,
    return
  }
  func.func @transform_0(%arg0: i32, %arg1: i32) -> (i32, i32, i32) {
    %c0_i32 = arith.constant 0 : i32
    %c0_i32_0 = arith.constant 0 : i32
    return %arg0, %arg1, %c0_i32 : i32, i32, i32
  }
  func.func @transform_1(%arg0: i32, %arg1: i32) -> (i32, i32, i32) {
    %c0_i32 = arith.constant 0 : i32
    %c0_i32_0 = arith.constant 0 : i32
    %c0_i32_1 = arith.constant 0 : i32
    return %arg0, %c0_i32, %c0_i32_0 : i32, i32, i32
  }
  func.func @transform_2(%arg0: i32, %arg1: i32) -> (i32, i32) {
    %c0_i32 = arith.constant 0 : i32
    %c0_i32_0 = arith.constant 0 : i32
    %c0_i32_1 = arith.constant 0 : i32
    return %c0_i32, %c0_i32_0 : i32, i32
  }
  func.func @transform_3(%arg0: i32, %arg1: i32) -> (i32, i32, i32) {
    %c0_i32 = arith.constant 0 : i32
    %c0_i32_0 = arith.constant 0 : i32
    return %arg0, %arg1, %c0_i32 : i32, i32, i32
  }
  func.func @transform_4(%arg0: i32, %arg1: i32) -> (i32, i32, i32, i32) {
    %c0_i32 = arith.constant 0 : i32
    %c0_i32_0 = arith.constant 0 : i32
    %c0_i32_1 = arith.constant 0 : i32
    return %arg0, %arg1, %c0_i32, %c0_i32_0 : i32, i32, i32, i32
  }
}

module attributes {stable_mosaic.version = 11 : i64} {
  func.func @_fused_conv_matmul_kernel(%arg0: i32, %arg1: i32, %arg2: memref<1x8x512xbf16, #tpu.memory_space<vmem>>, %arg3: memref<1x512x128xbf16, #tpu.memory_space<vmem>>, %arg4: memref<1x128xf32, #tpu.memory_space<vmem>>, %arg5: memref<1x8x128xbf16, #tpu.memory_space<vmem>>, %arg6: memref<1x1x2x128xf32, #tpu.memory_space<vmem>>) attributes {dimension_semantics = [#tpu.dimension_semantics<parallel>, #tpu.dimension_semantics<parallel>], iteration_bounds = array<i64: 4, 1>, scalar_prefetch = 0 : i64, scratch_operands = 0 : i64, tpu.core_type = #tpu.core_type<tc>, window_params = [{transform_indices = @transform_0, window_bounds = array<i64: 1, 8, 512>}, {transform_indices = @transform_1, window_bounds = array<i64: 1, 512, 128>}, {pipeline_mode = #tpu.pipeline_mode<synchronous>, transform_indices = @transform_2, window_bounds = array<i64: 1, 128>}, {transform_indices = @transform_3, window_bounds = array<i64: 1, 8, 128>}, {transform_indices = @transform_4, window_bounds = array<i64: 1, 1, 2, 128>}]} {
    %c0 = arith.constant 0 : index
    %c0_0 = arith.constant 0 : index
    %c0_1 = arith.constant 0 : index
    %0 = vector.load %arg2[%c0, %c0_0, %c0_1] : memref<1x8x512xbf16, #tpu.memory_space<vmem>>, vector<1x8x512xbf16>
    %1 = vector.shape_cast %0 : vector<1x8x512xbf16> to vector<8x512xbf16>
    %2 = arith.extf %1 : vector<8x512xbf16> to vector<8x512xf32>
    %cst = arith.constant 0.000000e+00 : f32
    %3 = vector.broadcast %cst : f32 to vector<8x512xf32>
    %4 = arith.maximumf %2, %3 : vector<8x512xf32>
    %5 = arith.truncf %4 : vector<8x512xf32> to vector<8x512xbf16>
    %c0_2 = arith.constant 0 : index
    %c0_3 = arith.constant 0 : index
    %c0_4 = arith.constant 0 : index
    %6 = vector.load %arg3[%c0_2, %c0_3, %c0_4] : memref<1x512x128xbf16, #tpu.memory_space<vmem>>, vector<1x512x128xbf16>
    %7 = vector.shape_cast %6 : vector<1x512x128xbf16> to vector<512x128xbf16>
    %cst_5 = arith.constant dense<0.000000e+00> : vector<8x128xf32>
    %8 = tpu.matmul %5, %7, %cst_5 {dimension_numbers = #tpu.dot_dimension_numbers<[1], [0], [0], [1], [0, 0, 1, 1], [], []>} : vector<8x512xbf16>, vector<512x128xbf16>, vector<8x128xf32> -> vector<8x128xf32>
    %c0_6 = arith.constant 0 : index
    %c0_7 = arith.constant 0 : index
    %9 = vector.load %arg4[%c0_6, %c0_7] : memref<1x128xf32, #tpu.memory_space<vmem>>, vector<1x128xf32>
    %10 = vector.broadcast %9 : vector<1x128xf32> to vector<8x128xf32>
    %11 = arith.addf %8, %10 : vector<8x128xf32>
    %cst_8 = arith.constant dense<0.000000e+00> : vector<128xf32>
    %12 = vector.multi_reduction <add>, %11, %cst_8 [0] : vector<8x128xf32> to vector<128xf32>
    %13 = vector.shape_cast %12 : vector<128xf32> to vector<1x128xf32>
    %c0_9 = arith.constant 0 : index
    %c0_10 = arith.constant 0 : index
    %c0_11 = arith.constant 0 : index
    %c0_12 = arith.constant 0 : index
    %14 = vector.load %arg6[%c0_9, %c0_10, %c0_11, %c0_12] : memref<1x1x2x128xf32, #tpu.memory_space<vmem>>, vector<1x1x1x128xf32>
    %15 = vector.shape_cast %14 : vector<1x1x1x128xf32> to vector<1x128xf32>
    %16 = vector.shape_cast %13 : vector<1x128xf32> to vector<1x1x1x128xf32>
    tpu.vector_store %arg6[%c0_9, %c0_10, %c0_11, %c0_12], %16 {strides = array<i32>} : memref<1x1x2x128xf32, #tpu.memory_space<vmem>>, vector<1x1x1x128xf32>,
    %17 = arith.mulf %11, %11 : vector<8x128xf32>
    %cst_13 = arith.constant dense<0.000000e+00> : vector<128xf32>
    %18 = vector.multi_reduction <add>, %17, %cst_13 [0] : vector<8x128xf32> to vector<128xf32>
    %19 = vector.shape_cast %18 : vector<128xf32> to vector<1x128xf32>
    %c0_14 = arith.constant 0 : index
    %c0_15 = arith.constant 0 : index
    %c1 = arith.constant 1 : index
    %c0_16 = arith.constant 0 : index
    %20 = vector.load %arg6[%c0_14, %c0_15, %c1, %c0_16] : memref<1x1x2x128xf32, #tpu.memory_space<vmem>>, vector<1x1x1x128xf32>
    %21 = vector.shape_cast %20 : vector<1x1x1x128xf32> to vector<1x128xf32>
    %22 = vector.shape_cast %19 : vector<1x128xf32> to vector<1x1x1x128xf32>
    tpu.vector_store %arg6[%c0_14, %c0_15, %c1, %c0_16], %22 {strides = array<i32>} : memref<1x1x2x128xf32, #tpu.memory_space<vmem>>, vector<1x1x1x128xf32>,
    %23 = arith.truncf %11 : vector<8x128xf32> to vector<8x128xbf16>
    %c0_17 = arith.constant 0 : index
    %c0_18 = arith.constant 0 : index
    %c0_19 = arith.constant 0 : index
    %24 = vector.load %arg5[%c0_17, %c0_18, %c0_19] : memref<1x8x128xbf16, #tpu.memory_space<vmem>>, vector<1x8x128xbf16>
    %25 = vector.shape_cast %24 : vector<1x8x128xbf16> to vector<8x128xbf16>
    %26 = vector.shape_cast %23 : vector<8x128xbf16> to vector<1x8x128xbf16>
    tpu.vector_store %arg5[%c0_17, %c0_18, %c0_19], %26 {strides = array<i32>} : memref<1x8x128xbf16, #tpu.memory_space<vmem>>, vector<1x8x128xbf16>,
    return
  }
  func.func @transform_0(%arg0: i32, %arg1: i32) -> (i32, i32, i32) {
    %c0_i32 = arith.constant 0 : i32
    %c0_i32_0 = arith.constant 0 : i32
    return %arg0, %arg1, %c0_i32 : i32, i32, i32
  }
  func.func @transform_1(%arg0: i32, %arg1: i32) -> (i32, i32, i32) {
    %c0_i32 = arith.constant 0 : i32
    %c0_i32_0 = arith.constant 0 : i32
    %c0_i32_1 = arith.constant 0 : i32
    return %arg0, %c0_i32, %c0_i32_0 : i32, i32, i32
  }
  func.func @transform_2(%arg0: i32, %arg1: i32) -> (i32, i32) {
    %c0_i32 = arith.constant 0 : i32
    %c0_i32_0 = arith.constant 0 : i32
    %c0_i32_1 = arith.constant 0 : i32
    return %c0_i32, %c0_i32_0 : i32, i32
  }
  func.func @transform_3(%arg0: i32, %arg1: i32) -> (i32, i32, i32) {
    %c0_i32 = arith.constant 0 : i32
    %c0_i32_0 = arith.constant 0 : i32
    return %arg0, %arg1, %c0_i32 : i32, i32, i32
  }
  func.func @transform_4(%arg0: i32, %arg1: i32) -> (i32, i32, i32, i32) {
    %c0_i32 = arith.constant 0 : i32
    %c0_i32_0 = arith.constant 0 : i32
    %c0_i32_1 = arith.constant 0 : i32
    return %arg0, %arg1, %c0_i32, %c0_i32_0 : i32, i32, i32, i32
  }
}

module attributes {stable_mosaic.version = 11 : i64} {
  func.func @_fused_conv_matmul_kernel(%arg0: i32, %arg1: i32, %arg2: memref<1x32x256xbf16, #tpu.memory_space<vmem>>, %arg3: memref<1x256x128xbf16, #tpu.memory_space<vmem>>, %arg4: memref<1x128xf32, #tpu.memory_space<vmem>>, %arg5: memref<1x32x128xbf16, #tpu.memory_space<vmem>>, %arg6: memref<1x1x2x128xf32, #tpu.memory_space<vmem>>) attributes {dimension_semantics = [#tpu.dimension_semantics<parallel>, #tpu.dimension_semantics<parallel>], iteration_bounds = array<i64: 4, 1>, scalar_prefetch = 0 : i64, scratch_operands = 0 : i64, tpu.core_type = #tpu.core_type<tc>, window_params = [{transform_indices = @transform_0, window_bounds = array<i64: 1, 32, 256>}, {transform_indices = @transform_1, window_bounds = array<i64: 1, 256, 128>}, {pipeline_mode = #tpu.pipeline_mode<synchronous>, transform_indices = @transform_2, window_bounds = array<i64: 1, 128>}, {transform_indices = @transform_3, window_bounds = array<i64: 1, 32, 128>}, {transform_indices = @transform_4, window_bounds = array<i64: 1, 1, 2, 128>}]} {
    %c0 = arith.constant 0 : index
    %c0_0 = arith.constant 0 : index
    %c0_1 = arith.constant 0 : index
    %0 = vector.load %arg2[%c0, %c0_0, %c0_1] : memref<1x32x256xbf16, #tpu.memory_space<vmem>>, vector<1x32x256xbf16>
    %1 = vector.shape_cast %0 : vector<1x32x256xbf16> to vector<32x256xbf16>
    %2 = arith.extf %1 : vector<32x256xbf16> to vector<32x256xf32>
    %cst = arith.constant 0.000000e+00 : f32
    %3 = vector.broadcast %cst : f32 to vector<32x256xf32>
    %4 = arith.maximumf %2, %3 : vector<32x256xf32>
    %5 = arith.truncf %4 : vector<32x256xf32> to vector<32x256xbf16>
    %c0_2 = arith.constant 0 : index
    %c0_3 = arith.constant 0 : index
    %c0_4 = arith.constant 0 : index
    %6 = vector.load %arg3[%c0_2, %c0_3, %c0_4] : memref<1x256x128xbf16, #tpu.memory_space<vmem>>, vector<1x256x128xbf16>
    %7 = vector.shape_cast %6 : vector<1x256x128xbf16> to vector<256x128xbf16>
    %cst_5 = arith.constant dense<0.000000e+00> : vector<32x128xf32>
    %8 = tpu.matmul %5, %7, %cst_5 {dimension_numbers = #tpu.dot_dimension_numbers<[1], [0], [0], [1], [0, 0, 1, 1], [], []>} : vector<32x256xbf16>, vector<256x128xbf16>, vector<32x128xf32> -> vector<32x128xf32>
    %c0_6 = arith.constant 0 : index
    %c0_7 = arith.constant 0 : index
    %9 = vector.load %arg4[%c0_6, %c0_7] : memref<1x128xf32, #tpu.memory_space<vmem>>, vector<1x128xf32>
    %10 = vector.broadcast %9 : vector<1x128xf32> to vector<32x128xf32>
    %11 = arith.addf %8, %10 : vector<32x128xf32>
    %cst_8 = arith.constant dense<0.000000e+00> : vector<128xf32>
    %12 = vector.multi_reduction <add>, %11, %cst_8 [0] : vector<32x128xf32> to vector<128xf32>
    %13 = vector.shape_cast %12 : vector<128xf32> to vector<1x128xf32>
    %c0_9 = arith.constant 0 : index
    %c0_10 = arith.constant 0 : index
    %c0_11 = arith.constant 0 : index
    %c0_12 = arith.constant 0 : index
    %14 = vector.load %arg6[%c0_9, %c0_10, %c0_11, %c0_12] : memref<1x1x2x128xf32, #tpu.memory_space<vmem>>, vector<1x1x1x128xf32>
    %15 = vector.shape_cast %14 : vector<1x1x1x128xf32> to vector<1x128xf32>
    %16 = vector.shape_cast %13 : vector<1x128xf32> to vector<1x1x1x128xf32>
    tpu.vector_store %arg6[%c0_9, %c0_10, %c0_11, %c0_12], %16 {strides = array<i32>} : memref<1x1x2x128xf32, #tpu.memory_space<vmem>>, vector<1x1x1x128xf32>,
    %17 = arith.mulf %11, %11 : vector<32x128xf32>
    %cst_13 = arith.constant dense<0.000000e+00> : vector<128xf32>
    %18 = vector.multi_reduction <add>, %17, %cst_13 [0] : vector<32x128xf32> to vector<128xf32>
    %19 = vector.shape_cast %18 : vector<128xf32> to vector<1x128xf32>
    %c0_14 = arith.constant 0 : index
    %c0_15 = arith.constant 0 : index
    %c1 = arith.constant 1 : index
    %c0_16 = arith.constant 0 : index
    %20 = vector.load %arg6[%c0_14, %c0_15, %c1, %c0_16] : memref<1x1x2x128xf32, #tpu.memory_space<vmem>>, vector<1x1x1x128xf32>
    %21 = vector.shape_cast %20 : vector<1x1x1x128xf32> to vector<1x128xf32>
    %22 = vector.shape_cast %19 : vector<1x128xf32> to vector<1x1x1x128xf32>
    tpu.vector_store %arg6[%c0_14, %c0_15, %c1, %c0_16], %22 {strides = array<i32>} : memref<1x1x2x128xf32, #tpu.memory_space<vmem>>, vector<1x1x1x128xf32>,
    %23 = arith.truncf %11 : vector<32x128xf32> to vector<32x128xbf16>
    %c0_17 = arith.constant 0 : index
    %c0_18 = arith.constant 0 : index
    %c0_19 = arith.constant 0 : index
    %24 = vector.load %arg5[%c0_17, %c0_18, %c0_19] : memref<1x32x128xbf16, #tpu.memory_space<vmem>>, vector<1x32x128xbf16>
    %25 = vector.shape_cast %24 : vector<1x32x128xbf16> to vector<32x128xbf16>
    %26 = vector.shape_cast %23 : vector<32x128xbf16> to vector<1x32x128xbf16>
    tpu.vector_store %arg5[%c0_17, %c0_18, %c0_19], %26 {strides = array<i32>} : memref<1x32x128xbf16, #tpu.memory_space<vmem>>, vector<1x32x128xbf16>,
    return
  }
  func.func @transform_0(%arg0: i32, %arg1: i32) -> (i32, i32, i32) {
    %c0_i32 = arith.constant 0 : i32
    %c0_i32_0 = arith.constant 0 : i32
    return %arg0, %arg1, %c0_i32 : i32, i32, i32
  }
  func.func @transform_1(%arg0: i32, %arg1: i32) -> (i32, i32, i32) {
    %c0_i32 = arith.constant 0 : i32
    %c0_i32_0 = arith.constant 0 : i32
    %c0_i32_1 = arith.constant 0 : i32
    return %arg0, %c0_i32, %c0_i32_0 : i32, i32, i32
  }
  func.func @transform_2(%arg0: i32, %arg1: i32) -> (i32, i32) {
    %c0_i32 = arith.constant 0 : i32
    %c0_i32_0 = arith.constant 0 : i32
    %c0_i32_1 = arith.constant 0 : i32
    return %c0_i32, %c0_i32_0 : i32, i32
  }
  func.func @transform_3(%arg0: i32, %arg1: i32) -> (i32, i32, i32) {
    %c0_i32 = arith.constant 0 : i32
    %c0_i32_0 = arith.constant 0 : i32
    return %arg0, %arg1, %c0_i32 : i32, i32, i32
  }
  func.func @transform_4(%arg0: i32, %arg1: i32) -> (i32, i32, i32, i32) {
    %c0_i32 = arith.constant 0 : i32
    %c0_i32_0 = arith.constant 0 : i32
    %c0_i32_1 = arith.constant 0 : i32
    return %arg0, %arg1, %c0_i32, %c0_i32_0 : i32, i32, i32, i32
  }
}

module attributes {stable_mosaic.version = 11 : i64} {
  func.func @_fused_conv_matmul_kernel(%arg0: i32, %arg1: i32, %arg2: memref<1x128x128xbf16, #tpu.memory_space<vmem>>, %arg3: memref<1x128x128xbf16, #tpu.memory_space<vmem>>, %arg4: memref<1x128xf32, #tpu.memory_space<vmem>>, %arg5: memref<1x128x128xbf16, #tpu.memory_space<vmem>>, %arg6: memref<1x1x2x128xf32, #tpu.memory_space<vmem>>) attributes {dimension_semantics = [#tpu.dimension_semantics<parallel>, #tpu.dimension_semantics<parallel>], iteration_bounds = array<i64: 4, 1>, scalar_prefetch = 0 : i64, scratch_operands = 0 : i64, tpu.core_type = #tpu.core_type<tc>, window_params = [{transform_indices = @transform_0, window_bounds = array<i64: 1, 128, 128>}, {transform_indices = @transform_1, window_bounds = array<i64: 1, 128, 128>}, {pipeline_mode = #tpu.pipeline_mode<synchronous>, transform_indices = @transform_2, window_bounds = array<i64: 1, 128>}, {transform_indices = @transform_3, window_bounds = array<i64: 1, 128, 128>}, {transform_indices = @transform_4, window_bounds = array<i64: 1, 1, 2, 128>}]} {
    %c0 = arith.constant 0 : index
    %c0_0 = arith.constant 0 : index
    %c0_1 = arith.constant 0 : index
    %0 = vector.load %arg2[%c0, %c0_0, %c0_1] : memref<1x128x128xbf16, #tpu.memory_space<vmem>>, vector<1x128x128xbf16>
    %1 = vector.shape_cast %0 : vector<1x128x128xbf16> to vector<128x128xbf16>
    %2 = arith.extf %1 : vector<128x128xbf16> to vector<128x128xf32>
    %cst = arith.constant 0.000000e+00 : f32
    %3 = vector.broadcast %cst : f32 to vector<128x128xf32>
    %4 = arith.maximumf %2, %3 : vector<128x128xf32>
    %5 = arith.truncf %4 : vector<128x128xf32> to vector<128x128xbf16>
    %c0_2 = arith.constant 0 : index
    %c0_3 = arith.constant 0 : index
    %c0_4 = arith.constant 0 : index
    %6 = vector.load %arg3[%c0_2, %c0_3, %c0_4] : memref<1x128x128xbf16, #tpu.memory_space<vmem>>, vector<1x128x128xbf16>
    %7 = vector.shape_cast %6 : vector<1x128x128xbf16> to vector<128x128xbf16>
    %cst_5 = arith.constant dense<0.000000e+00> : vector<128x128xf32>
    %8 = tpu.matmul %5, %7, %cst_5 {dimension_numbers = #tpu.dot_dimension_numbers<[1], [0], [0], [1], [0, 0, 1, 1], [], []>} : vector<128x128xbf16>, vector<128x128xbf16>, vector<128x128xf32> -> vector<128x128xf32>
    %c0_6 = arith.constant 0 : index
    %c0_7 = arith.constant 0 : index
    %9 = vector.load %arg4[%c0_6, %c0_7] : memref<1x128xf32, #tpu.memory_space<vmem>>, vector<1x128xf32>
    %10 = vector.broadcast %9 : vector<1x128xf32> to vector<128x128xf32>
    %11 = arith.addf %8, %10 : vector<128x128xf32>
    %cst_8 = arith.constant dense<0.000000e+00> : vector<128xf32>
    %12 = vector.multi_reduction <add>, %11, %cst_8 [0] : vector<128x128xf32> to vector<128xf32>
    %13 = vector.shape_cast %12 : vector<128xf32> to vector<1x128xf32>
    %c0_9 = arith.constant 0 : index
    %c0_10 = arith.constant 0 : index
    %c0_11 = arith.constant 0 : index
    %c0_12 = arith.constant 0 : index
    %14 = vector.load %arg6[%c0_9, %c0_10, %c0_11, %c0_12] : memref<1x1x2x128xf32, #tpu.memory_space<vmem>>, vector<1x1x1x128xf32>
    %15 = vector.shape_cast %14 : vector<1x1x1x128xf32> to vector<1x128xf32>
    %16 = vector.shape_cast %13 : vector<1x128xf32> to vector<1x1x1x128xf32>
    tpu.vector_store %arg6[%c0_9, %c0_10, %c0_11, %c0_12], %16 {strides = array<i32>} : memref<1x1x2x128xf32, #tpu.memory_space<vmem>>, vector<1x1x1x128xf32>,
    %17 = arith.mulf %11, %11 : vector<128x128xf32>
    %cst_13 = arith.constant dense<0.000000e+00> : vector<128xf32>
    %18 = vector.multi_reduction <add>, %17, %cst_13 [0] : vector<128x128xf32> to vector<128xf32>
    %19 = vector.shape_cast %18 : vector<128xf32> to vector<1x128xf32>
    %c0_14 = arith.constant 0 : index
    %c0_15 = arith.constant 0 : index
    %c1 = arith.constant 1 : index
    %c0_16 = arith.constant 0 : index
    %20 = vector.load %arg6[%c0_14, %c0_15, %c1, %c0_16] : memref<1x1x2x128xf32, #tpu.memory_space<vmem>>, vector<1x1x1x128xf32>
    %21 = vector.shape_cast %20 : vector<1x1x1x128xf32> to vector<1x128xf32>
    %22 = vector.shape_cast %19 : vector<1x128xf32> to vector<1x1x1x128xf32>
    tpu.vector_store %arg6[%c0_14, %c0_15, %c1, %c0_16], %22 {strides = array<i32>} : memref<1x1x2x128xf32, #tpu.memory_space<vmem>>, vector<1x1x1x128xf32>,
    %23 = arith.truncf %11 : vector<128x128xf32> to vector<128x128xbf16>
    %c0_17 = arith.constant 0 : index
    %c0_18 = arith.constant 0 : index
    %c0_19 = arith.constant 0 : index
    %24 = vector.load %arg5[%c0_17, %c0_18, %c0_19] : memref<1x128x128xbf16, #tpu.memory_space<vmem>>, vector<1x128x128xbf16>
    %25 = vector.shape_cast %24 : vector<1x128x128xbf16> to vector<128x128xbf16>
    %26 = vector.shape_cast %23 : vector<128x128xbf16> to vector<1x128x128xbf16>
    tpu.vector_store %arg5[%c0_17, %c0_18, %c0_19], %26 {strides = array<i32>} : memref<1x128x128xbf16, #tpu.memory_space<vmem>>, vector<1x128x128xbf16>,
    return
  }
  func.func @transform_0(%arg0: i32, %arg1: i32) -> (i32, i32, i32) {
    %c0_i32 = arith.constant 0 : i32
    %c0_i32_0 = arith.constant 0 : i32
    return %arg0, %arg1, %c0_i32 : i32, i32, i32
  }
  func.func @transform_1(%arg0: i32, %arg1: i32) -> (i32, i32, i32) {
    %c0_i32 = arith.constant 0 : i32
    %c0_i32_0 = arith.constant 0 : i32
    %c0_i32_1 = arith.constant 0 : i32
    return %arg0, %c0_i32, %c0_i32_0 : i32, i32, i32
  }
  func.func @transform_2(%arg0: i32, %arg1: i32) -> (i32, i32) {
    %c0_i32 = arith.constant 0 : i32
    %c0_i32_0 = arith.constant 0 : i32
    %c0_i32_1 = arith.constant 0 : i32
    return %c0_i32, %c0_i32_0 : i32, i32
  }
  func.func @transform_3(%arg0: i32, %arg1: i32) -> (i32, i32, i32) {
    %c0_i32 = arith.constant 0 : i32
    %c0_i32_0 = arith.constant 0 : i32
    return %arg0, %arg1, %c0_i32 : i32, i32, i32
  }
  func.func @transform_4(%arg0: i32, %arg1: i32) -> (i32, i32, i32, i32) {
    %c0_i32 = arith.constant 0 : i32
    %c0_i32_0 = arith.constant 0 : i32
    %c0_i32_1 = arith.constant 0 : i32
    return %arg0, %arg1, %c0_i32, %c0_i32_0 : i32, i32, i32, i32
  }
}

module attributes {stable_mosaic.version = 11 : i64} {
  func.func @_fused_conv_matmul_kernel(%arg0: i32, %arg1: i32, %arg2: memref<1x512x64xbf16, #tpu.memory_space<vmem>>, %arg3: memref<1x64x128xbf16, #tpu.memory_space<vmem>>, %arg4: memref<1x128xf32, #tpu.memory_space<vmem>>, %arg5: memref<1x512x128xf32, #tpu.memory_space<vmem>>) attributes {dimension_semantics = [#tpu.dimension_semantics<parallel>, #tpu.dimension_semantics<parallel>], iteration_bounds = array<i64: 4, 1>, scalar_prefetch = 0 : i64, scratch_operands = 0 : i64, tpu.core_type = #tpu.core_type<tc>, window_params = [{transform_indices = @transform_0, window_bounds = array<i64: 1, 512, 64>}, {transform_indices = @transform_1, window_bounds = array<i64: 1, 64, 128>}, {pipeline_mode = #tpu.pipeline_mode<synchronous>, transform_indices = @transform_2, window_bounds = array<i64: 1, 128>}, {transform_indices = @transform_3, window_bounds = array<i64: 1, 512, 128>}]} {
    %c0 = arith.constant 0 : index
    %c0_0 = arith.constant 0 : index
    %c0_1 = arith.constant 0 : index
    %0 = vector.load %arg2[%c0, %c0_0, %c0_1] : memref<1x512x64xbf16, #tpu.memory_space<vmem>>, vector<1x512x64xbf16>
    %1 = vector.shape_cast %0 : vector<1x512x64xbf16> to vector<512x64xbf16>
    %2 = arith.extf %1 : vector<512x64xbf16> to vector<512x64xf32>
    %cst = arith.constant 0.000000e+00 : f32
    %3 = vector.broadcast %cst : f32 to vector<512x64xf32>
    %4 = arith.maximumf %2, %3 : vector<512x64xf32>
    %5 = arith.truncf %4 : vector<512x64xf32> to vector<512x64xbf16>
    %c0_2 = arith.constant 0 : index
    %c0_3 = arith.constant 0 : index
    %c0_4 = arith.constant 0 : index
    %6 = vector.load %arg3[%c0_2, %c0_3, %c0_4] : memref<1x64x128xbf16, #tpu.memory_space<vmem>>, vector<1x64x128xbf16>
    %7 = vector.shape_cast %6 : vector<1x64x128xbf16> to vector<64x128xbf16>
    %cst_5 = arith.constant dense<0.000000e+00> : vector<512x128xf32>
    %8 = tpu.matmul %5, %7, %cst_5 {dimension_numbers = #tpu.dot_dimension_numbers<[1], [0], [0], [1], [0, 0, 1, 1], [], []>} : vector<512x64xbf16>, vector<64x128xbf16>, vector<512x128xf32> -> vector<512x128xf32>
    %c0_6 = arith.constant 0 : index
    %c0_7 = arith.constant 0 : index
    %9 = vector.load %arg4[%c0_6, %c0_7] : memref<1x128xf32, #tpu.memory_space<vmem>>, vector<1x128xf32>
    %10 = vector.broadcast %9 : vector<1x128xf32> to vector<512x128xf32>
    %11 = arith.addf %8, %10 : vector<512x128xf32>
    %12 = math.tanh %11 : vector<512x128xf32>
    %c0_8 = arith.constant 0 : index
    %c0_9 = arith.constant 0 : index
    %c0_10 = arith.constant 0 : index
    %13 = vector.load %arg5[%c0_8, %c0_9, %c0_10] : memref<1x512x128xf32, #tpu.memory_space<vmem>>, vector<1x512x128xf32>
    %14 = vector.shape_cast %13 : vector<1x512x128xf32> to vector<512x128xf32>
    %15 = vector.shape_cast %12 : vector<512x128xf32> to vector<1x512x128xf32>
    tpu.vector_store %arg5[%c0_8, %c0_9, %c0_10], %15 {strides = array<i32>} : memref<1x512x128xf32, #tpu.memory_space<vmem>>, vector<1x512x128xf32>,
    return
  }
  func.func @transform_0(%arg0: i32, %arg1: i32) -> (i32, i32, i32) {
    %c0_i32 = arith.constant 0 : i32
    %c0_i32_0 = arith.constant 0 : i32
    return %arg0, %arg1, %c0_i32 : i32, i32, i32
  }
  func.func @transform_1(%arg0: i32, %arg1: i32) -> (i32, i32, i32) {
    %c0_i32 = arith.constant 0 : i32
    %c0_i32_0 = arith.constant 0 : i32
    %c0_i32_1 = arith.constant 0 : i32
    return %arg0, %c0_i32, %c0_i32_0 : i32, i32, i32
  }
  func.func @transform_2(%arg0: i32, %arg1: i32) -> (i32, i32) {
    %c0_i32 = arith.constant 0 : i32
    %c0_i32_0 = arith.constant 0 : i32
    %c0_i32_1 = arith.constant 0 : i32
    return %c0_i32, %c0_i32_0 : i32, i32
  }
  func.func @transform_3(%arg0: i32, %arg1: i32) -> (i32, i32, i32) {
    %c0_i32 = arith.constant 0 : i32
    %c0_i32_0 = arith.constant 0 : i32
    return %arg0, %arg1, %c0_i32 : i32, i32, i32
  }
}

</mosaic_0001>

<bundles_post_ra>
// kernel: _lambda_.10
= control target key start
LH: loop header
LB: loop body
LE: loop exit
PB: predicated region body
PF: predicated region fallthrough
CT: control target
= control target key end

     0   :  { %vm294_vm0 = vcmask 785408   ;;  %s1889_s1 = inlined_call_operand.vmem [shape: bf16[1,96,128], index: 1, kind: input, shape index: {}]   ;;  %s1890_s0 = inlined_call_operand.vmem [shape: bf16[1,512,96], index: 0, kind: input, shape index: {}]   ;;  %s1891_s2 = inlined_call_operand.vmem [shape: f32[1,128], index: 2, kind: input, shape index: {}]   ;;  %s1892_s3 = inlined_call_operand.vmem [shape: bf16[1,512,128], index: 3, kind: output, shape index: {}]  }
   0x1   :  { %v1520_v0 = vld [vmem:[%s1889_s1 + $0x28] sm:$0xff]   ;;  %v1521_v1 = vld [vmem:[%s1889_s1 + $0x20] sm:$0xff]   ;;  %v1522_v2 = vld [vmem:[%s1889_s1 + $0x18] sm:$0xff]  }
   0x2   :  { %1432 = vmatprep.subr.bf16.mxu0 %v1520_v0  ;;  %1508 = vmatprep.subr.bf16.mxu1 %v1520_v0  ;;  %v1526_v3 = vld [vmem:[%s1890_s0] sm:$0xff]   ;;  %v1523_v5 = vld [vmem:[%s1889_s1 + $0x10] sm:$0xff]   ;;  %v1524_v6 = vld [vmem:[%s1889_s1 + $0x8] sm:$0xff]  }
   0x3   :  { %1433 = vmatpush3.bf16.msra.mxu0 %v1520_v0  ;;  %1514 = vmatpush3.bf16.msra.mxu1 %v1520_v0  ;;  %v1527_v4 = vld [vmem:[%s1890_s0 + $0x80] sm:$0xff]   ;;  %v1528_v8 = vld [vmem:[%s1890_s0 + $0x8] sm:$0xff]   ;;  %v1530_v10 = vld [vmem:[%s1890_s0 + $0x10] sm:$0xff]  }
   0x4   :  { %1434 = vmatprep.subr.bf16.mxu0 %v1521_v1  ;;  %1509 = vmatprep.subr.bf16.mxu1 %v1521_v1  ;;  %v1525_v7 = vld [vmem:[%s1889_s1] sm:$0xff]   ;;  %v1529_v9 = vld [vmem:[%s1890_s0 + $0x88] sm:$0xff]   ;;  %v1531_v11 = vld [vmem:[%s1890_s0 + $0x90] sm:$0xff]  }
   0x5   :  { %1444 = vmatprep.mubr.msk.bf16.mxu0 %vm294_vm0, %v1526_v3  ;;  %1476 = vmatprep.mubr.msk.bf16.mxu1 %vm294_vm0, %v1527_v4  ;;  %v1532_v12 = vld [vmem:[%s1890_s0 + $0x18] sm:$0xff]   ;;  %v1534_v14 = vld [vmem:[%s1890_s0 + $0x20] sm:$0xff]   ;;  %v1536_v16 = vld [vmem:[%s1890_s0 + $0x28] sm:$0xff]  }
   0x6   :  { %v1533_v13 = vld [vmem:[%s1890_s0 + $0x98] sm:$0xff]   ;;  %v1535_v15 = vld [vmem:[%s1890_s0 + $0xa0] sm:$0xff]   ;;  %v1537_v17 = vld [vmem:[%s1890_s0 + $0xa8] sm:$0xff]  }
   0x7   :  { %1435 = vmatpush3.bf16.msra.mxu0 %v1521_v1  ;;  %1515 = vmatpush3.bf16.msra.mxu1 %v1521_v1  ;;  %v1538_v18 = vld [vmem:[%s1890_s0 + $0x30] sm:$0xff]   ;;  %v1540_v20 = vld [vmem:[%s1890_s0 + $0x38] sm:$0xff]   ;;  %v1542_v22 = vld [vmem:[%s1890_s0 + $0x40] sm:$0xff]  }
   0x8   :  { %1436 = vmatprep.subr.bf16.mxu0 %v1522_v2  ;;  %1510 = vmatprep.subr.bf16.mxu1 %v1522_v2  ;;  %v1539_v19 = vld [vmem:[%s1890_s0 + $0xb0] sm:$0xff]   ;;  %v1541_v21 = vld [vmem:[%s1890_s0 + $0xb8] sm:$0xff]   ;;  %v1543_v23 = vld [vmem:[%s1890_s0 + $0xc0] sm:$0xff]  }
   0x9   :  { %v1544_v24 = vld [vmem:[%s1890_s0 + $0x48] sm:$0xff]   ;;  %v1546_v26 = vld [vmem:[%s1890_s0 + $0x50] sm:$0xff]   ;;  %v1548_v28 = vld [vmem:[%s1890_s0 + $0x58] sm:$0xff]  }
   0xa   :  { %v1545_v25 = vld [vmem:[%s1890_s0 + $0xc8] sm:$0xff]   ;;  %v1547_v27 = vld [vmem:[%s1890_s0 + $0xd0] sm:$0xff]   ;;  %v1549_v29 = vld [vmem:[%s1890_s0 + $0xd8] sm:$0xff]  }
   0xb   :  { %1437 = vmatpush3.bf16.msra.mxu0 %v1522_v2  ;;  %1516 = vmatpush3.bf16.msra.mxu1 %v1522_v2  ;;  %v1550_v30 = vld [vmem:[%s1890_s0 + $0x60] sm:$0xff]   ;;  %v1552_v32 = vld [vmem:[%s1890_s0 + $0x68] sm:$0xff]   ;;  %v1554_v34 = vld [vmem:[%s1890_s0 + $0x70] sm:$0xff]  }
   0xc   :  { %1438 = vmatprep.subr.bf16.mxu0 %v1523_v5  ;;  %1511 = vmatprep.subr.bf16.mxu1 %v1523_v5  ;;  %v1551_v31 = vld [vmem:[%s1890_s0 + $0xe0] sm:$0xff]   ;;  %v1553_v33 = vld [vmem:[%s1890_s0 + $0xe8] sm:$0xff]   ;;  %v1555_v35 = vld [vmem:[%s1890_s0 + $0xf0] sm:$0xff]  }
   0xd   :  { %v1556_v36 = vld [vmem:[%s1890_s0 + $0x78] sm:$0xff]   ;;  %v1727_v40 = vld [vmem:[%s1891_s2] ss:$0 sm:$0xff] }
   0xe   :  { %v1557_v37 = vld [vmem:[%s1890_s0 + $0xf8] sm:$0xff]  }
   0xf   :  { %1439 = vmatpush3.bf16.msra.mxu0 %v1523_v5  ;;  %1517 = vmatpush3.bf16.msra.mxu1 %v1523_v5 }
  0x10   :  { %1440 = vmatprep.subr.bf16.mxu0 %v1524_v6  ;;  %1512 = vmatprep.subr.bf16.mxu1 %v1524_v6 }
  0x13   :  { %1441 = vmatpush3.bf16.msra.mxu0 %v1524_v6  ;;  %1518 = vmatpush3.bf16.msra.mxu1 %v1524_v6 }
  0x14   :  { %1442 = vmatprep.subr.bf16.mxu0 %v1525_v7  ;;  %1513 = vmatprep.subr.bf16.mxu1 %v1525_v7 }
  0x17   :  { %1443 = vmatpush3.bf16.msra.mxu0 %v1525_v7  ;;  %1519 = vmatpush3.bf16.msra.mxu1 %v1525_v7 }
  0x1a   :  { %1445 = vmatmul.mubr.msk.bf16.vlgmr.msra.gmra.mxu0 %vm294_vm0, %v1528_v8  ;;  %1477 = vmatmul.mubr.msk.bf16.vlgmr.msra.gmra.mxu1 %vm294_vm0, %v1529_v9 }
  0x1b   :  { %1448 = vmatprep.mubr.msk.bf16.mxu0 %vm294_vm0, %v1530_v10  ;;  %1480 = vmatprep.mubr.msk.bf16.mxu1 %vm294_vm0, %v1531_v11 }
  0x22   :  { %1449 = vmatmul.mubr.msk.bf16.gmra.mxu0 %vm294_vm0, %v1532_v12  ;;  %1481 = vmatmul.mubr.msk.bf16.gmra.mxu1 %vm294_vm0, %v1533_v13 }
  0x23   :  { %1452 = vmatprep.mubr.msk.bf16.mxu0 %vm294_vm0, %v1534_v14  ;;  %1484 = vmatprep.mubr.msk.bf16.mxu1 %vm294_vm0, %v1535_v15 }
  0x2a   :  { %1453 = vmatmul.mubr.msk.bf16.gmra.mxu0 %vm294_vm0, %v1536_v16  ;;  %1485 = vmatmul.mubr.msk.bf16.gmra.mxu1 %vm294_vm0, %v1537_v17 }
  0x2b   :  { %1456 = vmatprep.mubr.msk.bf16.mxu0 %vm294_vm0, %v1538_v18  ;;  %1488 = vmatprep.mubr.msk.bf16.mxu1 %vm294_vm0, %v1539_v19 }
  0x32   :  { %1457 = vmatmul.mubr.msk.bf16.gmra.mxu0 %vm294_vm0, %v1540_v20  ;;  %1489 = vmatmul.mubr.msk.bf16.gmra.mxu1 %vm294_vm0, %v1541_v21 }
  0x33   :  { %1460 = vmatprep.mubr.msk.bf16.mxu0 %vm294_vm0, %v1542_v22  ;;  %1492 = vmatprep.mubr.msk.bf16.mxu1 %vm294_vm0, %v1543_v23 }
  0x3a   :  { %1461 = vmatmul.mubr.msk.bf16.gmra.mxu0 %vm294_vm0, %v1544_v24  ;;  %1493 = vmatmul.mubr.msk.bf16.gmra.mxu1 %vm294_vm0, %v1545_v25 }
  0x3b   :  { %1464 = vmatprep.mubr.msk.bf16.mxu0 %vm294_vm0, %v1546_v26  ;;  %1496 = vmatprep.mubr.msk.bf16.mxu1 %vm294_vm0, %v1547_v27 }
  0x42   :  { %1465 = vmatmul.mubr.msk.bf16.gmra.mxu0 %vm294_vm0, %v1548_v28  ;;  %1497 = vmatmul.mubr.msk.bf16.gmra.mxu1 %vm294_vm0, %v1549_v29 }
  0x43   :  { %1468 = vmatprep.mubr.msk.bf16.mxu0 %vm294_vm0, %v1550_v30  ;;  %1500 = vmatprep.mubr.msk.bf16.mxu1 %vm294_vm0, %v1551_v31 }
  0x4a   :  { %1469 = vmatmul.mubr.msk.bf16.gmra.mxu0 %vm294_vm0, %v1552_v32  ;;  %1501 = vmatmul.mubr.msk.bf16.gmra.mxu1 %vm294_vm0, %v1553_v33 }
  0x4b   :  { %1472 = vmatprep.mubr.msk.bf16.mxu0 %vm294_vm0, %v1554_v34  ;;  %1504 = vmatprep.mubr.msk.bf16.mxu1 %vm294_vm0, %v1555_v35 }
  0x52   :  { %1473 = vmatmul.mubr.msk.bf16.gmra.mxu0 %vm294_vm0, %v1556_v36  ;;  %1505 = vmatmul.mubr.msk.bf16.gmra.mxu1 %vm294_vm0, %v1557_v37 }
  0xda   :  { %v1446_v38 = vpop.f32.mrf.mxu0  ;;  %v1478_v39 = vpop.f32.mrf.mxu1 }
  0xdb   :  { %v434_v45 = vadd.f32 %v1446_v38, %v1727_v40  ;;  %v562_v46 = vadd.f32 %v1478_v39, %v1727_v40 }
  0xdc   :  { %v425_v41 = vpop.f32.mrf.mxu0  ;;  %v553_v42 = vpop.f32.mrf.mxu1 }
  0xdd   :  { %v426_v49 = vadd.f32 %v1727_v40, %v425_v41  ;;  %v554_v50 = vadd.f32 %v1727_v40, %v553_v42 }
  0xde   :  { %v1447_v43 = vpop.f32.mrf.mxu0  ;;  %v1479_v44 = vpop.f32.mrf.mxu1 }
  0xdf   :  { %v437_v47 = vadd.f32 %v1447_v43, %v1727_v40  ;;  %v565_v48 = vadd.f32 %v1479_v44, %v1727_v40 }
  0xe0   :  { %v428_v51 = vpop.f32.mrf.mxu0  ;;  %v556_v52 = vpop.f32.mrf.mxu1 }
  0xe1   :  { %v1211_v53 = vpack.c.bf16 %v437_v47, %v434_v45  ;;  %v1291_v54 = vpack.c.bf16 %v565_v48, %v562_v46  ;;  %v429_v55 = vadd.f32 %v1727_v40, %v428_v51  ;;  %v557_v56 = vadd.f32 %v1727_v40, %v556_v52 }
  0xe2   :  { %v1450_v57 = vpop.f32.mrf.mxu0  ;;  %v1482_v58 = vpop.f32.mrf.mxu1 }
  0xe3   :  { %1363 = vst [vmem:[%s1892_s3 + $0x8] sm:$0xff] %v1211_v53   ;;  %1379 = vst [vmem:[%s1892_s3 + $0x88] sm:$0xff] %v1291_v54   ;;  %v1206_v59 = vpack.c.bf16 %v429_v55, %v426_v49  ;;  %v1286_v60 = vpack.c.bf16 %v557_v56, %v554_v50  ;;  %v450_v1 = vadd.f32 %v1450_v57, %v1727_v40 }
  0xe4   :  { %v441_v61 = vpop.f32.mrf.mxu0  ;;  %v569_v62 = vpop.f32.mrf.mxu1  ;;  %v578_v2 = vadd.f32 %v1482_v58, %v1727_v40 }
  0xe5   :  { %1207 = vst [vmem:[%s1892_s3] sm:$0xff] %v1206_v59   ;;  %1378 = vst [vmem:[%s1892_s3 + $0x80] sm:$0xff] %v1286_v60   ;;  %v442_v5 = vadd.f32 %v1727_v40, %v441_v61  ;;  %v570_v6 = vadd.f32 %v1727_v40, %v569_v62 }
  0xe6   :  { %v1451_v63 = vpop.f32.mrf.mxu0  ;;  %v1483_v0 = vpop.f32.mrf.mxu1 }
  0xe7   :  { %v453_v3 = vadd.f32 %v1451_v63, %v1727_v40  ;;  %v581_v4 = vadd.f32 %v1483_v0, %v1727_v40 }
  0xe8   :  { %v444_v7 = vpop.f32.mrf.mxu0  ;;  %v572_v8 = vpop.f32.mrf.mxu1 }
  0xe9   :  { %v1221_v9 = vpack.c.bf16 %v453_v3, %v450_v1  ;;  %v1301_v10 = vpack.c.bf16 %v581_v4, %v578_v2  ;;  %v445_v11 = vadd.f32 %v1727_v40, %v444_v7  ;;  %v573_v12 = vadd.f32 %v1727_v40, %v572_v8 }
  0xea   :  { %v1454_v13 = vpop.f32.mrf.mxu0  ;;  %v1486_v14 = vpop.f32.mrf.mxu1 }
  0xeb   :  { %1365 = vst [vmem:[%s1892_s3 + $0x18] sm:$0xff] %v1221_v9   ;;  %1381 = vst [vmem:[%s1892_s3 + $0x98] sm:$0xff] %v1301_v10   ;;  %v1216_v15 = vpack.c.bf16 %v445_v11, %v442_v5  ;;  %v1296_v16 = vpack.c.bf16 %v573_v12, %v570_v6  ;;  %v466_v21 = vadd.f32 %v1454_v13, %v1727_v40 }
  0xec   :  { %v457_v17 = vpop.f32.mrf.mxu0  ;;  %v585_v18 = vpop.f32.mrf.mxu1  ;;  %v594_v22 = vadd.f32 %v1486_v14, %v1727_v40 }
  0xed   :  { %1364 = vst [vmem:[%s1892_s3 + $0x10] sm:$0xff] %v1216_v15   ;;  %1380 = vst [vmem:[%s1892_s3 + $0x90] sm:$0xff] %v1296_v16   ;;  %v458_v25 = vadd.f32 %v1727_v40, %v457_v17  ;;  %v586_v26 = vadd.f32 %v1727_v40, %v585_v18 }
  0xee   :  { %v1455_v19 = vpop.f32.mrf.mxu0  ;;  %v1487_v20 = vpop.f32.mrf.mxu1 }
  0xef   :  { %v469_v23 = vadd.f32 %v1455_v19, %v1727_v40  ;;  %v597_v24 = vadd.f32 %v1487_v20, %v1727_v40 }
  0xf0   :  { %v460_v27 = vpop.f32.mrf.mxu0  ;;  %v588_v28 = vpop.f32.mrf.mxu1 }
  0xf1   :  { %v1231_v29 = vpack.c.bf16 %v469_v23, %v466_v21  ;;  %v1311_v30 = vpack.c.bf16 %v597_v24, %v594_v22  ;;  %v461_v31 = vadd.f32 %v1727_v40, %v460_v27  ;;  %v589_v32 = vadd.f32 %v1727_v40, %v588_v28 }
  0xf2   :  { %v1458_v33 = vpop.f32.mrf.mxu0  ;;  %v1490_v34 = vpop.f32.mrf.mxu1 }
  0xf3   :  { %1367 = vst [vmem:[%s1892_s3 + $0x28] sm:$0xff] %v1231_v29   ;;  %1383 = vst [vmem:[%s1892_s3 + $0xa8] sm:$0xff] %v1311_v30   ;;  %v1226_v35 = vpack.c.bf16 %v461_v31, %v458_v25  ;;  %v1306_v36 = vpack.c.bf16 %v589_v32, %v586_v26  ;;  %v482_v42 = vadd.f32 %v1458_v33, %v1727_v40 }
  0xf4   :  { %v473_v37 = vpop.f32.mrf.mxu0  ;;  %v601_v38 = vpop.f32.mrf.mxu1  ;;  %v610_v43 = vadd.f32 %v1490_v34, %v1727_v40 }
  0xf5   :  { %1366 = vst [vmem:[%s1892_s3 + $0x20] sm:$0xff] %v1226_v35   ;;  %1382 = vst [vmem:[%s1892_s3 + $0xa0] sm:$0xff] %v1306_v36   ;;  %v474_v46 = vadd.f32 %v1727_v40, %v473_v37  ;;  %v602_v47 = vadd.f32 %v1727_v40, %v601_v38 }
  0xf6   :  { %v1459_v39 = vpop.f32.mrf.mxu0  ;;  %v1491_v41 = vpop.f32.mrf.mxu1 }
  0xf7   :  { %v485_v44 = vadd.f32 %v1459_v39, %v1727_v40  ;;  %v613_v45 = vadd.f32 %v1491_v41, %v1727_v40 }
  0xf8   :  { %v476_v48 = vpop.f32.mrf.mxu0  ;;  %v604_v49 = vpop.f32.mrf.mxu1 }
  0xf9   :  { %v1241_v50 = vpack.c.bf16 %v485_v44, %v482_v42  ;;  %v1321_v51 = vpack.c.bf16 %v613_v45, %v610_v43  ;;  %v477_v52 = vadd.f32 %v1727_v40, %v476_v48  ;;  %v605_v53 = vadd.f32 %v1727_v40, %v604_v49 }
  0xfa   :  { %v1462_v54 = vpop.f32.mrf.mxu0  ;;  %v1494_v55 = vpop.f32.mrf.mxu1 }
  0xfb   :  { %1369 = vst [vmem:[%s1892_s3 + $0x38] sm:$0xff] %v1241_v50   ;;  %1385 = vst [vmem:[%s1892_s3 + $0xb8] sm:$0xff] %v1321_v51   ;;  %v1236_v56 = vpack.c.bf16 %v477_v52, %v474_v46  ;;  %v1316_v57 = vpack.c.bf16 %v605_v53, %v602_v47  ;;  %v498_v62 = vadd.f32 %v1462_v54, %v1727_v40 }
  0xfc   :  { %v489_v58 = vpop.f32.mrf.mxu0  ;;  %v617_v59 = vpop.f32.mrf.mxu1  ;;  %v626_v63 = vadd.f32 %v1494_v55, %v1727_v40 }
  0xfd   :  { %1368 = vst [vmem:[%s1892_s3 + $0x30] sm:$0xff] %v1236_v56   ;;  %1384 = vst [vmem:[%s1892_s3 + $0xb0] sm:$0xff] %v1316_v57   ;;  %v490_v2 = vadd.f32 %v1727_v40, %v489_v58  ;;  %v618_v3 = vadd.f32 %v1727_v40, %v617_v59 }
  0xfe   :  { %v1463_v60 = vpop.f32.mrf.mxu0  ;;  %v1495_v61 = vpop.f32.mrf.mxu1 }
  0xff   :  { %v501_v0 = vadd.f32 %v1463_v60, %v1727_v40  ;;  %v629_v1 = vadd.f32 %v1495_v61, %v1727_v40 }
 0x100   :  { %v492_v4 = vpop.f32.mrf.mxu0  ;;  %v620_v5 = vpop.f32.mrf.mxu1 }
 0x101   :  { %v1251_v6 = vpack.c.bf16 %v501_v0, %v498_v62  ;;  %v1331_v7 = vpack.c.bf16 %v629_v1, %v626_v63  ;;  %v493_v8 = vadd.f32 %v1727_v40, %v492_v4  ;;  %v621_v9 = vadd.f32 %v1727_v40, %v620_v5 }
 0x102   :  { %v1466_v10 = vpop.f32.mrf.mxu0  ;;  %v1498_v11 = vpop.f32.mrf.mxu1 }
 0x103   :  { %1371 = vst [vmem:[%s1892_s3 + $0x48] sm:$0xff] %v1251_v6   ;;  %1387 = vst [vmem:[%s1892_s3 + $0xc8] sm:$0xff] %v1331_v7   ;;  %v1246_v12 = vpack.c.bf16 %v493_v8, %v490_v2  ;;  %v1326_v13 = vpack.c.bf16 %v621_v9, %v618_v3  ;;  %v514_v18 = vadd.f32 %v1466_v10, %v1727_v40 }
 0x104   :  { %v505_v14 = vpop.f32.mrf.mxu0  ;;  %v633_v15 = vpop.f32.mrf.mxu1  ;;  %v642_v19 = vadd.f32 %v1498_v11, %v1727_v40 }
 0x105   :  { %1370 = vst [vmem:[%s1892_s3 + $0x40] sm:$0xff] %v1246_v12   ;;  %1386 = vst [vmem:[%s1892_s3 + $0xc0] sm:$0xff] %v1326_v13   ;;  %v506_v22 = vadd.f32 %v1727_v40, %v505_v14  ;;  %v634_v23 = vadd.f32 %v1727_v40, %v633_v15 }
 0x106   :  { %v1467_v16 = vpop.f32.mrf.mxu0  ;;  %v1499_v17 = vpop.f32.mrf.mxu1 }
 0x107   :  { %v517_v20 = vadd.f32 %v1467_v16, %v1727_v40  ;;  %v645_v21 = vadd.f32 %v1499_v17, %v1727_v40 }
 0x108   :  { %v508_v24 = vpop.f32.mrf.mxu0  ;;  %v636_v25 = vpop.f32.mrf.mxu1 }
 0x109   :  { %v1261_v26 = vpack.c.bf16 %v517_v20, %v514_v18  ;;  %v1341_v27 = vpack.c.bf16 %v645_v21, %v642_v19  ;;  %v509_v28 = vadd.f32 %v1727_v40, %v508_v24  ;;  %v637_v29 = vadd.f32 %v1727_v40, %v636_v25 }
 0x10a   :  { %v1470_v30 = vpop.f32.mrf.mxu0  ;;  %v1502_v31 = vpop.f32.mrf.mxu1 }
 0x10b   :  { %1373 = vst [vmem:[%s1892_s3 + $0x58] sm:$0xff] %v1261_v26   ;;  %1389 = vst [vmem:[%s1892_s3 + $0xd8] sm:$0xff] %v1341_v27   ;;  %v1256_v32 = vpack.c.bf16 %v509_v28, %v506_v22  ;;  %v1336_v33 = vpack.c.bf16 %v637_v29, %v634_v23  ;;  %v530_v38 = vadd.f32 %v1470_v30, %v1727_v40 }
 0x10c   :  { %v521_v34 = vpop.f32.mrf.mxu0  ;;  %v649_v35 = vpop.f32.mrf.mxu1  ;;  %v658_v39 = vadd.f32 %v1502_v31, %v1727_v40 }
 0x10d   :  { %1372 = vst [vmem:[%s1892_s3 + $0x50] sm:$0xff] %v1256_v32   ;;  %1388 = vst [vmem:[%s1892_s3 + $0xd0] sm:$0xff] %v1336_v33   ;;  %v522_v43 = vadd.f32 %v1727_v40, %v521_v34  ;;  %v650_v44 = vadd.f32 %v1727_v40, %v649_v35 }
 0x10e   :  { %v1471_v36 = vpop.f32.mrf.mxu0  ;;  %v1503_v37 = vpop.f32.mrf.mxu1 }
 0x10f   :  { %v533_v41 = vadd.f32 %v1471_v36, %v1727_v40  ;;  %v661_v42 = vadd.f32 %v1503_v37, %v1727_v40 }
 0x110   :  { %v524_v45 = vpop.f32.mrf.mxu0  ;;  %v652_v46 = vpop.f32.mrf.mxu1 }
 0x111   :  { %v1271_v47 = vpack.c.bf16 %v533_v41, %v530_v38  ;;  %v1351_v48 = vpack.c.bf16 %v661_v42, %v658_v39  ;;  %v525_v49 = vadd.f32 %v1727_v40, %v524_v45  ;;  %v653_v50 = vadd.f32 %v1727_v40, %v652_v46 }
 0x112   :  { %v1474_v51 = vpop.f32.mrf.mxu0  ;;  %v1506_v52 = vpop.f32.mrf.mxu1 }
 0x113   :  { %1375 = vst [vmem:[%s1892_s3 + $0x68] sm:$0xff] %v1271_v47   ;;  %1391 = vst [vmem:[%s1892_s3 + $0xe8] sm:$0xff] %v1351_v48   ;;  %v1266_v53 = vpack.c.bf16 %v525_v49, %v522_v43  ;;  %v1346_v54 = vpack.c.bf16 %v653_v50, %v650_v44  ;;  %v546_v59 = vadd.f32 %v1474_v51, %v1727_v40 }
 0x114   :  { %v537_v55 = vpop.f32.mrf.mxu0  ;;  %v665_v56 = vpop.f32.mrf.mxu1  ;;  %v674_v60 = vadd.f32 %v1506_v52, %v1727_v40 }
 0x115   :  { %1374 = vst [vmem:[%s1892_s3 + $0x60] sm:$0xff] %v1266_v53   ;;  %1390 = vst [vmem:[%s1892_s3 + $0xe0] sm:$0xff] %v1346_v54   ;;  %v538_v63 = vadd.f32 %v1727_v40, %v537_v55  ;;  %v666_v0 = vadd.f32 %v1727_v40, %v665_v56 }
 0x116   :  { %v1475_v57 = vpop.f32.mrf.mxu0  ;;  %v1507_v58 = vpop.f32.mrf.mxu1 }
 0x117   :  { %v549_v61 = vadd.f32 %v1475_v57, %v1727_v40  ;;  %v677_v62 = vadd.f32 %v1507_v58, %v1727_v40 }
 0x118   :  { %v540_v1 = vpop.f32.mrf.mxu0  ;;  %v668_v2 = vpop.f32.mrf.mxu1 }
 0x119   :  { %v1281_v3 = vpack.c.bf16 %v549_v61, %v546_v59  ;;  %v1361_v4 = vpack.c.bf16 %v677_v62, %v674_v60  ;;  %v541_v5 = vadd.f32 %v1727_v40, %v540_v1  ;;  %v669_v6 = vadd.f32 %v1727_v40, %v668_v2 }
 0x11b   :  { %1377 = vst [vmem:[%s1892_s3 + $0x78] sm:$0xff] %v1281_v3   ;;  %1393 = vst [vmem:[%s1892_s3 + $0xf8] sm:$0xff] %v1361_v4   ;;  %v1276_v7 = vpack.c.bf16 %v541_v5, %v538_v63  ;;  %v1356_v8 = vpack.c.bf16 %v669_v6, %v666_v0 }
 0x11d   :  { %1376 = vst [vmem:[%s1892_s3 + $0x70] sm:$0xff] %v1276_v7   ;;  %1392 = vst [vmem:[%s1892_s3 + $0xf0] sm:$0xff] %v1356_v8  }

// kernel: _lambda_.11
= control target key start
LH: loop header
LB: loop body
LE: loop exit
PB: predicated region body
PF: predicated region fallthrough
CT: control target
= control target key end

     0   :  { %s743_s1 = inlined_call_operand.vmem [shape: bf16[1,128,128], index: 1, kind: input, shape index: {}]   ;;  %s744_s0 = inlined_call_operand.vmem [shape: bf16[1,128,128], index: 0, kind: input, shape index: {}]   ;;  %s745_s2 = inlined_call_operand.vmem [shape: f32[1,128], index: 2, kind: input, shape index: {}]   ;;  %s746_s3 = inlined_call_operand.vmem [shape: bf16[1,128,128], index: 3, kind: output, shape index: {0}]   ;;  %s747_s4 = inlined_call_operand.vmem [shape: f32[1,1,2,128], index: 4, kind: output, shape index: {1}]  }
   0x1   :  { %v612_v0 = vld [vmem:[%s743_s1 + $0x38] sm:$0xff]   ;;  %v613_v1 = vld [vmem:[%s743_s1 + $0x30] sm:$0xff]   ;;  %v614_v2 = vld [vmem:[%s743_s1 + $0x28] sm:$0xff]  }
   0x2   :  { %564 = vmatprep.subr.bf16.mxu0 %v612_v0  ;;  %596 = vmatprep.subr.bf16.mxu1 %v612_v0  ;;  %v615_v3 = vld [vmem:[%s743_s1 + $0x20] sm:$0xff]   ;;  %v616_v9 = vld [vmem:[%s743_s1 + $0x18] sm:$0xff]   ;;  %v534_v12 = vld [vmem:[%s744_s0 + $0x8] sm:$0xff]  }
   0x3   :  { %565 = vmatpush3.bf16.msra.mxu0 %v612_v0  ;;  %604 = vmatpush3.bf16.msra.mxu1 %v612_v0  ;;  %v463_v4 = vld [vmem:[%s744_s0] sm:$0xff]   ;;  %v535_v15 = vld [vmem:[%s744_s0 + $0x10] sm:$0xff]   ;;  %v538_v16 = vld [vmem:[%s744_s0 + $0x28] sm:$0xff]   ;;  %v468_v18 = vunpack.c.l.bf16 %v534_v12  ;;  %v469_v19 = vunpack.c.h.bf16 %v534_v12 }
   0x4   :  { %566 = vmatprep.subr.bf16.mxu0 %v613_v1  ;;  %597 = vmatprep.subr.bf16.mxu1 %v613_v1  ;;  %v464_v5 = vunpack.c.l.bf16 %v463_v4  ;;  %v465_v6 = vunpack.c.h.bf16 %v463_v4  ;;  %v537_v13 = vld [vmem:[%s744_s0 + $0x20] sm:$0xff]   ;;  %v617_v17 = vld [vmem:[%s743_s1 + $0x10] sm:$0xff]   ;;  %v472_v22 = vunpack.c.l.bf16 %v535_v15  ;;  %v473_v23 = vunpack.c.h.bf16 %v535_v15  ;;  %v618_v29 = vld [vmem:[%s743_s1 + $0x8] sm:$0xff]  }
   0x5   :  { %v480_v20 = vunpack.c.l.bf16 %v537_v13  ;;  %v481_v21 = vunpack.c.h.bf16 %v537_v13  ;;  %v484_v24 = vunpack.c.l.bf16 %v538_v16  ;;  %v539_v25 = vld [vmem:[%s744_s0 + $0x30] sm:$0xff]   ;;  %v485_v28 = vunpack.c.h.bf16 %v538_v16  ;;  %v536_v31 = vld [vmem:[%s744_s0 + $0x18] sm:$0xff]   ;;  %v619_v36 = vld [vmem:[%s743_s1] sm:$0xff]  }
   0x6   :  { %vm49_vm0 = vcmp.ge.f32.partialorder %v464_v5, 0.0  ;;  %vm50_vm1 = vcmp.ge.f32.partialorder %v465_v6, 0.0  ;;  %v65_v7 = vmul.f32 0.2, %v464_v5  ;;  %v66_v8 = vmul.f32 0.2, %v465_v6 }
   0x7   :  { %567 = vmatpush3.bf16.msra.mxu0 %v613_v1  ;;  %605 = vmatpush3.bf16.msra.mxu1 %v613_v1  ;;  %vm57_vm2 = vcmp.ge.f32.partialorder %v480_v20, 0.0  ;;  %vm58_vm3 = vcmp.ge.f32.partialorder %v481_v21, 0.0  ;;  %v73_v26 = vmul.f32 0.2, %v480_v20  ;;  %v74_v27 = vmul.f32 0.2, %v481_v21 }
   0x8   :  { %568 = vmatprep.subr.bf16.mxu0 %v614_v2  ;;  %598 = vmatprep.subr.bf16.mxu1 %v614_v2  ;;  %v81_v10 = vsel %vm49_vm0, %v464_v5, %v65_v7  ;;  %v82_v11 = vsel %vm50_vm1, %v465_v6, %v66_v8  ;;  %vm51_vm4 = vcmp.ge.f32.partialorder %v468_v18, 0.0  ;;  %vm52_vm5 = vcmp.ge.f32.partialorder %v469_v19, 0.0  ;;  %v540_v40 = vld [vmem:[%s744_s0 + $0x38] sm:$0xff]  }
   0x9   :  { %v97_v14 = vpack.c.bf16 %v82_v11, %v81_v10  ;;  %v67_v30 = vmul.f32 0.2, %v468_v18  ;;  %v89_v32 = vsel %vm57_vm2, %v480_v20, %v73_v26  ;;  %v90_v33 = vsel %vm58_vm3, %v481_v21, %v74_v27  ;;  %v421_v10 = vld [vmem:[%s745_s2] ss:$0 sm:$0xff] }
   0xa   :  { %v488_v34 = vunpack.c.l.bf16 %v539_v25  ;;  %v489_v35 = vunpack.c.h.bf16 %v539_v25  ;;  %v68_v37 = vmul.f32 0.2, %v469_v19  ;;  %vm53_vm6 = vcmp.ge.f32.partialorder %v472_v22, 0.0 }
   0xb   :  { %569 = vmatpush3.bf16.msra.mxu0 %v614_v2  ;;  %606 = vmatpush3.bf16.msra.mxu1 %v614_v2  ;;  %v69_v38 = vmul.f32 0.2, %v472_v22  ;;  %v101_v39 = vpack.c.bf16 %v90_v33, %v89_v32  ;;  %v70_v41 = vmul.f32 0.2, %v473_v23  ;;  %v75_v42 = vmul.f32 0.2, %v484_v24 }
   0xc   :  { %570 = vmatprep.subr.bf16.mxu0 %v615_v3  ;;  %599 = vmatprep.subr.bf16.mxu1 %v615_v3  ;;  %v76_v43 = vmul.f32 0.2, %v485_v28  ;;  %vm59_vm7 = vcmp.ge.f32.partialorder %v484_v24, 0.0  ;;  %vm60_vm8 = vcmp.ge.f32.partialorder %v485_v28, 0.0  ;;  %v77_v44 = vmul.f32 0.2, %v488_v34 }
   0xd   :  { %580 = vmatprep.mubr.bf16.mxu0 %v97_v14  ;;  %v78_v45 = vmul.f32 0.2, %v489_v35  ;;  %vm54_vm9 = vcmp.ge.f32.partialorder %v473_v23, 0.0  ;;  %v476_v46 = vunpack.c.l.bf16 %v536_v31  ;;  %588 = vmatprep.mubr.bf16.mxu1 %v101_v39  ;;  %vm61_vm10 = vcmp.ge.f32.partialorder %v488_v34, 0.0 }
   0xe   :  { %vm62_vm11 = vcmp.ge.f32.partialorder %v489_v35, 0.0  ;;  %v83_v47 = vsel %vm51_vm4, %v468_v18, %v67_v30  ;;  %v84_v48 = vsel %vm52_vm5, %v469_v19, %v68_v37  ;;  %v85_v49 = vsel %vm53_vm6, %v472_v22, %v69_v38 }
   0xf   :  { %571 = vmatpush3.bf16.msra.mxu0 %v615_v3  ;;  %607 = vmatpush3.bf16.msra.mxu1 %v615_v3  ;;  %v477_v50 = vunpack.c.h.bf16 %v536_v31  ;;  %v91_v51 = vsel %vm59_vm7, %v484_v24, %v75_v42  ;;  %v92_v52 = vsel %vm60_vm8, %v485_v28, %v76_v43  ;;  %v492_v53 = vunpack.c.l.bf16 %v540_v40 }
  0x10   :  { %572 = vmatprep.subr.bf16.mxu0 %v616_v9  ;;  %600 = vmatprep.subr.bf16.mxu1 %v616_v9  ;;  %v493_v54 = vunpack.c.h.bf16 %v540_v40  ;;  %v86_v55 = vsel %vm54_vm9, %v473_v23, %v70_v41  ;;  %v93_v56 = vsel %vm61_vm10, %v488_v34, %v77_v44  ;;  %v94_v57 = vsel %vm62_vm11, %v489_v35, %v78_v45 }
  0x11   :  { %v98_v58 = vpack.c.bf16 %v84_v48, %v83_v47  ;;  %vm55_vm12 = vcmp.ge.f32.partialorder %v476_v46, 0.0  ;;  %v71_v59 = vmul.f32 0.2, %v476_v46  ;;  %v72_v60 = vmul.f32 0.2, %v477_v50 }
  0x12   :  { %v102_v61 = vpack.c.bf16 %v92_v52, %v91_v51  ;;  %v99_v62 = vpack.c.bf16 %v86_v55, %v85_v49  ;;  %v103_v63 = vpack.c.bf16 %v94_v57, %v93_v56  ;;  %v79_v0 = vmul.f32 0.2, %v492_v53 }
  0x13   :  { %573 = vmatpush3.bf16.msra.mxu0 %v616_v9  ;;  %608 = vmatpush3.bf16.msra.mxu1 %v616_v9  ;;  %v80_v1 = vmul.f32 0.2, %v493_v54  ;;  %vm56_vm13 = vcmp.ge.f32.partialorder %v477_v50, 0.0  ;;  %vm63_vm14 = vcmp.ge.f32.partialorder %v492_v53, 0.0  ;;  %vm64_vm15 = vcmp.ge.f32.partialorder %v493_v54, 0.0 }
  0x14   :  { %574 = vmatprep.subr.bf16.mxu0 %v617_v17  ;;  %601 = vmatprep.subr.bf16.mxu1 %v617_v17  ;;  %v87_v2 = vsel %vm55_vm12, %v476_v46, %v71_v59  ;;  %v88_v3 = vsel %vm56_vm13, %v477_v50, %v72_v60  ;;  %v95_v4 = vsel %vm63_vm14, %v492_v53, %v79_v0 }
  0x15   :  { %v96_v5 = vsel %vm64_vm15, %v493_v54, %v80_v1  ;;  %v100_v6 = vpack.c.bf16 %v88_v3, %v87_v2 }
  0x16   :  { %v104_v7 = vpack.c.bf16 %v96_v5, %v95_v4 }
  0x17   :  { %575 = vmatpush3.bf16.msra.mxu0 %v617_v17  ;;  %609 = vmatpush3.bf16.msra.mxu1 %v617_v17 }
  0x18   :  { %576 = vmatprep.subr.bf16.mxu0 %v618_v29  ;;  %602 = vmatprep.subr.bf16.mxu1 %v618_v29 }
  0x1b   :  { %577 = vmatpush3.bf16.msra.mxu0 %v618_v29  ;;  %610 = vmatpush3.bf16.msra.mxu1 %v618_v29 }
  0x1c   :  { %578 = vmatprep.subr.bf16.mxu0 %v619_v36  ;;  %603 = vmatprep.subr.bf16.mxu1 %v619_v36 }
  0x1f   :  { %579 = vmatpush3.bf16.msra.mxu0 %v619_v36  ;;  %611 = vmatpush3.bf16.msra.mxu1 %v619_v36 }
  0x22   :  { %581 = vmatmul.mubr.bf16.vlgmr.msra.gmra.mxu0 %v98_v58  ;;  %589 = vmatmul.mubr.bf16.vlgmr.msra.gmra.mxu1 %v102_v61 }
  0x23   :  { %584 = vmatprep.mubr.bf16.mxu0 %v99_v62  ;;  %592 = vmatprep.mubr.bf16.mxu1 %v103_v63 }
  0x2a   :  { %585 = vmatmul.mubr.bf16.gmra.mxu0 %v100_v6  ;;  %593 = vmatmul.mubr.bf16.gmra.mxu1 %v104_v7 }
  0xe2   :  { %v582_v8 = vpop.f32.mrf.mxu0  ;;  %v590_v9 = vpop.f32.mrf.mxu1 }
  0xe3   :  { %v701_v14 = vadd.f32 %v590_v9, %v421_v10  ;;  %v219_v16 = vadd.f32 %v582_v8, %v421_v10 }
  0xe4   :  { %v210_v11 = vpop.f32.mrf.mxu0  ;;  %v242_v12 = vpop.f32.mrf.mxu1 }
  0xe5   :  { %v211_v17 = vadd.f32 %v421_v10, %v210_v11  ;;  %v243_v21 = vadd.f32 %v421_v10, %v242_v12  ;;  %v297_v36 = vmul.f32 %v219_v16, %v219_v16  ;;  %v305_v12 = vmul.f32 %v701_v14, %v701_v14 }
  0xe6   :  { %v583_v13 = vpop.f32.mrf.mxu0  ;;  %v591_v15 = vpop.f32.mrf.mxu1 }
  0xe7   :  { %v222_v18 = vadd.f32 %v583_v13, %v421_v10  ;;  %v703_v19 = vadd.f32 %v591_v15, %v421_v10  ;;  %v295_v29 = vmul.f32 %v211_v17, %v211_v17  ;;  %v303_v6 = vmul.f32 %v243_v21, %v243_v21 }
  0xe8   :  { %v213_v20 = vpop.f32.mrf.mxu0  ;;  %v245_v22 = vpop.f32.mrf.mxu1 }
  0xe9   :  { %v502_v23 = vpack.c.bf16 %v222_v18, %v219_v16  ;;  %v214_v24 = vadd.f32 %v421_v10, %v213_v20  ;;  %v522_v26 = vpack.c.bf16 %v703_v19, %v701_v14  ;;  %v246_v27 = vadd.f32 %v421_v10, %v245_v22 }
  0xea   :  { %v586_v25 = vpop.f32.mrf.mxu0  ;;  %v594_v28 = vpop.f32.mrf.mxu1  ;;  %v298_v40 = vmul.f32 %v222_v18, %v222_v18 }
  0xeb   :  { %541 = vst [vmem:[%s746_s3 + $0x8] sm:$0xff] %v502_v23   ;;  %v273_v30 = vadd.f32 %v214_v24, %v211_v17  ;;  %v296_v31 = vmul.f32 %v214_v24, %v214_v24  ;;  %v497_v32 = vpack.c.bf16 %v214_v24, %v211_v17  ;;  %545 = vst [vmem:[%s746_s3 + $0x28] sm:$0xff] %v522_v26  }
  0xec   :  { %v226_v33 = vpop.f32.mrf.mxu0  ;;  %v517_v34 = vpack.c.bf16 %v246_v27, %v243_v21  ;;  %v258_v35 = vpop.f32.mrf.mxu1  ;;  %v267_v42 = vadd.f32 %v594_v28, %v421_v10  ;;  %v235_v45 = vadd.f32 %v586_v25, %v421_v10 }
  0xed   :  { %v274_v37 = vadd.f32 %v273_v30, %v219_v16  ;;  %v311_v38 = vadd.f32 %v296_v31, %v295_v29  ;;  %498 = vst [vmem:[%s746_s3] sm:$0xff] %v497_v32   ;;  %v227_v39 = vadd.f32 %v421_v10, %v226_v33  ;;  %v259_v49 = vadd.f32 %v421_v10, %v258_v35 }
  0xee   :  { %v587_v41 = vpop.f32.mrf.mxu0  ;;  %544 = vst [vmem:[%s746_s3 + $0x20] sm:$0xff] %v517_v34   ;;  %v595_v43 = vpop.f32.mrf.mxu1  ;;  %v301_v0 = vmul.f32 %v235_v45, %v235_v45  ;;  %v306_v16 = vmul.f32 %v703_v19, %v703_v19  ;;  %v309_v26 = vmul.f32 %v267_v42, %v267_v42 }
  0xef   :  { %v312_v44 = vadd.f32 %v311_v38, %v297_v36  ;;  %v275_v46 = vadd.f32 %v274_v37, %v222_v18  ;;  %v238_v47 = vadd.f32 %v587_v41, %v421_v10  ;;  %v270_v50 = vadd.f32 %v595_v43, %v421_v10 }
  0xf0   :  { %v229_v48 = vpop.f32.mrf.mxu0  ;;  %v261_v51 = vpop.f32.mrf.mxu1  ;;  %v299_v53 = vmul.f32 %v227_v39, %v227_v39  ;;  %v307_v22 = vmul.f32 %v259_v49, %v259_v49 }
  0xf1   :  { %v276_v52 = vadd.f32 %v275_v46, %v227_v39  ;;  %v313_v54 = vadd.f32 %v312_v44, %v298_v40  ;;  %v512_v55 = vpack.c.bf16 %v238_v47, %v235_v45  ;;  %v230_v56 = vadd.f32 %v421_v10, %v229_v48 }
  0xf2   :  { %v532_v57 = vpack.c.bf16 %v270_v50, %v267_v42  ;;  %v262_v58 = vadd.f32 %v421_v10, %v261_v51  ;;  %v302_v3 = vmul.f32 %v238_v47, %v238_v47  ;;  %v304_v10 = vmul.f32 %v246_v27, %v246_v27 }
  0xf3   :  { %v314_v59 = vadd.f32 %v313_v54, %v299_v53  ;;  %543 = vst [vmem:[%s746_s3 + $0x18] sm:$0xff] %v512_v55   ;;  %v277_v60 = vadd.f32 %v276_v52, %v230_v56  ;;  %v300_v61 = vmul.f32 %v230_v56, %v230_v56  ;;  %v507_v62 = vpack.c.bf16 %v230_v56, %v227_v39 }
  0xf4   :  { %547 = vst [vmem:[%s746_s3 + $0x38] sm:$0xff] %v532_v57   ;;  %v527_v63 = vpack.c.bf16 %v262_v58, %v259_v49  ;;  %v308_v25 = vmul.f32 %v262_v58, %v262_v58  ;;  %v310_v29 = vmul.f32 %v270_v50, %v270_v50 }
  0xf5   :  { %v278_v1 = vadd.f32 %v277_v60, %v235_v45  ;;  %v315_v2 = vadd.f32 %v314_v59, %v300_v61  ;;  %542 = vst [vmem:[%s746_s3 + $0x10] sm:$0xff] %v507_v62  }
  0xf6   :  { %546 = vst [vmem:[%s746_s3 + $0x30] sm:$0xff] %v527_v63  }
  0xf7   :  { %v316_v4 = vadd.f32 %v315_v2, %v301_v0  ;;  %v279_v5 = vadd.f32 %v278_v1, %v238_v47 }
  0xf9   :  { %v280_v7 = vadd.f32 %v279_v5, %v243_v21  ;;  %v317_v8 = vadd.f32 %v316_v4, %v302_v3 }
  0xfb   :  { %v281_v9 = vadd.f32 %v280_v7, %v246_v27  ;;  %v318_v11 = vadd.f32 %v317_v8, %v303_v6 }
  0xfd   :  { %v282_v13 = vadd.f32 %v281_v9, %v701_v14  ;;  %v319_v15 = vadd.f32 %v318_v11, %v304_v10 }
  0xff   :  { %v320_v17 = vadd.f32 %v319_v15, %v305_v12  ;;  %v283_v18 = vadd.f32 %v282_v13, %v703_v19 }
 0x101   :  { %v284_v20 = vadd.f32 %v283_v18, %v259_v49  ;;  %v321_v23 = vadd.f32 %v320_v17, %v306_v16 }
 0x103   :  { %v322_v21 = vadd.f32 %v321_v23, %v307_v22  ;;  %v285_v24 = vadd.f32 %v284_v20, %v262_v58 }
 0x105   :  { %v286_v27 = vadd.f32 %v285_v24, %v267_v42  ;;  %v323_v28 = vadd.f32 %v322_v21, %v308_v25 }
 0x107   :  { %v287_v30 = vadd.f32 %v286_v27, %v270_v50  ;;  %v324_v31 = vadd.f32 %v323_v28, %v309_v26 }
 0x109   :  { %v288_v14 = vrot.slane %v287_v30, 4  ;;  %v325_v32 = vadd.f32 %v324_v31, %v310_v29 }
 0x10b   :  { %v289_v33 = vadd.f32 %v288_v14, %v287_v30  ;;  %v326_v34 = vrot.slane %v325_v32, 4 }
 0x10d   :  { %v290_v35 = vrot.slane %v289_v33, 2  ;;  %v327_v36 = vadd.f32 %v326_v34, %v325_v32 }
 0x10f   :  { %v291_v37 = vadd.f32 %v290_v35, %v289_v33  ;;  %v328_v19 = vrot.slane %v327_v36, 2 }
 0x111   :  { %v292_v38 = vrot.slane %v291_v37, 1  ;;  %v329_v39 = vadd.f32 %v328_v19, %v327_v36 }
 0x113   :  { %v293_v40 = vadd.f32 %v292_v38, %v291_v37  ;;  %v330_v41 = vrot.slane %v329_v39, 1 }
 0x115   :  { %294 = vst [vmem:[%s747_s4] sm:$0x1] %v293_v40  ;;  %v331_v42 = vadd.f32 %v330_v41, %v329_v39 }
 0x117   :  { %332 = vst [vmem:[%s747_s4 + $0x1] sm:$0x1] %v331_v42 }

// kernel: _lambda_.12
= control target key start
LH: loop header
LB: loop body
LE: loop exit
PB: predicated region body
PF: predicated region fallthrough
CT: control target
= control target key end

     0   :  { %s489_s1 = inlined_call_operand.vmem [shape: bf16[1,256,128], index: 1, kind: input, shape index: {}]   ;;  %s490_s0 = inlined_call_operand.vmem [shape: bf16[1,32,256], index: 0, kind: input, shape index: {}]   ;;  %s491_s2 = inlined_call_operand.vmem [shape: f32[1,128], index: 2, kind: input, shape index: {}]   ;;  %s492_s3 = inlined_call_operand.vmem [shape: bf16[1,32,128], index: 3, kind: output, shape index: {0}]   ;;  %s493_s4 = inlined_call_operand.vmem [shape: f32[1,1,2,128], index: 4, kind: output, shape index: {1}]  }
   0x1   :  { %v373_v0 = vld [vmem:[%s489_s1 + $0x78] sm:$0xff]   ;;  %v375_v2 = vld [vmem:[%s489_s1 + $0x70] sm:$0xff]   ;;  %v377_v4 = vld [vmem:[%s489_s1 + $0x68] sm:$0xff]  }
   0x2   :  { %v374_v1 = vld [vmem:[%s489_s1 + $0x38] sm:$0xff]   ;;  %329 = vmatprep.subr.bf16.mxu0 %v373_v0  ;;  %357 = vmatprep.subr.bf16.mxu1 %v373_v0  ;;  %v376_v3 = vld [vmem:[%s489_s1 + $0x30] sm:$0xff]   ;;  %v378_v5 = vld [vmem:[%s489_s1 + $0x28] sm:$0xff]  }
   0x3   :  { %330 = vmatpush3.bf16.msra.mxu0 %v374_v1  ;;  %365 = vmatpush3.bf16.msra.mxu1 %v374_v1  ;;  %v379_v6 = vld [vmem:[%s489_s1 + $0x60] sm:$0xff]   ;;  %v381_v8 = vld [vmem:[%s489_s1 + $0x58] sm:$0xff]   ;;  %v383_v10 = vld [vmem:[%s489_s1 + $0x50] sm:$0xff]  }
   0x4   :  { %331 = vmatprep.subr.bf16.mxu0 %v375_v2  ;;  %358 = vmatprep.subr.bf16.mxu1 %v375_v2  ;;  %v380_v7 = vld [vmem:[%s489_s1 + $0x20] sm:$0xff]   ;;  %v382_v9 = vld [vmem:[%s489_s1 + $0x18] sm:$0xff]   ;;  %v18_v12 = vld [vmem:[%s490_s0 + $0x8] sm:$0xff] }
   0x5   :  { %v17_v11 = vld [vmem:[%s490_s0] sm:$0xff]  ;;  %v19_v13 = vld [vmem:[%s490_s0 + $0x10] sm:$0xff]  ;;  %v23_v16 = vunpack.c.l.bf16 %v18_v12  ;;  %v24_v17 = vunpack.c.h.bf16 %v18_v12  ;;  %v20_v18 = vld [vmem:[%s490_s0 + $0x18] sm:$0xff] }
   0x6   :  { %v21_v14 = vunpack.c.l.bf16 %v17_v11  ;;  %v22_v15 = vunpack.c.h.bf16 %v17_v11  ;;  %v384_v19 = vld [vmem:[%s489_s1 + $0x10] sm:$0xff]   ;;  %v385_v20 = vld [vmem:[%s489_s1 + $0x48] sm:$0xff]   ;;  %v25_v21 = vunpack.c.l.bf16 %v19_v13  ;;  %v26_v22 = vunpack.c.h.bf16 %v19_v13  ;;  %v387_v36 = vld [vmem:[%s489_s1 + $0x40] sm:$0xff]  }
   0x7   :  { %332 = vmatpush3.bf16.msra.mxu0 %v376_v3  ;;  %366 = vmatpush3.bf16.msra.mxu1 %v376_v3  ;;  %v27_v23 = vunpack.c.l.bf16 %v20_v18  ;;  %v28_v24 = vunpack.c.h.bf16 %v20_v18  ;;  %vm32_vm1 = vcmp.ge.f32.partialorder %v24_v17, 0.0  ;;  %v40_v26 = vmul.f32 0.2, %v24_v17  ;;  %v386_v35 = vld [vmem:[%s489_s1 + $0x8] sm:$0xff]   ;;  %v388_v42 = vld [vmem:[%s489_s1] sm:$0xff]  }
   0x8   :  { %333 = vmatprep.subr.bf16.mxu0 %v377_v4  ;;  %359 = vmatprep.subr.bf16.mxu1 %v377_v4  ;;  %vm30_vm0 = vcmp.ge.f32.partialorder %v22_v15, 0.0  ;;  %v38_v25 = vmul.f32 0.2, %v22_v15  ;;  %vm34_vm2 = vcmp.ge.f32.partialorder %v26_v22, 0.0  ;;  %v42_v27 = vmul.f32 0.2, %v26_v22 }
   0x9   :  { %vm36_vm3 = vcmp.ge.f32.partialorder %v28_v24, 0.0  ;;  %v44_v28 = vmul.f32 0.2, %v28_v24  ;;  %v48_v30 = vsel %vm32_vm1, %v24_v17, %v40_v26  ;;  %v37_v34 = vmul.f32 0.2, %v21_v14 }
   0xa   :  { %v46_v29 = vsel %vm30_vm0, %v22_v15, %v38_v25  ;;  %v50_v32 = vsel %vm34_vm2, %v26_v22, %v42_v27  ;;  %vm29_vm4 = vcmp.ge.f32.partialorder %v21_v14, 0.0  ;;  %vm31_vm5 = vcmp.ge.f32.partialorder %v23_v16, 0.0  ;;  %v293_v53 = vld [vmem:[%s491_s2] ss:$0 sm:$0xff] }
   0xb   :  { %334 = vmatpush3.bf16.msra.mxu0 %v378_v5  ;;  %367 = vmatpush3.bf16.msra.mxu1 %v378_v5  ;;  %v54_v31 = vpack.c.bf16 %v48_v30, %v46_v29  ;;  %v52_v33 = vsel %vm36_vm3, %v28_v24, %v44_v28  ;;  %v39_v38 = vmul.f32 0.2, %v23_v16  ;;  %vm33_vm6 = vcmp.ge.f32.partialorder %v25_v21, 0.0 }
   0xc   :  { %335 = vmatprep.subr.bf16.mxu0 %v379_v6  ;;  %360 = vmatprep.subr.bf16.mxu1 %v379_v6  ;;  %v56_v37 = vpack.c.bf16 %v52_v33, %v50_v32  ;;  %vm35_vm7 = vcmp.ge.f32.partialorder %v27_v23, 0.0  ;;  %v41_v39 = vmul.f32 0.2, %v25_v21  ;;  %v43_v40 = vmul.f32 0.2, %v27_v23 }
   0xd   :  { %224 = vmatprep.mubr.bf16.mxu0 %v54_v31  ;;  %v45_v41 = vsel %vm29_vm4, %v21_v14, %v37_v34  ;;  %v47_v43 = vsel %vm31_vm5, %v23_v16, %v39_v38 }
   0xe   :  { %232 = vmatprep.mubr.bf16.mxu1 %v56_v37  ;;  %v49_v44 = vsel %vm33_vm6, %v25_v21, %v41_v39  ;;  %v51_v45 = vsel %vm35_vm7, %v27_v23, %v43_v40  ;;  %v53_v46 = vpack.c.bf16 %v47_v43, %v45_v41 }
   0xf   :  { %336 = vmatpush3.bf16.msra.mxu0 %v380_v7  ;;  %368 = vmatpush3.bf16.msra.mxu1 %v380_v7  ;;  %v55_v47 = vpack.c.bf16 %v51_v45, %v49_v44 }
  0x10   :  { %337 = vmatprep.subr.bf16.mxu0 %v381_v8  ;;  %361 = vmatprep.subr.bf16.mxu1 %v381_v8 }
  0x13   :  { %338 = vmatpush3.bf16.msra.mxu0 %v382_v9  ;;  %369 = vmatpush3.bf16.msra.mxu1 %v382_v9 }
  0x14   :  { %339 = vmatprep.subr.bf16.mxu0 %v383_v10  ;;  %362 = vmatprep.subr.bf16.mxu1 %v383_v10 }
  0x17   :  { %340 = vmatpush3.bf16.msra.mxu0 %v384_v19  ;;  %370 = vmatpush3.bf16.msra.mxu1 %v384_v19 }
  0x18   :  { %341 = vmatprep.subr.bf16.mxu0 %v385_v20  ;;  %363 = vmatprep.subr.bf16.mxu1 %v385_v20 }
  0x1b   :  { %342 = vmatpush3.bf16.msra.mxu0 %v386_v35  ;;  %371 = vmatpush3.bf16.msra.mxu1 %v386_v35 }
  0x1c   :  { %343 = vmatprep.subr.bf16.mxu0 %v387_v36  ;;  %364 = vmatprep.subr.bf16.mxu1 %v387_v36 }
  0x1f   :  { %344 = vmatpush3.bf16.msra.mxu0 %v388_v42  ;;  %372 = vmatpush3.bf16.msra.mxu1 %v388_v42 }
  0x22   :  { %225 = vmatmul.mubr.bf16.vlgmr.msra.gmra.mxu0 %v53_v46  ;;  %233 = vmatmul.mubr.bf16.vlgmr.msra.gmra.mxu1 %v55_v47 }
  0xe2   :  { %v345_v48 = vpop.f32.mrf.mxu0  ;;  %v351_v49 = vpop.f32.mrf.mxu1 }
  0xe4   :  { %v346_v50 = vpop.f32.mrf.mxu0  ;;  %v352_v51 = vpop.f32.mrf.mxu1 }
  0xe5   :  { %v347_v52 = vadd.f32 %v346_v50, %v345_v48  ;;  %v353_v56 = vadd.f32 %v352_v51, %v351_v49 }
  0xe6   :  { %v348_v54 = vpop.f32.mrf.mxu0  ;;  %v354_v55 = vpop.f32.mrf.mxu1 }
  0xe7   :  { %v227_v59 = vadd.f32 %v347_v52, %v293_v53  ;;  %v235_v62 = vadd.f32 %v353_v56, %v293_v53 }
  0xe8   :  { %v349_v57 = vpop.f32.mrf.mxu0  ;;  %v355_v58 = vpop.f32.mrf.mxu1 }
  0xe9   :  { %v350_v60 = vadd.f32 %v349_v57, %v348_v54  ;;  %v356_v61 = vadd.f32 %v355_v58, %v354_v55  ;;  %v251_v1 = vmul.f32 %v227_v59, %v227_v59  ;;  %v253_v6 = vmul.f32 %v235_v62, %v235_v62 }
  0xeb   :  { %v230_v63 = vadd.f32 %v350_v60, %v293_v53  ;;  %v238_v0 = vadd.f32 %v356_v61, %v293_v53 }
  0xed   :  { %v241_v2 = vadd.f32 %v230_v63, %v227_v59  ;;  %v252_v3 = vmul.f32 %v230_v63, %v230_v63  ;;  %v321_v4 = vpack.c.bf16 %v230_v63, %v227_v59  ;;  %v326_v5 = vpack.c.bf16 %v238_v0, %v235_v62 }
  0xee   :  { %v254_v10 = vmul.f32 %v238_v0, %v238_v0 }
  0xef   :  { %v255_v7 = vadd.f32 %v252_v3, %v251_v1  ;;  %322 = vst [vmem:[%s492_s3] sm:$0xff] %v321_v4   ;;  %v242_v8 = vadd.f32 %v241_v2, %v235_v62  ;;  %328 = vst [vmem:[%s492_s3 + $0x8] sm:$0xff] %v326_v5  }
  0xf1   :  { %v243_v9 = vadd.f32 %v242_v8, %v238_v0  ;;  %v256_v11 = vadd.f32 %v255_v7, %v253_v6 }
  0xf3   :  { %v244_v12 = vrot.slane %v243_v9, 4  ;;  %v257_v13 = vadd.f32 %v256_v11, %v254_v10 }
  0xf5   :  { %v245_v14 = vadd.f32 %v244_v12, %v243_v9  ;;  %v258_v15 = vrot.slane %v257_v13, 4 }
  0xf7   :  { %v246_v16 = vrot.slane %v245_v14, 2  ;;  %v259_v17 = vadd.f32 %v258_v15, %v257_v13 }
  0xf9   :  { %v247_v18 = vadd.f32 %v246_v16, %v245_v14  ;;  %v260_v19 = vrot.slane %v259_v17, 2 }
  0xfb   :  { %v248_v20 = vrot.slane %v247_v18, 1  ;;  %v261_v21 = vadd.f32 %v260_v19, %v259_v17 }
  0xfd   :  { %v249_v22 = vadd.f32 %v248_v20, %v247_v18  ;;  %v262_v23 = vrot.slane %v261_v21, 1 }
  0xff   :  { %250 = vst [vmem:[%s493_s4] sm:$0x1] %v249_v22  ;;  %v263_v24 = vadd.f32 %v262_v23, %v261_v21 }
 0x101   :  { %264 = vst [vmem:[%s493_s4 + $0x1] sm:$0x1] %v263_v24 }

// kernel: _lambda_.13
= control target key start
LH: loop header
LB: loop body
LE: loop exit
PB: predicated region body
PF: predicated region fallthrough
CT: control target
= control target key end

     0   :  { %s655_s1 = inlined_call_operand.vmem [shape: bf16[1,512,128], index: 1, kind: input, shape index: {}]   ;;  %s656_s0 = inlined_call_operand.vmem [shape: bf16[1,8,512], index: 0, kind: input, shape index: {}]   ;;  %s657_s2 = inlined_call_operand.vmem [shape: f32[1,128], index: 2, kind: input, shape index: {}]   ;;  %s658_s3 = inlined_call_operand.vmem [shape: bf16[1,8,128], index: 3, kind: output, shape index: {0}]   ;;  %s659_s4 = inlined_call_operand.vmem [shape: f32[1,1,2,128], index: 4, kind: output, shape index: {1}]  }
   0x1   :  { %v484_v0 = vld [vmem:[%s655_s1 + $0x78] sm:$0xff]   ;;  %v488_v4 = vld [vmem:[%s655_s1 + $0x70] sm:$0xff]   ;;  %v492_v8 = vld [vmem:[%s655_s1 + $0x68] sm:$0xff]  }
   0x2   :  { %v485_v1 = vld [vmem:[%s655_s1 + $0xf8] sm:$0xff]   ;;  %440 = vmatprep.subr.bf16.mxu0 %v484_v0  ;;  %v489_v5 = vld [vmem:[%s655_s1 + $0xf0] sm:$0xff]   ;;  %v493_v9 = vld [vmem:[%s655_s1 + $0xe8] sm:$0xff]  }
   0x3   :  { %v486_v2 = vld [vmem:[%s655_s1 + $0x38] sm:$0xff]   ;;  %462 = vmatprep.subr.bf16.mxu1 %v485_v1  ;;  %v490_v6 = vld [vmem:[%s655_s1 + $0x30] sm:$0xff]   ;;  %v494_v10 = vld [vmem:[%s655_s1 + $0x28] sm:$0xff]  }
   0x4   :  { %v487_v3 = vld [vmem:[%s655_s1 + $0xb8] sm:$0xff]   ;;  %441 = vmatpush3.bf16.msra.mxu0 %v486_v2  ;;  %v491_v7 = vld [vmem:[%s655_s1 + $0xb0] sm:$0xff]   ;;  %v495_v11 = vld [vmem:[%s655_s1 + $0xa8] sm:$0xff]  }
   0x5   :  { %463 = vmatpush3.bf16.msra.mxu1 %v487_v3  ;;  %442 = vmatprep.subr.bf16.mxu0 %v488_v4  ;;  %v496_v12 = vld [vmem:[%s655_s1 + $0x60] sm:$0xff]   ;;  %v500_v16 = vld [vmem:[%s655_s1 + $0x58] sm:$0xff]   ;;  %v504_v20 = vld [vmem:[%s655_s1 + $0x50] sm:$0xff]  }
   0x6   :  { %464 = vmatprep.subr.bf16.mxu1 %v489_v5  ;;  %v497_v13 = vld [vmem:[%s655_s1 + $0xe0] sm:$0xff]   ;;  %v501_v17 = vld [vmem:[%s655_s1 + $0xd8] sm:$0xff]   ;;  %v505_v21 = vld [vmem:[%s655_s1 + $0xd0] sm:$0xff]  }
   0x7   :  { %v498_v14 = vld [vmem:[%s655_s1 + $0x20] sm:$0xff]   ;;  %v502_v18 = vld [vmem:[%s655_s1 + $0x18] sm:$0xff]   ;;  %v506_v22 = vld [vmem:[%s655_s1 + $0x10] sm:$0xff]  }
   0x8   :  { %443 = vmatpush3.bf16.msra.mxu0 %v490_v6  ;;  %v499_v15 = vld [vmem:[%s655_s1 + $0xa0] sm:$0xff]   ;;  %v503_v19 = vld [vmem:[%s655_s1 + $0x98] sm:$0xff]   ;;  %v507_v23 = vld [vmem:[%s655_s1 + $0x90] sm:$0xff]  }
   0x9   :  { %465 = vmatpush3.bf16.msra.mxu1 %v491_v7  ;;  %444 = vmatprep.subr.bf16.mxu0 %v492_v8  ;;  %v508_v24 = vld [vmem:[%s655_s1 + $0x48] sm:$0xff]   ;;  %v512_v28 = vld [vmem:[%s655_s1 + $0x40] sm:$0xff]  }
   0xa   :  { %466 = vmatprep.subr.bf16.mxu1 %v493_v9  ;;  %v509_v25 = vld [vmem:[%s655_s1 + $0xc8] sm:$0xff]   ;;  %v513_v29 = vld [vmem:[%s655_s1 + $0xc0] sm:$0xff]  }
   0xb   :  { %v510_v26 = vld [vmem:[%s655_s1 + $0x8] sm:$0xff]   ;;  %v514_v30 = vld [vmem:[%s655_s1] sm:$0xff]  }
   0xc   :  { %445 = vmatpush3.bf16.msra.mxu0 %v494_v10  ;;  %v511_v27 = vld [vmem:[%s655_s1 + $0x88] sm:$0xff]   ;;  %v515_v31 = vld [vmem:[%s655_s1 + $0x80] sm:$0xff]  }
   0xd   :  { %467 = vmatpush3.bf16.msra.mxu1 %v495_v11  ;;  %446 = vmatprep.subr.bf16.mxu0 %v496_v12  ;;  %v17_v32 = vld [vmem:[%s656_s0] sm:$0xff]  ;;  %v18_v33 = vld [vmem:[%s656_s0 + $0x8] sm:$0xff] }
   0xe   :  { %468 = vmatprep.subr.bf16.mxu1 %v497_v13  ;;  %v19_v34 = vunpack.c.l.bf16 %v17_v32  ;;  %v20_v35 = vunpack.c.h.bf16 %v17_v32  ;;  %v21_v36 = vunpack.c.l.bf16 %v18_v33  ;;  %v22_v37 = vunpack.c.h.bf16 %v18_v33  ;;  %v407_v52 = vld [vmem:[%s657_s2] ss:$0 sm:$0xff] }
  0x10   :  { %447 = vmatpush3.bf16.msra.mxu0 %v498_v14  ;;  %vm24_vm0 = vcmp.ge.f32.partialorder %v20_v35, 0.0  ;;  %v28_v38 = vmul.f32 0.2, %v20_v35  ;;  %vm26_vm1 = vcmp.ge.f32.partialorder %v22_v37, 0.0  ;;  %v30_v39 = vmul.f32 0.2, %v22_v37 }
  0x11   :  { %469 = vmatpush3.bf16.msra.mxu1 %v499_v15  ;;  %448 = vmatprep.subr.bf16.mxu0 %v500_v16  ;;  %vm23_vm2 = vcmp.ge.f32.partialorder %v19_v34, 0.0  ;;  %v27_v40 = vmul.f32 0.2, %v19_v34  ;;  %vm25_vm3 = vcmp.ge.f32.partialorder %v21_v36, 0.0  ;;  %v29_v41 = vmul.f32 0.2, %v21_v36 }
  0x12   :  { %470 = vmatprep.subr.bf16.mxu1 %v501_v17  ;;  %v32_v42 = vsel %vm24_vm0, %v20_v35, %v28_v38  ;;  %v34_v43 = vsel %vm26_vm1, %v22_v37, %v30_v39 }
  0x13   :  { %v36_v44 = vpack.c.bf16 %v32_v42, %v32_v42  ;;  %v38_v45 = vpack.c.bf16 %v34_v43, %v34_v43  ;;  %v31_v46 = vsel %vm23_vm2, %v19_v34, %v27_v40  ;;  %v33_v47 = vsel %vm25_vm3, %v21_v36, %v29_v41 }
  0x14   :  { %449 = vmatpush3.bf16.msra.mxu0 %v502_v18  ;;  %v35_v48 = vpack.c.bf16 %v31_v46, %v31_v46  ;;  %v37_v49 = vpack.c.bf16 %v33_v47, %v33_v47 }
  0x15   :  { %471 = vmatpush3.bf16.msra.mxu1 %v503_v19  ;;  %450 = vmatprep.subr.bf16.mxu0 %v504_v20 }
  0x16   :  { %472 = vmatprep.subr.bf16.mxu1 %v505_v21  ;;  %334 = vmatprep.mubr.bf16.mxu0 %v36_v44 }
  0x17   :  { %374 = vmatprep.mubr.bf16.mxu1 %v38_v45 }
  0x18   :  { %451 = vmatpush3.bf16.msra.mxu0 %v506_v22 }
  0x19   :  { %473 = vmatpush3.bf16.msra.mxu1 %v507_v23  ;;  %452 = vmatprep.subr.bf16.mxu0 %v508_v24 }
  0x1a   :  { %474 = vmatprep.subr.bf16.mxu1 %v509_v25 }
  0x1c   :  { %453 = vmatpush3.bf16.msra.mxu0 %v510_v26 }
  0x1d   :  { %475 = vmatpush3.bf16.msra.mxu1 %v511_v27  ;;  %454 = vmatprep.subr.bf16.mxu0 %v512_v28 }
  0x1e   :  { %476 = vmatprep.subr.bf16.mxu1 %v513_v29 }
  0x20   :  { %455 = vmatpush3.bf16.msra.mxu0 %v514_v30 }
  0x21   :  { %477 = vmatpush3.bf16.msra.mxu1 %v515_v31 }
  0x23   :  { %335 = vmatmul.mubr.bf16.vlgmr.msra.gmra.mxu0 %v35_v48 }
  0x24   :  { %375 = vmatmul.mubr.bf16.vlgmr.msra.gmra.mxu1 %v37_v49 }
  0xe3   :  { %v456_v50 = vpop.f32.mrf.mxu0 }
  0xe4   :  { %v478_v51 = vpop.f32.mrf.mxu1 }
  0xe5   :  { %v457_v53 = vpop.f32.mrf.mxu0 }
  0xe6   :  { %v479_v54 = vpop.f32.mrf.mxu1  ;;  %v458_v55 = vadd.f32 %v457_v53, %v456_v50 }
  0xe7   :  { %v459_v56 = vpop.f32.mrf.mxu0  ;;  %v480_v59 = vadd.f32 %v479_v54, %v478_v51 }
  0xe8   :  { %v481_v57 = vpop.f32.mrf.mxu1  ;;  %v337_v58 = vadd.f32 %v458_v55, %v407_v52 }
  0xe9   :  { %v460_v60 = vpop.f32.mrf.mxu0 }
  0xea   :  { %v482_v61 = vpop.f32.mrf.mxu1  ;;  %v377_v62 = vadd.f32 %v480_v59, %v337_v58 }
  0xec   :  { %v382_v63 = vrot.slane %v377_v62, 4  ;;  %v389_v0 = vmul.f32 %v377_v62, %v377_v62  ;;  %v397_v1 = vpack.c.bf16 %v377_v62, %v377_v62 }
  0xee   :  { %v383_v2 = vadd.f32 %v382_v63, %v377_v62  ;;  %v390_v3 = vrot.slane %v389_v0, 4  ;;  %398 = vst [vmem:[%s658_s3] sm:$0xf] %v397_v1 }
  0xf0   :  { %v384_v4 = vrot.slane %v383_v2, 2  ;;  %v391_v5 = vadd.f32 %v390_v3, %v389_v0 }
  0xf2   :  { %v385_v6 = vadd.f32 %v384_v4, %v383_v2  ;;  %v392_v7 = vrot.slane %v391_v5, 2 }
  0xf4   :  { %v386_v8 = vrot.slane %v385_v6, 1  ;;  %v393_v9 = vadd.f32 %v392_v7, %v391_v5 }
  0xf6   :  { %v387_v10 = vadd.f32 %v386_v8, %v385_v6  ;;  %v394_v11 = vrot.slane %v393_v9, 1 }
  0xf8   :  { %388 = vst [vmem:[%s659_s4] sm:$0x1] %v387_v10  ;;  %v395_v12 = vadd.f32 %v394_v11, %v393_v9 }
  0xfa   :  { %396 = vst [vmem:[%s659_s4 + $0x1] sm:$0x1] %v395_v12 }

// kernel: _lambda_.14
= control target key start
LH: loop header
LB: loop body
LE: loop exit
PB: predicated region body
PF: predicated region fallthrough
CT: control target
= control target key end

     0   :  { %s1191_s1 = inlined_call_operand.vmem [shape: bf16[1,1024,128], index: 1, kind: input, shape index: {}]   ;;  %s1192_s0 = inlined_call_operand.vmem [shape: bf16[1,8,1024], index: 0, kind: input, shape index: {}]   ;;  %s1193_s2 = inlined_call_operand.vmem [shape: f32[1,128], index: 2, kind: input, shape index: {}]   ;;  %s1194_s3 = inlined_call_operand.vmem [shape: bf16[1,8,128], index: 3, kind: output, shape index: {}]  }
   0x1   :  { %v897_v0 = vld [vmem:[%s1191_s1 + $0x78] sm:$0xff]   ;;  %v901_v4 = vld [vmem:[%s1191_s1 + $0x70] sm:$0xff]   ;;  %v905_v8 = vld [vmem:[%s1191_s1 + $0x68] sm:$0xff]  }
   0x2   :  { %v898_v1 = vld [vmem:[%s1191_s1 + $0xf8] sm:$0xff]   ;;  %809 = vmatprep.subr.bf16.mxu0 %v897_v0  ;;  %v902_v5 = vld [vmem:[%s1191_s1 + $0xf0] sm:$0xff]   ;;  %v906_v9 = vld [vmem:[%s1191_s1 + $0xe8] sm:$0xff]  }
   0x3   :  { %v899_v2 = vld [vmem:[%s1191_s1 + $0x38] sm:$0xff]   ;;  %831 = vmatprep.subr.bf16.mxu1 %v898_v1  ;;  %v903_v6 = vld [vmem:[%s1191_s1 + $0x30] sm:$0xff]   ;;  %v907_v10 = vld [vmem:[%s1191_s1 + $0x28] sm:$0xff]  }
   0x4   :  { %v900_v3 = vld [vmem:[%s1191_s1 + $0xb8] sm:$0xff]   ;;  %810 = vmatpush3.bf16.msra.mxu0 %v899_v2  ;;  %v904_v7 = vld [vmem:[%s1191_s1 + $0xb0] sm:$0xff]   ;;  %v908_v11 = vld [vmem:[%s1191_s1 + $0xa8] sm:$0xff]  }
   0x5   :  { %832 = vmatpush3.bf16.msra.mxu1 %v900_v3  ;;  %811 = vmatprep.subr.bf16.mxu0 %v901_v4  ;;  %v909_v12 = vld [vmem:[%s1191_s1 + $0x60] sm:$0xff]   ;;  %v913_v16 = vld [vmem:[%s1191_s1 + $0x58] sm:$0xff]   ;;  %v917_v20 = vld [vmem:[%s1191_s1 + $0x50] sm:$0xff]  }
   0x6   :  { %833 = vmatprep.subr.bf16.mxu1 %v902_v5  ;;  %v910_v13 = vld [vmem:[%s1191_s1 + $0xe0] sm:$0xff]   ;;  %v914_v17 = vld [vmem:[%s1191_s1 + $0xd8] sm:$0xff]   ;;  %v918_v21 = vld [vmem:[%s1191_s1 + $0xd0] sm:$0xff]  }
   0x7   :  { %v911_v14 = vld [vmem:[%s1191_s1 + $0x20] sm:$0xff]   ;;  %v915_v18 = vld [vmem:[%s1191_s1 + $0x18] sm:$0xff]   ;;  %v919_v22 = vld [vmem:[%s1191_s1 + $0x10] sm:$0xff]  }
   0x8   :  { %812 = vmatpush3.bf16.msra.mxu0 %v903_v6  ;;  %v912_v15 = vld [vmem:[%s1191_s1 + $0xa0] sm:$0xff]   ;;  %v916_v19 = vld [vmem:[%s1191_s1 + $0x98] sm:$0xff]   ;;  %v920_v23 = vld [vmem:[%s1191_s1 + $0x90] sm:$0xff]  }
   0x9   :  { %834 = vmatpush3.bf16.msra.mxu1 %v904_v7  ;;  %813 = vmatprep.subr.bf16.mxu0 %v905_v8  ;;  %v921_v24 = vld [vmem:[%s1191_s1 + $0x48] sm:$0xff]   ;;  %v925_v28 = vld [vmem:[%s1191_s1 + $0x40] sm:$0xff]   ;;  %v929_v38 = vld [vmem:[%s1191_s1 + $0x178] sm:$0xff]  }
   0xa   :  { %835 = vmatprep.subr.bf16.mxu1 %v906_v9  ;;  %v922_v25 = vld [vmem:[%s1191_s1 + $0xc8] sm:$0xff]   ;;  %v926_v29 = vld [vmem:[%s1191_s1 + $0xc0] sm:$0xff]   ;;  %v930_v39 = vld [vmem:[%s1191_s1 + $0x1f8] sm:$0xff]  }
   0xb   :  { %v923_v26 = vld [vmem:[%s1191_s1 + $0x8] sm:$0xff]   ;;  %v927_v30 = vld [vmem:[%s1191_s1] sm:$0xff]   ;;  %v931_v46 = vld [vmem:[%s1191_s1 + $0x138] sm:$0xff]  }
   0xc   :  { %814 = vmatpush3.bf16.msra.mxu0 %v907_v10  ;;  %v924_v27 = vld [vmem:[%s1191_s1 + $0x88] sm:$0xff]   ;;  %v928_v31 = vld [vmem:[%s1191_s1 + $0x80] sm:$0xff]   ;;  %v932_v51 = vld [vmem:[%s1191_s1 + $0x1b8] sm:$0xff]  }
   0xd   :  { %836 = vmatpush3.bf16.msra.mxu1 %v908_v11  ;;  %815 = vmatprep.subr.bf16.mxu0 %v909_v12  ;;  %v15_v32 = vld [vmem:[%s1192_s0] sm:$0xff]  ;;  %v16_v33 = vld [vmem:[%s1192_s0 + $0x8] sm:$0xff]  ;;  %v933_v54 = vld [vmem:[%s1191_s1 + $0x170] sm:$0xff]  }
   0xe   :  { %837 = vmatprep.subr.bf16.mxu1 %v910_v13  ;;  %v19_v34 = vunpack.c.l.bf16 %v15_v32  ;;  %v20_v35 = vunpack.c.h.bf16 %v15_v32  ;;  %v21_v36 = vunpack.c.l.bf16 %v16_v33  ;;  %v22_v37 = vunpack.c.h.bf16 %v16_v33  ;;  %v934_v55 = vld [vmem:[%s1191_s1 + $0x1f0] sm:$0xff]   ;;  %v937_v58 = vld [vmem:[%s1191_s1 + $0x168] sm:$0xff]   ;;  %v941_v62 = vld [vmem:[%s1191_s1 + $0x160] sm:$0xff]  }
   0xf   :  { %v935_v56 = vld [vmem:[%s1191_s1 + $0x130] sm:$0xff]   ;;  %v938_v59 = vld [vmem:[%s1191_s1 + $0x1e8] sm:$0xff]   ;;  %v942_v63 = vld [vmem:[%s1191_s1 + $0x1e0] sm:$0xff]  }
  0x10   :  { %816 = vmatpush3.bf16.msra.mxu0 %v911_v14  ;;  %vm28_vm0 = vcmp.ge.f32.partialorder %v20_v35, 0.0  ;;  %v36_v40 = vmul.f32 0.2, %v20_v35  ;;  %vm30_vm1 = vcmp.ge.f32.partialorder %v22_v37, 0.0  ;;  %v38_v41 = vmul.f32 0.2, %v22_v37 }
  0x11   :  { %838 = vmatpush3.bf16.msra.mxu1 %v912_v15  ;;  %817 = vmatprep.subr.bf16.mxu0 %v913_v16  ;;  %vm27_vm2 = vcmp.ge.f32.partialorder %v19_v34, 0.0  ;;  %v35_v42 = vmul.f32 0.2, %v19_v34  ;;  %vm29_vm3 = vcmp.ge.f32.partialorder %v21_v36, 0.0  ;;  %v37_v43 = vmul.f32 0.2, %v21_v36 }
  0x12   :  { %839 = vmatprep.subr.bf16.mxu1 %v914_v17  ;;  %v44_v44 = vsel %vm28_vm0, %v20_v35, %v36_v40  ;;  %v46_v45 = vsel %vm30_vm1, %v22_v37, %v38_v41  ;;  %v936_v57 = vld [vmem:[%s1191_s1 + $0x1b0] sm:$0xff]   ;;  %v939_v60 = vld [vmem:[%s1191_s1 + $0x128] sm:$0xff]   ;;  %v943_v0 = vld [vmem:[%s1191_s1 + $0x120] sm:$0xff]  }
  0x13   :  { %v52_v47 = vpack.c.bf16 %v44_v44, %v44_v44  ;;  %v54_v48 = vpack.c.bf16 %v46_v45, %v46_v45  ;;  %v43_v49 = vsel %vm27_vm2, %v19_v34, %v35_v42  ;;  %v45_v50 = vsel %vm29_vm3, %v21_v36, %v37_v43  ;;  %v940_v61 = vld [vmem:[%s1191_s1 + $0x1a8] sm:$0xff]   ;;  %v944_v1 = vld [vmem:[%s1191_s1 + $0x1a0] sm:$0xff]   ;;  %v945_v2 = vld [vmem:[%s1191_s1 + $0x158] sm:$0xff]  }
  0x14   :  { %818 = vmatpush3.bf16.msra.mxu0 %v915_v18  ;;  %v51_v52 = vpack.c.bf16 %v43_v49, %v43_v49  ;;  %v53_v53 = vpack.c.bf16 %v45_v50, %v45_v50  ;;  %v946_v3 = vld [vmem:[%s1191_s1 + $0x1d8] sm:$0xff]   ;;  %v949_v6 = vld [vmem:[%s1191_s1 + $0x150] sm:$0xff]   ;;  %v953_v10 = vld [vmem:[%s1191_s1 + $0x148] sm:$0xff]  }
  0x15   :  { %840 = vmatpush3.bf16.msra.mxu1 %v916_v19  ;;  %819 = vmatprep.subr.bf16.mxu0 %v917_v20  ;;  %v947_v4 = vld [vmem:[%s1191_s1 + $0x118] sm:$0xff]   ;;  %v950_v7 = vld [vmem:[%s1191_s1 + $0x1d0] sm:$0xff]   ;;  %v954_v11 = vld [vmem:[%s1191_s1 + $0x1c8] sm:$0xff]  }
  0x16   :  { %841 = vmatprep.subr.bf16.mxu1 %v918_v21  ;;  %610 = vmatprep.mubr.bf16.mxu0 %v52_v47  ;;  %v948_v5 = vld [vmem:[%s1191_s1 + $0x198] sm:$0xff]   ;;  %v951_v8 = vld [vmem:[%s1191_s1 + $0x110] sm:$0xff]   ;;  %v955_v12 = vld [vmem:[%s1191_s1 + $0x108] sm:$0xff]  }
  0x17   :  { %650 = vmatprep.mubr.bf16.mxu1 %v54_v48  ;;  %v952_v9 = vld [vmem:[%s1191_s1 + $0x190] sm:$0xff]   ;;  %v956_v13 = vld [vmem:[%s1191_s1 + $0x188] sm:$0xff]   ;;  %v957_v14 = vld [vmem:[%s1191_s1 + $0x140] sm:$0xff]  }
  0x18   :  { %820 = vmatpush3.bf16.msra.mxu0 %v919_v22  ;;  %v958_v15 = vld [vmem:[%s1191_s1 + $0x1c0] sm:$0xff]   ;;  %v17_v18 = vld [vmem:[%s1192_s0 + $0x10] sm:$0xff]  ;;  %v18_v21 = vld [vmem:[%s1192_s0 + $0x18] sm:$0xff] }
  0x19   :  { %842 = vmatpush3.bf16.msra.mxu1 %v920_v23  ;;  %821 = vmatprep.subr.bf16.mxu0 %v921_v24  ;;  %v959_v16 = vld [vmem:[%s1191_s1 + $0x100] sm:$0xff]   ;;  %v23_v19 = vunpack.c.l.bf16 %v17_v18  ;;  %v24_v20 = vunpack.c.h.bf16 %v17_v18  ;;  %v25_v22 = vunpack.c.l.bf16 %v18_v21  ;;  %v26_v23 = vunpack.c.h.bf16 %v18_v21 }
  0x1a   :  { %843 = vmatprep.subr.bf16.mxu1 %v922_v25  ;;  %v960_v17 = vld [vmem:[%s1191_s1 + $0x180] sm:$0xff]  }
  0x1b   :  { %vm32_vm4 = vcmp.ge.f32.partialorder %v24_v20, 0.0  ;;  %v40_v24 = vmul.f32 0.2, %v24_v20  ;;  %vm31_vm5 = vcmp.ge.f32.partialorder %v23_v19, 0.0  ;;  %v39_v25 = vmul.f32 0.2, %v23_v19 }
  0x1c   :  { %822 = vmatpush3.bf16.msra.mxu0 %v923_v26  ;;  %vm34_vm6 = vcmp.ge.f32.partialorder %v26_v23, 0.0  ;;  %v42_v26 = vmul.f32 0.2, %v26_v23  ;;  %vm33_vm7 = vcmp.ge.f32.partialorder %v25_v22, 0.0  ;;  %v744_v45 = vld [vmem:[%s1193_s2] ss:$0 sm:$0xff] }
  0x1d   :  { %844 = vmatpush3.bf16.msra.mxu1 %v924_v27  ;;  %823 = vmatprep.subr.bf16.mxu0 %v925_v28  ;;  %v41_v27 = vmul.f32 0.2, %v25_v22  ;;  %v48_v28 = vsel %vm32_vm4, %v24_v20, %v40_v24 }
  0x1e   :  { %845 = vmatprep.subr.bf16.mxu1 %v926_v29  ;;  %v47_v29 = vsel %vm31_vm5, %v23_v19, %v39_v25 }
  0x1f   :  { %v55_v32 = vpack.c.bf16 %v47_v29, %v47_v29  ;;  %v49_v33 = vsel %vm33_vm7, %v25_v22, %v41_v27 }
  0x20   :  { %824 = vmatpush3.bf16.msra.mxu0 %v927_v30  ;;  %v56_v30 = vpack.c.bf16 %v48_v28, %v48_v28  ;;  %v57_v35 = vpack.c.bf16 %v49_v33, %v49_v33 }
  0x21   :  { %846 = vmatpush3.bf16.msra.mxu1 %v928_v31  ;;  %853 = vmatprep.subr.bf16.mxu0 %v929_v38  ;;  %v50_v31 = vsel %vm34_vm6, %v26_v23, %v42_v26 }
  0x22   :  { %875 = vmatprep.subr.bf16.mxu1 %v930_v39  ;;  %v58_v34 = vpack.c.bf16 %v50_v31, %v50_v31 }
  0x23   :  { %611 = vmatmul.mubr.bf16.vlgmr.msra.gmra.mxu0 %v51_v52 }
  0x24   :  { %651 = vmatmul.mubr.bf16.vlgmr.msra.gmra.mxu1 %v53_v53  ;;  %854 = vmatpush3.bf16.msra.mxu0 %v931_v46 }
  0x25   :  { %876 = vmatpush3.bf16.msra.mxu1 %v932_v51  ;;  %855 = vmatprep.subr.bf16.mxu0 %v933_v54 }
  0x26   :  { %877 = vmatprep.subr.bf16.mxu1 %v934_v55  ;;  %690 = vmatprep.mubr.bf16.mxu0 %v56_v30 }
  0x27   :  { %730 = vmatprep.mubr.bf16.mxu1 %v58_v34 }
  0x28   :  { %856 = vmatpush3.bf16.msra.mxu0 %v935_v56 }
  0x29   :  { %878 = vmatpush3.bf16.msra.mxu1 %v936_v57  ;;  %857 = vmatprep.subr.bf16.mxu0 %v937_v58 }
  0x2a   :  { %879 = vmatprep.subr.bf16.mxu1 %v938_v59 }
  0x2c   :  { %858 = vmatpush3.bf16.msra.mxu0 %v939_v60 }
  0x2d   :  { %880 = vmatpush3.bf16.msra.mxu1 %v940_v61  ;;  %859 = vmatprep.subr.bf16.mxu0 %v941_v62 }
  0x2e   :  { %881 = vmatprep.subr.bf16.mxu1 %v942_v63 }
  0x30   :  { %860 = vmatpush3.bf16.msra.mxu0 %v943_v0 }
  0x31   :  { %882 = vmatpush3.bf16.msra.mxu1 %v944_v1  ;;  %861 = vmatprep.subr.bf16.mxu0 %v945_v2 }
  0x32   :  { %883 = vmatprep.subr.bf16.mxu1 %v946_v3 }
  0x34   :  { %862 = vmatpush3.bf16.msra.mxu0 %v947_v4 }
  0x35   :  { %884 = vmatpush3.bf16.msra.mxu1 %v948_v5  ;;  %863 = vmatprep.subr.bf16.mxu0 %v949_v6 }
  0x36   :  { %885 = vmatprep.subr.bf16.mxu1 %v950_v7 }
  0x38   :  { %864 = vmatpush3.bf16.msra.mxu0 %v951_v8 }
  0x39   :  { %886 = vmatpush3.bf16.msra.mxu1 %v952_v9  ;;  %865 = vmatprep.subr.bf16.mxu0 %v953_v10 }
  0x3a   :  { %887 = vmatprep.subr.bf16.mxu1 %v954_v11 }
  0x3c   :  { %866 = vmatpush3.bf16.msra.mxu0 %v955_v12 }
  0x3d   :  { %888 = vmatpush3.bf16.msra.mxu1 %v956_v13  ;;  %867 = vmatprep.subr.bf16.mxu0 %v957_v14 }
  0x3e   :  { %889 = vmatprep.subr.bf16.mxu1 %v958_v15 }
  0x40   :  { %868 = vmatpush3.bf16.msra.mxu0 %v959_v16 }
  0x41   :  { %890 = vmatpush3.bf16.msra.mxu1 %v960_v17 }
  0x43   :  { %691 = vmatmul.mubr.bf16.vlgmr.msra.gmra.mxu0 %v55_v32 }
  0x44   :  { %731 = vmatmul.mubr.bf16.vlgmr.msra.gmra.mxu1 %v57_v35 }
  0xe3   :  { %v825_v36 = vpop.f32.mrf.mxu0 }
  0xe4   :  { %v847_v37 = vpop.f32.mrf.mxu1 }
  0xe5   :  { %v826_v38 = vpop.f32.mrf.mxu0 }
  0xe6   :  { %v848_v39 = vpop.f32.mrf.mxu1  ;;  %v827_v44 = vadd.f32 %v826_v38, %v825_v36 }
  0xe7   :  { %v828_v40 = vpop.f32.mrf.mxu0  ;;  %v849_v47 = vadd.f32 %v848_v39, %v847_v37 }
  0xe8   :  { %v850_v41 = vpop.f32.mrf.mxu1  ;;  %v613_v46 = vadd.f32 %v827_v44, %v744_v45 }
  0xe9   :  { %v829_v42 = vpop.f32.mrf.mxu0 }
  0xea   :  { %v851_v43 = vpop.f32.mrf.mxu1  ;;  %v653_v51 = vadd.f32 %v849_v47, %v613_v46 }
 0x103   :  { %v869_v48 = vpop.f32.mrf.mxu0 }
 0x104   :  { %v891_v49 = vpop.f32.mrf.mxu1 }
 0x105   :  { %v870_v50 = vpop.f32.mrf.mxu0 }
 0x106   :  { %v871_v52 = vadd.f32 %v870_v50, %v869_v48  ;;  %v892_v53 = vpop.f32.mrf.mxu1 }
 0x107   :  { %v872_v54 = vpop.f32.mrf.mxu0  ;;  %v893_v56 = vadd.f32 %v892_v53, %v891_v49 }
 0x108   :  { %v693_v55 = vadd.f32 %v871_v52, %v653_v51  ;;  %v894_v57 = vpop.f32.mrf.mxu1 }
 0x109   :  { %v873_v58 = vpop.f32.mrf.mxu0 }
 0x10a   :  { %v733_v59 = vadd.f32 %v893_v56, %v693_v55  ;;  %v895_v60 = vpop.f32.mrf.mxu1 }
 0x10c   :  { %v738_v61 = vpack.c.bf16 %v733_v59, %v733_v59 }
 0x10e   :  { %739 = vst [vmem:[%s1194_s3] sm:$0xf] %v738_v61 }

// kernel: _lambda_.15
= control target key start
LH: loop header
LB: loop body
LE: loop exit
PB: predicated region body
PF: predicated region fallthrough
CT: control target
= control target key end

     0   :  { %s745_s15 = smov 0   ;;  %s747_s16 = smov 0   ;;  %s811_s0 = inlined_call_operand.vmem [shape: bf16[4,8,256], index: 0, kind: input, shape index: {}]   ;;  %s812_s1 = inlined_call_operand.vmem [shape: bf16[4,256,128], index: 1, kind: input, shape index: {}]   ;;  %s813_s2 = inlined_call_operand.vmem [shape: f32[1,128], index: 2, kind: input, shape index: {}]   ;;  %s814_s3 = inlined_call_operand.vmem [shape: bf16[4,8,128], index: 3, kind: output, shape index: {0}]   ;;  %s815_s4 = inlined_call_operand.vmem [shape: f32[4,1,2,128], index: 4, kind: output, shape index: {1}]  }
   0x1   :  { %s749_s17 = smov 0  }
   0x2 LB: > { %s27_s18 = sadd.s32 1, %s714_s16  ;;  %p606_p0 = scmp.ge.s32.totalorder %s718_s17, 1  ;;  %s718_s17 = sphi %s749_s17, %s15_s17   ;;  %s714_s16 = sphi %s747_s16, %s817_s16   ;;  %s710_s15 = sphi %s745_s15, %s816_s15  }
   0x3   : > { %p29_p1 = scmp.ge.s32.totalorder %s27_s18, 4  ;;  %p197_p2 = scmp.lt.s32.totalorder %s718_s17, 5 }
   0x5   : > { %s819_s18 = smov (%p29_p1, %s27_s18), 0  ;;  %p198_p3 = pnand %p606_p0, %p197_p2 }
   0x6   : > { %p241_p4 = scmp.lt.s32.totalorder (!%p198_p3), %s710_s15, 3 }
   0x7   : > { %201 = sbr.rel (%p198_p3) target bundleno = 262 (0x106), region = 32 }
   0xc   : > { %s821_s15 = smov (!%p241_p4, %s710_s15), 3  ;;  %v613_v24 = vld [vmem:[%s813_s2] ss:$0 sm:$0xff] }
   0xd   : > { %s633_s19 = sshll.u32 %s821_s15, 7  ;;  %s632_s23 = sshll.u32 %s821_s15, 3 }
   0xe   : > { %s769_s22 = scalar_lea.vmem %s812_s1, %s633_s19  ;;  %s249_s26 = scalar_lea.vmem %s811_s0, %s632_s23 }
   0xf   : > { %v680_v0 = vld [vmem:[%s769_s22 + $0x78] sm:$0xff]   ;;  %v682_v2 = vld [vmem:[%s769_s22 + $0x70] sm:$0xff]   ;;  %v684_v4 = vld [vmem:[%s769_s22 + $0x68] sm:$0xff]   ;;  %s611_s29 = sshll.u32 %s821_s15, 2  ;;  %s612_s7 = sshll.u32 %s821_s15, 1 }
  0x10   : > { %v681_v1 = vld [vmem:[%s769_s22 + $0x38] sm:$0xff]   ;;  %634 = vmatprep.subr.bf16.mxu0 %v680_v0  ;;  %v683_v3 = vld [vmem:[%s769_s22 + $0x30] sm:$0xff]   ;;  %v685_v5 = vld [vmem:[%s769_s22 + $0x28] sm:$0xff]   ;;  %s261_s6 = scalar_lea.vmem %s814_s3, %s611_s29  ;;  %s268_s10 = scalar_lea.vmem %s815_s4, %s612_s7 }
  0x11   : > { %635 = vmatpush3.bf16.msra.mxu0 %v681_v1  ;;  %v686_v6 = vld [vmem:[%s769_s22 + $0x60] sm:$0xff]   ;;  %v688_v8 = vld [vmem:[%s769_s22 + $0x58] sm:$0xff]   ;;  %v690_v10 = vld [vmem:[%s769_s22 + $0x50] sm:$0xff]  }
  0x12   : > { %636 = vmatprep.subr.bf16.mxu0 %v682_v2  ;;  %v687_v7 = vld [vmem:[%s769_s22 + $0x20] sm:$0xff]   ;;  %v689_v9 = vld [vmem:[%s769_s22 + $0x18] sm:$0xff]   ;;  %v691_v13 = vld [vmem:[%s769_s22 + $0x10] sm:$0xff]  }
  0x13   : > { %v270_v11 = vld [vmem:[%s249_s26] sm:$0xff]  ;;  %v692_v15 = vld [vmem:[%s769_s22 + $0x48] sm:$0xff]  }
  0x14   : > { %v272_v12 = vunpack.c.h.bf16 %v270_v11  ;;  %v271_v17 = vunpack.c.l.bf16 %v270_v11  ;;  %v693_v18 = vld [vmem:[%s769_s22 + $0x8] sm:$0xff]   ;;  %v694_v19 = vld [vmem:[%s769_s22 + $0x40] sm:$0xff]  }
  0x15   : > { %637 = vmatpush3.bf16.msra.mxu0 %v683_v3  ;;  %v695_v21 = vld [vmem:[%s769_s22] sm:$0xff]  }
  0x16   : > { %638 = vmatprep.subr.bf16.mxu0 %v684_v4  ;;  %v274_v14 = vmax.f32 %v272_v12, 0.0  ;;  %v273_v20 = vmax.f32 %v271_v17, 0.0 }
  0x18   : > { %v276_v16 = vpack.c.bf16 %v274_v14, %v274_v14  ;;  %v275_v22 = vpack.c.bf16 %v273_v20, %v273_v20 }
  0x19   : > { %639 = vmatpush3.bf16.msra.mxu0 %v685_v5 }
  0x1a   : > { %640 = vmatprep.subr.bf16.mxu0 %v686_v6  ;;  %444 = vmatprep.mubr.bf16.mxu0 %v276_v16 }
  0x1d   : > { %641 = vmatpush3.bf16.msra.mxu0 %v687_v7 }
  0x1e   : > { %642 = vmatprep.subr.bf16.mxu0 %v688_v8 }
  0x21   : > { %643 = vmatpush3.bf16.msra.mxu0 %v689_v9 }
  0x22   : > { %644 = vmatprep.subr.bf16.mxu0 %v690_v10 }
  0x25   : > { %645 = vmatpush3.bf16.msra.mxu0 %v691_v13 }
  0x26   : > { %646 = vmatprep.subr.bf16.mxu0 %v692_v15 }
  0x29   : > { %647 = vmatpush3.bf16.msra.mxu0 %v693_v18 }
  0x2a   : > { %648 = vmatprep.subr.bf16.mxu0 %v694_v19 }
  0x2d   : > { %649 = vmatpush3.bf16.msra.mxu0 %v695_v21 }
  0x30   : > { %445 = vmatmul.mubr.bf16.vlgmr.msra.gmra.mxu0 %v275_v22 }
  0xf0   : > { %v650_v23 = vpop.f32.mrf.mxu0 }
  0xf2   : > { %v651_v25 = vpop.f32.mrf.mxu0 }
  0xf3   : > { %v652_v26 = vadd.f32 %v651_v25, %v650_v23 }
  0xf4   : > { %v653_v27 = vpop.f32.mrf.mxu0 }
  0xf5   : > { %v447_v28 = vadd.f32 %v652_v26, %v613_v24 }
  0xf6   : > { %v654_v29 = vpop.f32.mrf.mxu0 }
  0xf7   : > { %v452_v30 = vrot.slane %v447_v28, 4  ;;  %v459_v31 = vmul.f32 %v447_v28, %v447_v28  ;;  %v467_v32 = vpack.c.bf16 %v447_v28, %v447_v28 }
  0xf9   : > { %v453_v33 = vadd.f32 %v452_v30, %v447_v28  ;;  %v460_v34 = vrot.slane %v459_v31, 4  ;;  %468 = vst [vmem:[%s261_s6] sm:$0xf] %v467_v32 }
  0xfb   : > { %v454_v35 = vrot.slane %v453_v33, 2  ;;  %v461_v36 = vadd.f32 %v460_v34, %v459_v31 }
  0xfd   : > { %v455_v37 = vadd.f32 %v454_v35, %v453_v33  ;;  %v462_v38 = vrot.slane %v461_v36, 2 }
  0xff   : > { %v456_v39 = vrot.slane %v455_v37, 1  ;;  %v463_v40 = vadd.f32 %v462_v38, %v461_v36 }
 0x101   : > { %v457_v41 = vadd.f32 %v456_v39, %v455_v37  ;;  %v464_v42 = vrot.slane %v463_v40, 1 }
 0x103   : > { %458 = vst [vmem:[%s268_s10] sm:$0x1] %v457_v41  ;;  %v465_v43 = vadd.f32 %v464_v42, %v463_v40 }
 0x105   : > { %466 = vst [vmem:[%s268_s10 + $0x1] sm:$0x1] %v465_v43 }
 0x106 PF: > { %s15_s17 = sadd.s32 1, %s718_s17   ;;  %s816_s15 = smov %s714_s16 }
 0x107   : > { %p12_p5 = scmp.ge.s32.totalorder %s15_s17, 6   ;;  %s817_s16 = smov %s819_s18 }
 0x109   :  { %14 = sbr.rel (!%p12_p5) target bundleno = 2 (0x2), region = 77 }

// kernel: _lambda_.16
= control target key start
LH: loop header
LB: loop body
LE: loop exit
PB: predicated region body
PF: predicated region fallthrough
CT: control target
= control target key end

     0   :  { %s974_s15 = smov 0   ;;  %s976_s16 = smov 0   ;;  %s1056_s0 = inlined_call_operand.vmem [shape: bf16[4,8,512], index: 0, kind: input, shape index: {}]   ;;  %s1057_s1 = inlined_call_operand.vmem [shape: bf16[4,512,128], index: 1, kind: input, shape index: {}]   ;;  %s1058_s2 = inlined_call_operand.vmem [shape: f32[1,128], index: 2, kind: input, shape index: {}]   ;;  %s1059_s3 = inlined_call_operand.vmem [shape: bf16[4,8,128], index: 3, kind: output, shape index: {0}]   ;;  %s1060_s4 = inlined_call_operand.vmem [shape: f32[4,1,2,128], index: 4, kind: output, shape index: {1}]  }
   0x1   :  { %s978_s17 = smov 0  }
   0x2 LB: > { %s27_s18 = sadd.s32 1, %s943_s16  ;;  %p781_p0 = scmp.ge.s32.totalorder %s947_s17, 1  ;;  %s947_s17 = sphi %s978_s17, %s15_s17   ;;  %s943_s16 = sphi %s976_s16, %s1062_s16   ;;  %s939_s15 = sphi %s974_s15, %s1061_s15  }
   0x3   : > { %p29_p1 = scmp.ge.s32.totalorder %s27_s18, 4  ;;  %p197_p2 = scmp.lt.s32.totalorder %s947_s17, 5 }
   0x5   : > { %s1064_s18 = smov (%p29_p1, %s27_s18), 0  ;;  %p198_p3 = pnand %p781_p0, %p197_p2 }
   0x6   : > { %p241_p4 = scmp.lt.s32.totalorder (!%p198_p3), %s939_s15, 3 }
   0x7   : > { %201 = sbr.rel (%p198_p3) target bundleno = 265 (0x109), region = 32 }
   0xc   : > { %s1066_s15 = smov (!%p241_p4, %s939_s15), 3  ;;  %v788_v48 = vld [vmem:[%s1058_s2] ss:$0 sm:$0xff] }
   0xd   : > { %s824_s19 = sshll.u32 %s1066_s15, 8  ;;  %s823_s23 = sshll.u32 %s1066_s15, 4 }
   0xe   : > { %s998_s22 = scalar_lea.vmem %s1057_s1, %s824_s19  ;;  %s249_s26 = scalar_lea.vmem %s1056_s0, %s823_s23 }
   0xf   : > { %v893_v0 = vld [vmem:[%s998_s22 + $0x78] sm:$0xff]   ;;  %v897_v4 = vld [vmem:[%s998_s22 + $0x70] sm:$0xff]   ;;  %v901_v8 = vld [vmem:[%s998_s22 + $0x68] sm:$0xff]   ;;  %s786_s29 = sshll.u32 %s1066_s15, 2  ;;  %s787_s7 = sshll.u32 %s1066_s15, 1 }
  0x10   : > { %v894_v1 = vld [vmem:[%s998_s22 + $0xf8] sm:$0xff]   ;;  %825 = vmatprep.subr.bf16.mxu0 %v893_v0  ;;  %v898_v5 = vld [vmem:[%s998_s22 + $0xf0] sm:$0xff]   ;;  %v902_v9 = vld [vmem:[%s998_s22 + $0xe8] sm:$0xff]   ;;  %s261_s6 = scalar_lea.vmem %s1059_s3, %s786_s29  ;;  %s268_s10 = scalar_lea.vmem %s1060_s4, %s787_s7 }
  0x11   : > { %v895_v2 = vld [vmem:[%s998_s22 + $0x38] sm:$0xff]   ;;  %847 = vmatprep.subr.bf16.mxu1 %v894_v1  ;;  %v899_v6 = vld [vmem:[%s998_s22 + $0x30] sm:$0xff]   ;;  %v903_v10 = vld [vmem:[%s998_s22 + $0x28] sm:$0xff]  }
  0x12   : > { %v896_v3 = vld [vmem:[%s998_s22 + $0xb8] sm:$0xff]   ;;  %826 = vmatpush3.bf16.msra.mxu0 %v895_v2  ;;  %v900_v7 = vld [vmem:[%s998_s22 + $0xb0] sm:$0xff]   ;;  %v904_v11 = vld [vmem:[%s998_s22 + $0xa8] sm:$0xff]  }
  0x13   : > { %848 = vmatpush3.bf16.msra.mxu1 %v896_v3  ;;  %827 = vmatprep.subr.bf16.mxu0 %v897_v4  ;;  %v905_v12 = vld [vmem:[%s998_s22 + $0x60] sm:$0xff]   ;;  %v909_v16 = vld [vmem:[%s998_s22 + $0x58] sm:$0xff]   ;;  %v913_v20 = vld [vmem:[%s998_s22 + $0x50] sm:$0xff]  }
  0x14   : > { %849 = vmatprep.subr.bf16.mxu1 %v898_v5  ;;  %v906_v13 = vld [vmem:[%s998_s22 + $0xe0] sm:$0xff]   ;;  %v910_v17 = vld [vmem:[%s998_s22 + $0xd8] sm:$0xff]   ;;  %v914_v21 = vld [vmem:[%s998_s22 + $0xd0] sm:$0xff]  }
  0x15   : > { %v907_v14 = vld [vmem:[%s998_s22 + $0x20] sm:$0xff]   ;;  %v911_v18 = vld [vmem:[%s998_s22 + $0x18] sm:$0xff]   ;;  %v915_v22 = vld [vmem:[%s998_s22 + $0x10] sm:$0xff]  }
  0x16   : > { %828 = vmatpush3.bf16.msra.mxu0 %v899_v6  ;;  %v908_v15 = vld [vmem:[%s998_s22 + $0xa0] sm:$0xff]   ;;  %v912_v19 = vld [vmem:[%s998_s22 + $0x98] sm:$0xff]   ;;  %v916_v23 = vld [vmem:[%s998_s22 + $0x90] sm:$0xff]  }
  0x17   : > { %850 = vmatpush3.bf16.msra.mxu1 %v900_v7  ;;  %829 = vmatprep.subr.bf16.mxu0 %v901_v8  ;;  %v917_v24 = vld [vmem:[%s998_s22 + $0x48] sm:$0xff]   ;;  %v921_v28 = vld [vmem:[%s998_s22 + $0x40] sm:$0xff]  }
  0x18   : > { %851 = vmatprep.subr.bf16.mxu1 %v902_v9  ;;  %v918_v25 = vld [vmem:[%s998_s22 + $0xc8] sm:$0xff]   ;;  %v922_v29 = vld [vmem:[%s998_s22 + $0xc0] sm:$0xff]  }
  0x19   : > { %v919_v26 = vld [vmem:[%s998_s22 + $0x8] sm:$0xff]   ;;  %v923_v30 = vld [vmem:[%s998_s22] sm:$0xff]  }
  0x1a   : > { %830 = vmatpush3.bf16.msra.mxu0 %v903_v10  ;;  %v920_v27 = vld [vmem:[%s998_s22 + $0x88] sm:$0xff]   ;;  %v924_v31 = vld [vmem:[%s998_s22 + $0x80] sm:$0xff]  }
  0x1b   : > { %852 = vmatpush3.bf16.msra.mxu1 %v904_v11  ;;  %831 = vmatprep.subr.bf16.mxu0 %v905_v12  ;;  %v270_v32 = vld [vmem:[%s249_s26] sm:$0xff]  ;;  %v271_v33 = vld [vmem:[%s249_s26 + $0x8] sm:$0xff] }
  0x1c   : > { %853 = vmatprep.subr.bf16.mxu1 %v906_v13  ;;  %v272_v34 = vunpack.c.l.bf16 %v270_v32  ;;  %v273_v35 = vunpack.c.h.bf16 %v270_v32  ;;  %v274_v36 = vunpack.c.l.bf16 %v271_v33  ;;  %v275_v37 = vunpack.c.h.bf16 %v271_v33 }
  0x1e   : > { %832 = vmatpush3.bf16.msra.mxu0 %v907_v14  ;;  %v276_v38 = vmax.f32 %v272_v34, 0.0  ;;  %v277_v39 = vmax.f32 %v273_v35, 0.0  ;;  %v278_v40 = vmax.f32 %v274_v36, 0.0  ;;  %v279_v41 = vmax.f32 %v275_v37, 0.0 }
  0x1f   : > { %854 = vmatpush3.bf16.msra.mxu1 %v908_v15  ;;  %833 = vmatprep.subr.bf16.mxu0 %v909_v16 }
  0x20   : > { %855 = vmatprep.subr.bf16.mxu1 %v910_v17  ;;  %v281_v42 = vpack.c.bf16 %v277_v39, %v277_v39  ;;  %v283_v43 = vpack.c.bf16 %v279_v41, %v279_v41  ;;  %v280_v44 = vpack.c.bf16 %v276_v38, %v276_v38  ;;  %v282_v45 = vpack.c.bf16 %v278_v40, %v278_v40 }
  0x22   : > { %834 = vmatpush3.bf16.msra.mxu0 %v911_v18  ;;  %579 = vmatprep.mubr.bf16.mxu0 %v281_v42 }
  0x23   : > { %856 = vmatpush3.bf16.msra.mxu1 %v912_v19  ;;  %835 = vmatprep.subr.bf16.mxu0 %v913_v20 }
  0x24   : > { %857 = vmatprep.subr.bf16.mxu1 %v914_v21  ;;  %619 = vmatprep.mubr.bf16.mxu1 %v283_v43 }
  0x26   : > { %836 = vmatpush3.bf16.msra.mxu0 %v915_v22 }
  0x27   : > { %858 = vmatpush3.bf16.msra.mxu1 %v916_v23  ;;  %837 = vmatprep.subr.bf16.mxu0 %v917_v24 }
  0x28   : > { %859 = vmatprep.subr.bf16.mxu1 %v918_v25 }
  0x2a   : > { %838 = vmatpush3.bf16.msra.mxu0 %v919_v26 }
  0x2b   : > { %860 = vmatpush3.bf16.msra.mxu1 %v920_v27  ;;  %839 = vmatprep.subr.bf16.mxu0 %v921_v28 }
  0x2c   : > { %861 = vmatprep.subr.bf16.mxu1 %v922_v29 }
  0x2e   : > { %840 = vmatpush3.bf16.msra.mxu0 %v923_v30 }
  0x2f   : > { %862 = vmatpush3.bf16.msra.mxu1 %v924_v31 }
  0x31   : > { %580 = vmatmul.mubr.bf16.vlgmr.msra.gmra.mxu0 %v280_v44 }
  0x32   : > { %620 = vmatmul.mubr.bf16.vlgmr.msra.gmra.mxu1 %v282_v45 }
  0xf1   : > { %v841_v46 = vpop.f32.mrf.mxu0 }
  0xf2   : > { %v863_v47 = vpop.f32.mrf.mxu1 }
  0xf3   : > { %v842_v49 = vpop.f32.mrf.mxu0 }
  0xf4   : > { %v864_v50 = vpop.f32.mrf.mxu1  ;;  %v843_v51 = vadd.f32 %v842_v49, %v841_v46 }
  0xf5   : > { %v844_v52 = vpop.f32.mrf.mxu0  ;;  %v865_v55 = vadd.f32 %v864_v50, %v863_v47 }
  0xf6   : > { %v866_v53 = vpop.f32.mrf.mxu1  ;;  %v582_v54 = vadd.f32 %v843_v51, %v788_v48 }
  0xf7   : > { %v845_v56 = vpop.f32.mrf.mxu0 }
  0xf8   : > { %v867_v57 = vpop.f32.mrf.mxu1  ;;  %v622_v58 = vadd.f32 %v865_v55, %v582_v54 }
  0xfa   : > { %v627_v59 = vrot.slane %v622_v58, 4  ;;  %v634_v60 = vmul.f32 %v622_v58, %v622_v58  ;;  %v642_v61 = vpack.c.bf16 %v622_v58, %v622_v58 }
  0xfc   : > { %v628_v62 = vadd.f32 %v627_v59, %v622_v58  ;;  %v635_v63 = vrot.slane %v634_v60, 4  ;;  %643 = vst [vmem:[%s261_s6] sm:$0xf] %v642_v61 }
  0xfe   : > { %v629_v0 = vrot.slane %v628_v62, 2  ;;  %v636_v1 = vadd.f32 %v635_v63, %v634_v60 }
 0x100   : > { %v630_v2 = vadd.f32 %v629_v0, %v628_v62  ;;  %v637_v3 = vrot.slane %v636_v1, 2 }
 0x102   : > { %v631_v4 = vrot.slane %v630_v2, 1  ;;  %v638_v5 = vadd.f32 %v637_v3, %v636_v1 }
 0x104   : > { %v632_v6 = vadd.f32 %v631_v4, %v630_v2  ;;  %v639_v7 = vrot.slane %v638_v5, 1 }
 0x106   : > { %633 = vst [vmem:[%s268_s10] sm:$0x1] %v632_v6  ;;  %v640_v8 = vadd.f32 %v639_v7, %v638_v5 }
 0x108   : > { %641 = vst [vmem:[%s268_s10 + $0x1] sm:$0x1] %v640_v8 }
 0x109 PF: > { %s15_s17 = sadd.s32 1, %s947_s17   ;;  %s1061_s15 = smov %s943_s16 }
 0x10a   : > { %p12_p5 = scmp.ge.s32.totalorder %s15_s17, 6   ;;  %s1062_s16 = smov %s1064_s18 }
 0x10c   :  { %14 = sbr.rel (!%p12_p5) target bundleno = 2 (0x2), region = 77 }

// kernel: _lambda_.17
= control target key start
LH: loop header
LB: loop body
LE: loop exit
PB: predicated region body
PF: predicated region fallthrough
CT: control target
= control target key end

     0   :  { %s861_s15 = smov 0   ;;  %s863_s16 = smov 0   ;;  %s927_s0 = inlined_call_operand.vmem [shape: bf16[4,32,256], index: 0, kind: input, shape index: {}]   ;;  %s928_s1 = inlined_call_operand.vmem [shape: bf16[4,256,128], index: 1, kind: input, shape index: {}]   ;;  %s929_s2 = inlined_call_operand.vmem [shape: f32[1,128], index: 2, kind: input, shape index: {}]   ;;  %s930_s3 = inlined_call_operand.vmem [shape: bf16[4,32,128], index: 3, kind: output, shape index: {0}]   ;;  %s931_s4 = inlined_call_operand.vmem [shape: f32[4,1,2,128], index: 4, kind: output, shape index: {1}]  }
   0x1   :  { %s865_s17 = smov 0  }
   0x2 LB: > { %s27_s18 = sadd.s32 1, %s830_s16  ;;  %p679_p0 = scmp.ge.s32.totalorder %s834_s17, 1  ;;  %s834_s17 = sphi %s865_s17, %s15_s17   ;;  %s830_s16 = sphi %s863_s16, %s933_s16   ;;  %s826_s15 = sphi %s861_s15, %s932_s15  }
   0x3   : > { %p29_p1 = scmp.ge.s32.totalorder %s27_s18, 4  ;;  %p199_p2 = scmp.lt.s32.totalorder %s834_s17, 5 }
   0x5   : > { %s935_s18 = smov (%p29_p1, %s27_s18), 0  ;;  %p200_p3 = pnand %p679_p0, %p199_p2 }
   0x6   : > { %p247_p4 = scmp.lt.s32.totalorder (!%p200_p3), %s826_s15, 3 }
   0x7   : > { %203 = sbr.rel (%p200_p3) target bundleno = 272 (0x110), region = 32 }
   0xc   : > { %s937_s15 = smov (!%p247_p4, %s826_s15), 3  ;;  %v687_v45 = vld [vmem:[%s929_s2] ss:$0 sm:$0xff] }
   0xd   : > { %s711_s19 = sshll.u32 %s937_s15, 7  ;;  %s710_s23 = sshll.u32 %s937_s15, 5 }
   0xe   : > { %s885_s22 = scalar_lea.vmem %s928_s1, %s711_s19  ;;  %s255_s26 = scalar_lea.vmem %s927_s0, %s710_s23 }
   0xf   : > { %v796_v0 = vld [vmem:[%s885_s22 + $0x78] sm:$0xff]   ;;  %v798_v2 = vld [vmem:[%s885_s22 + $0x70] sm:$0xff]   ;;  %v800_v4 = vld [vmem:[%s885_s22 + $0x68] sm:$0xff]   ;;  %s712_s29 = sshll.u32 %s937_s15, 4  ;;  %s686_s7 = sshll.u32 %s937_s15, 1 }
  0x10   : > { %v797_v1 = vld [vmem:[%s885_s22 + $0x38] sm:$0xff]   ;;  %728 = vmatprep.subr.bf16.mxu0 %v796_v0  ;;  %756 = vmatprep.subr.bf16.mxu1 %v796_v0  ;;  %v799_v3 = vld [vmem:[%s885_s22 + $0x30] sm:$0xff]   ;;  %v801_v5 = vld [vmem:[%s885_s22 + $0x28] sm:$0xff]   ;;  %s270_s6 = scalar_lea.vmem %s930_s3, %s712_s29  ;;  %s278_s10 = scalar_lea.vmem %s931_s4, %s686_s7 }
  0x11   : > { %729 = vmatpush3.bf16.msra.mxu0 %v797_v1  ;;  %764 = vmatpush3.bf16.msra.mxu1 %v797_v1  ;;  %v802_v6 = vld [vmem:[%s885_s22 + $0x60] sm:$0xff]   ;;  %v804_v8 = vld [vmem:[%s885_s22 + $0x58] sm:$0xff]   ;;  %v806_v10 = vld [vmem:[%s885_s22 + $0x50] sm:$0xff]  }
  0x12   : > { %730 = vmatprep.subr.bf16.mxu0 %v798_v2  ;;  %757 = vmatprep.subr.bf16.mxu1 %v798_v2  ;;  %v803_v7 = vld [vmem:[%s885_s22 + $0x20] sm:$0xff]   ;;  %v805_v9 = vld [vmem:[%s885_s22 + $0x18] sm:$0xff]   ;;  %v281_v12 = vld [vmem:[%s255_s26 + $0x8] sm:$0xff] }
  0x13   : > { %v280_v11 = vld [vmem:[%s255_s26] sm:$0xff]  ;;  %v282_v13 = vld [vmem:[%s255_s26 + $0x10] sm:$0xff]  ;;  %v287_v15 = vunpack.c.h.bf16 %v281_v12  ;;  %v283_v16 = vld [vmem:[%s255_s26 + $0x18] sm:$0xff]  ;;  %v286_v27 = vunpack.c.l.bf16 %v281_v12 }
  0x14   : > { %v285_v14 = vunpack.c.h.bf16 %v280_v11  ;;  %v289_v17 = vunpack.c.h.bf16 %v282_v13  ;;  %v291_v18 = vunpack.c.h.bf16 %v283_v16  ;;  %v807_v19 = vld [vmem:[%s885_s22 + $0x10] sm:$0xff]   ;;  %v808_v22 = vld [vmem:[%s885_s22 + $0x48] sm:$0xff]   ;;  %v284_v25 = vunpack.c.l.bf16 %v280_v11  ;;  %v810_v32 = vld [vmem:[%s885_s22 + $0x40] sm:$0xff]  }
  0x15   : > { %731 = vmatpush3.bf16.msra.mxu0 %v799_v3  ;;  %765 = vmatpush3.bf16.msra.mxu1 %v799_v3  ;;  %v295_v21 = vmax.f32 %v287_v15, 0.0  ;;  %v288_v28 = vunpack.c.l.bf16 %v282_v13  ;;  %v290_v29 = vunpack.c.l.bf16 %v283_v16  ;;  %v809_v31 = vld [vmem:[%s885_s22 + $0x8] sm:$0xff]   ;;  %v294_v34 = vmax.f32 %v286_v27, 0.0  ;;  %v811_v37 = vld [vmem:[%s885_s22] sm:$0xff]  }
  0x16   : > { %732 = vmatprep.subr.bf16.mxu0 %v800_v4  ;;  %758 = vmatprep.subr.bf16.mxu1 %v800_v4  ;;  %v293_v20 = vmax.f32 %v285_v14, 0.0  ;;  %v297_v23 = vmax.f32 %v289_v17, 0.0  ;;  %v299_v24 = vmax.f32 %v291_v18, 0.0  ;;  %v292_v33 = vmax.f32 %v284_v25, 0.0 }
  0x17   : > { %v296_v35 = vmax.f32 %v288_v28, 0.0  ;;  %v298_v36 = vmax.f32 %v290_v29, 0.0 }
  0x18   : > { %v301_v26 = vpack.c.bf16 %v295_v21, %v293_v20  ;;  %v303_v30 = vpack.c.bf16 %v299_v24, %v297_v23  ;;  %v300_v38 = vpack.c.bf16 %v294_v34, %v292_v33 }
  0x19   : > { %733 = vmatpush3.bf16.msra.mxu0 %v801_v5  ;;  %766 = vmatpush3.bf16.msra.mxu1 %v801_v5  ;;  %v302_v39 = vpack.c.bf16 %v298_v36, %v296_v35 }
  0x1a   : > { %734 = vmatprep.subr.bf16.mxu0 %v802_v6  ;;  %759 = vmatprep.subr.bf16.mxu1 %v802_v6 }
  0x1b   : > { %471 = vmatprep.mubr.bf16.mxu0 %v301_v26  ;;  %479 = vmatprep.mubr.bf16.mxu1 %v303_v30 }
  0x1d   : > { %735 = vmatpush3.bf16.msra.mxu0 %v803_v7  ;;  %767 = vmatpush3.bf16.msra.mxu1 %v803_v7 }
  0x1e   : > { %736 = vmatprep.subr.bf16.mxu0 %v804_v8  ;;  %760 = vmatprep.subr.bf16.mxu1 %v804_v8 }
  0x21   : > { %737 = vmatpush3.bf16.msra.mxu0 %v805_v9  ;;  %768 = vmatpush3.bf16.msra.mxu1 %v805_v9 }
  0x22   : > { %738 = vmatprep.subr.bf16.mxu0 %v806_v10  ;;  %761 = vmatprep.subr.bf16.mxu1 %v806_v10 }
  0x25   : > { %739 = vmatpush3.bf16.msra.mxu0 %v807_v19  ;;  %769 = vmatpush3.bf16.msra.mxu1 %v807_v19 }
  0x26   : > { %740 = vmatprep.subr.bf16.mxu0 %v808_v22  ;;  %762 = vmatprep.subr.bf16.mxu1 %v808_v22 }
  0x29   : > { %741 = vmatpush3.bf16.msra.mxu0 %v809_v31  ;;  %770 = vmatpush3.bf16.msra.mxu1 %v809_v31 }
  0x2a   : > { %742 = vmatprep.subr.bf16.mxu0 %v810_v32  ;;  %763 = vmatprep.subr.bf16.mxu1 %v810_v32 }
  0x2d   : > { %743 = vmatpush3.bf16.msra.mxu0 %v811_v37  ;;  %771 = vmatpush3.bf16.msra.mxu1 %v811_v37 }
  0x30   : > { %472 = vmatmul.mubr.bf16.vlgmr.msra.gmra.mxu0 %v300_v38  ;;  %480 = vmatmul.mubr.bf16.vlgmr.msra.gmra.mxu1 %v302_v39 }
  0xf0   : > { %v744_v40 = vpop.f32.mrf.mxu0  ;;  %v750_v41 = vpop.f32.mrf.mxu1 }
  0xf2   : > { %v745_v42 = vpop.f32.mrf.mxu0  ;;  %v751_v43 = vpop.f32.mrf.mxu1 }
  0xf3   : > { %v746_v44 = vadd.f32 %v745_v42, %v744_v40  ;;  %v752_v48 = vadd.f32 %v751_v43, %v750_v41 }
  0xf4   : > { %v747_v46 = vpop.f32.mrf.mxu0  ;;  %v753_v47 = vpop.f32.mrf.mxu1 }
  0xf5   : > { %v474_v51 = vadd.f32 %v746_v44, %v687_v45  ;;  %v482_v54 = vadd.f32 %v752_v48, %v687_v45 }
  0xf6   : > { %v748_v49 = vpop.f32.mrf.mxu0  ;;  %v754_v50 = vpop.f32.mrf.mxu1 }
  0xf7   : > { %v749_v52 = vadd.f32 %v748_v49, %v747_v46  ;;  %v755_v53 = vadd.f32 %v754_v50, %v753_v47  ;;  %v498_v57 = vmul.f32 %v474_v51, %v474_v51  ;;  %v500_v62 = vmul.f32 %v482_v54, %v482_v54 }
  0xf9   : > { %v477_v55 = vadd.f32 %v749_v52, %v687_v45  ;;  %v485_v56 = vadd.f32 %v755_v53, %v687_v45 }
  0xfb   : > { %v488_v58 = vadd.f32 %v477_v55, %v474_v51  ;;  %v499_v59 = vmul.f32 %v477_v55, %v477_v55  ;;  %v720_v60 = vpack.c.bf16 %v477_v55, %v474_v51  ;;  %v725_v61 = vpack.c.bf16 %v485_v56, %v482_v54 }
  0xfc   : > { %v501_v2 = vmul.f32 %v485_v56, %v485_v56 }
  0xfd   : > { %v502_v63 = vadd.f32 %v499_v59, %v498_v57  ;;  %721 = vst [vmem:[%s270_s6] sm:$0xff] %v720_v60   ;;  %v489_v0 = vadd.f32 %v488_v58, %v482_v54  ;;  %727 = vst [vmem:[%s270_s6 + $0x8] sm:$0xff] %v725_v61  }
  0xff   : > { %v490_v1 = vadd.f32 %v489_v0, %v485_v56  ;;  %v503_v3 = vadd.f32 %v502_v63, %v500_v62 }
 0x101   : > { %v491_v4 = vrot.slane %v490_v1, 4  ;;  %v504_v5 = vadd.f32 %v503_v3, %v501_v2 }
 0x103   : > { %v492_v6 = vadd.f32 %v491_v4, %v490_v1  ;;  %v505_v7 = vrot.slane %v504_v5, 4 }
 0x105   : > { %v493_v8 = vrot.slane %v492_v6, 2  ;;  %v506_v9 = vadd.f32 %v505_v7, %v504_v5 }
 0x107   : > { %v494_v10 = vadd.f32 %v493_v8, %v492_v6  ;;  %v507_v11 = vrot.slane %v506_v9, 2 }
 0x109   : > { %v495_v12 = vrot.slane %v494_v10, 1  ;;  %v508_v13 = vadd.f32 %v507_v11, %v506_v9 }
 0x10b   : > { %v496_v14 = vadd.f32 %v495_v12, %v494_v10  ;;  %v509_v15 = vrot.slane %v508_v13, 1 }
 0x10d   : > { %497 = vst [vmem:[%s278_s10] sm:$0x1] %v496_v14  ;;  %v510_v16 = vadd.f32 %v509_v15, %v508_v13 }
 0x10f   : > { %511 = vst [vmem:[%s278_s10 + $0x1] sm:$0x1] %v510_v16 }
 0x110 PF: > { %s15_s17 = sadd.s32 1, %s834_s17   ;;  %s932_s15 = smov %s830_s16 }
 0x111   : > { %p12_p5 = scmp.ge.s32.totalorder %s15_s17, 6   ;;  %s933_s16 = smov %s935_s18 }
 0x113   :  { %14 = sbr.rel (!%p12_p5) target bundleno = 2 (0x2), region = 77 }

// kernel: _lambda_.18
= control target key start
LH: loop header
LB: loop body
LE: loop exit
PB: predicated region body
PF: predicated region fallthrough
CT: control target
= control target key end

     0   :  { %s1070_s15 = smov 0   ;;  %s1072_s16 = smov 0   ;;  %s1163_s0 = inlined_call_operand.vmem [shape: bf16[4,128,128], index: 0, kind: input, shape index: {}]   ;;  %s1164_s1 = inlined_call_operand.vmem [shape: bf16[4,128,128], index: 1, kind: input, shape index: {}]   ;;  %s1165_s2 = inlined_call_operand.vmem [shape: f32[1,128], index: 2, kind: input, shape index: {}]   ;;  %s1166_s3 = inlined_call_operand.vmem [shape: bf16[4,128,128], index: 3, kind: output, shape index: {0}]   ;;  %s1167_s4 = inlined_call_operand.vmem [shape: f32[4,1,2,128], index: 4, kind: output, shape index: {1}]  }
   0x1   :  { %s1074_s17 = smov 0  }
   0x2 LB: > { %s27_s18 = sadd.s32 1, %s1039_s16  ;;  %p785_p0 = scmp.ge.s32.totalorder %s1043_s17, 1  ;;  %s1043_s17 = sphi %s1074_s17, %s15_s17   ;;  %s1039_s16 = sphi %s1072_s16, %s1169_s16   ;;  %s1035_s15 = sphi %s1070_s15, %s1168_s15  }
   0x3   : > { %p29_p1 = scmp.ge.s32.totalorder %s27_s18, 4  ;;  %p198_p2 = scmp.lt.s32.totalorder %s1043_s17, 5 }
   0x5   : > { %s1171_s18 = smov (%p29_p1, %s27_s18), 0  ;;  %p199_p3 = pnand %p785_p0, %p198_p2 }
   0x6   : > { %p245_p4 = scmp.lt.s32.totalorder (!%p199_p3), %s1035_s15, 3 }
   0x7   : > { %202 = sbr.rel (%p199_p3) target bundleno = 294 (0x126), region = 32 }
   0xc   : > { %s1173_s15 = smov (!%p245_p4, %s1035_s15), 3  ;;  %v793_v58 = vld [vmem:[%s1165_s2] ss:$0 sm:$0xff] }
   0xd   : > { %s1091_s19 = sshll.u32 %s1173_s15, 6  ;;  %s792_s5 = sshll.u32 %s1173_s15, 1 }
   0xe   : > { %s1097_s22 = scalar_lea.vmem %s1164_s1, %s1091_s19  ;;  %s1106_s25 = scalar_lea.vmem %s1163_s0, %s1091_s19 }
   0xf   : > { %v1013_v0 = vld [vmem:[%s1097_s22 + $0x38] sm:$0xff]   ;;  %v1014_v1 = vld [vmem:[%s1097_s22 + $0x30] sm:$0xff]   ;;  %v1015_v2 = vld [vmem:[%s1097_s22 + $0x28] sm:$0xff]   ;;  %s1132_s30 = scalar_lea.vmem %s1166_s3, %s1091_s19  ;;  %s275_s8 = scalar_lea.vmem %s1167_s4, %s792_s5 }
  0x10   : > { %941 = vmatprep.subr.bf16.mxu0 %v1013_v0  ;;  %973 = vmatprep.subr.bf16.mxu1 %v1013_v0  ;;  %v1016_v3 = vld [vmem:[%s1097_s22 + $0x20] sm:$0xff]   ;;  %v1017_v10 = vld [vmem:[%s1097_s22 + $0x18] sm:$0xff]   ;;  %v1018_v16 = vld [vmem:[%s1097_s22 + $0x10] sm:$0xff]  }
  0x11   : > { %942 = vmatpush3.bf16.msra.mxu0 %v1013_v0  ;;  %981 = vmatpush3.bf16.msra.mxu1 %v1013_v0  ;;  %v840_v4 = vld [vmem:[%s1106_s25] sm:$0xff]   ;;  %v911_v18 = vld [vmem:[%s1106_s25 + $0x8] sm:$0xff]   ;;  %v912_v21 = vld [vmem:[%s1106_s25 + $0x10] sm:$0xff]  }
  0x12   : > { %943 = vmatprep.subr.bf16.mxu0 %v1014_v1  ;;  %974 = vmatprep.subr.bf16.mxu1 %v1014_v1  ;;  %v841_v5 = vunpack.c.l.bf16 %v840_v4  ;;  %v842_v6 = vunpack.c.h.bf16 %v840_v4  ;;  %v914_v7 = vld [vmem:[%s1106_s25 + $0x20] sm:$0xff]   ;;  %v915_v19 = vld [vmem:[%s1106_s25 + $0x28] sm:$0xff]   ;;  %v916_v22 = vld [vmem:[%s1106_s25 + $0x30] sm:$0xff]   ;;  %v845_v23 = vunpack.c.l.bf16 %v911_v18  ;;  %v846_v24 = vunpack.c.h.bf16 %v911_v18 }
  0x13   : > { %v857_v12 = vunpack.c.l.bf16 %v914_v7  ;;  %v858_v13 = vunpack.c.h.bf16 %v914_v7  ;;  %v1019_v20 = vld [vmem:[%s1097_s22 + $0x8] sm:$0xff]   ;;  %v861_v25 = vunpack.c.l.bf16 %v915_v19  ;;  %v862_v26 = vunpack.c.h.bf16 %v915_v19  ;;  %v1020_v31 = vld [vmem:[%s1097_s22] sm:$0xff]   ;;  %v913_v34 = vld [vmem:[%s1106_s25 + $0x18] sm:$0xff]  }
  0x14   : > { %v309_v8 = vmax.f32 %v841_v5, 0.0  ;;  %v310_v9 = vmax.f32 %v842_v6, 0.0  ;;  %v849_v27 = vunpack.c.l.bf16 %v912_v21  ;;  %v850_v28 = vunpack.c.h.bf16 %v912_v21  ;;  %v917_v41 = vld [vmem:[%s1106_s25 + $0x38] sm:$0xff]  }
  0x15   : > { %944 = vmatpush3.bf16.msra.mxu0 %v1014_v1  ;;  %982 = vmatpush3.bf16.msra.mxu1 %v1014_v1  ;;  %v317_v14 = vmax.f32 %v857_v12, 0.0  ;;  %v318_v15 = vmax.f32 %v858_v13, 0.0  ;;  %v865_v29 = vunpack.c.l.bf16 %v916_v22  ;;  %v866_v30 = vunpack.c.h.bf16 %v916_v22 }
  0x16   : > { %945 = vmatprep.subr.bf16.mxu0 %v1015_v2  ;;  %975 = vmatprep.subr.bf16.mxu1 %v1015_v2  ;;  %v325_v11 = vpack.c.bf16 %v310_v9, %v309_v8  ;;  %v311_v32 = vmax.f32 %v845_v23, 0.0  ;;  %v312_v33 = vmax.f32 %v846_v24, 0.0  ;;  %v319_v35 = vmax.f32 %v861_v25, 0.0 }
  0x17   : > { %v329_v17 = vpack.c.bf16 %v318_v15, %v317_v14  ;;  %v320_v36 = vmax.f32 %v862_v26, 0.0  ;;  %v313_v37 = vmax.f32 %v849_v27, 0.0  ;;  %v314_v38 = vmax.f32 %v850_v28, 0.0 }
  0x18   : > { %957 = vmatprep.mubr.bf16.mxu0 %v325_v11  ;;  %v321_v39 = vmax.f32 %v865_v29, 0.0  ;;  %v322_v40 = vmax.f32 %v866_v30, 0.0  ;;  %v853_v42 = vunpack.c.l.bf16 %v913_v34  ;;  %v854_v43 = vunpack.c.h.bf16 %v913_v34 }
  0x19   : > { %946 = vmatpush3.bf16.msra.mxu0 %v1015_v2  ;;  %983 = vmatpush3.bf16.msra.mxu1 %v1015_v2  ;;  %v326_v44 = vpack.c.bf16 %v312_v33, %v311_v32  ;;  %v330_v45 = vpack.c.bf16 %v320_v36, %v319_v35  ;;  %v869_v46 = vunpack.c.l.bf16 %v917_v41  ;;  %v870_v47 = vunpack.c.h.bf16 %v917_v41 }
  0x1a   : > { %947 = vmatprep.subr.bf16.mxu0 %v1016_v3  ;;  %976 = vmatprep.subr.bf16.mxu1 %v1016_v3  ;;  %v327_v48 = vpack.c.bf16 %v314_v38, %v313_v37  ;;  %v331_v49 = vpack.c.bf16 %v322_v40, %v321_v39  ;;  %v315_v50 = vmax.f32 %v853_v42, 0.0  ;;  %v316_v51 = vmax.f32 %v854_v43, 0.0 }
  0x1b   : > { %965 = vmatprep.mubr.bf16.mxu1 %v329_v17  ;;  %v323_v52 = vmax.f32 %v869_v46, 0.0  ;;  %v324_v53 = vmax.f32 %v870_v47, 0.0 }
  0x1c   : > { %v328_v54 = vpack.c.bf16 %v316_v51, %v315_v50 }
  0x1d   : > { %948 = vmatpush3.bf16.msra.mxu0 %v1016_v3  ;;  %984 = vmatpush3.bf16.msra.mxu1 %v1016_v3  ;;  %v332_v55 = vpack.c.bf16 %v324_v53, %v323_v52 }
  0x1e   : > { %949 = vmatprep.subr.bf16.mxu0 %v1017_v10  ;;  %977 = vmatprep.subr.bf16.mxu1 %v1017_v10 }
  0x21   : > { %950 = vmatpush3.bf16.msra.mxu0 %v1017_v10  ;;  %985 = vmatpush3.bf16.msra.mxu1 %v1017_v10 }
  0x22   : > { %951 = vmatprep.subr.bf16.mxu0 %v1018_v16  ;;  %978 = vmatprep.subr.bf16.mxu1 %v1018_v16 }
  0x25   : > { %952 = vmatpush3.bf16.msra.mxu0 %v1018_v16  ;;  %986 = vmatpush3.bf16.msra.mxu1 %v1018_v16 }
  0x26   : > { %953 = vmatprep.subr.bf16.mxu0 %v1019_v20  ;;  %979 = vmatprep.subr.bf16.mxu1 %v1019_v20 }
  0x29   : > { %954 = vmatpush3.bf16.msra.mxu0 %v1019_v20  ;;  %987 = vmatpush3.bf16.msra.mxu1 %v1019_v20 }
  0x2a   : > { %955 = vmatprep.subr.bf16.mxu0 %v1020_v31  ;;  %980 = vmatprep.subr.bf16.mxu1 %v1020_v31 }
  0x2d   : > { %956 = vmatpush3.bf16.msra.mxu0 %v1020_v31  ;;  %988 = vmatpush3.bf16.msra.mxu1 %v1020_v31 }
  0x30   : > { %958 = vmatmul.mubr.bf16.vlgmr.msra.gmra.mxu0 %v326_v44  ;;  %966 = vmatmul.mubr.bf16.vlgmr.msra.gmra.mxu1 %v330_v45 }
  0x31   : > { %961 = vmatprep.mubr.bf16.mxu0 %v327_v48  ;;  %969 = vmatprep.mubr.bf16.mxu1 %v331_v49 }
  0x38   : > { %962 = vmatmul.mubr.bf16.gmra.mxu0 %v328_v54  ;;  %970 = vmatmul.mubr.bf16.gmra.mxu1 %v332_v55 }
  0xf0   : > { %v959_v56 = vpop.f32.mrf.mxu0  ;;  %v967_v57 = vpop.f32.mrf.mxu1 }
  0xf1   : > { %v1124_v62 = vadd.f32 %v967_v57, %v793_v58  ;;  %v447_v0 = vadd.f32 %v959_v56, %v793_v58 }
  0xf2   : > { %v438_v59 = vpop.f32.mrf.mxu0  ;;  %v470_v60 = vpop.f32.mrf.mxu1 }
  0xf3   : > { %v439_v1 = vadd.f32 %v793_v58, %v438_v59  ;;  %v471_v5 = vadd.f32 %v793_v58, %v470_v60  ;;  %v525_v20 = vmul.f32 %v447_v0, %v447_v0  ;;  %v533_v60 = vmul.f32 %v1124_v62, %v1124_v62 }
  0xf4   : > { %v960_v61 = vpop.f32.mrf.mxu0  ;;  %v968_v63 = vpop.f32.mrf.mxu1 }
  0xf5   : > { %v450_v2 = vadd.f32 %v960_v61, %v793_v58  ;;  %v1126_v3 = vadd.f32 %v968_v63, %v793_v58  ;;  %v523_v13 = vmul.f32 %v439_v1, %v439_v1  ;;  %v531_v54 = vmul.f32 %v471_v5, %v471_v5 }
  0xf6   : > { %v441_v4 = vpop.f32.mrf.mxu0  ;;  %v473_v6 = vpop.f32.mrf.mxu1 }
  0xf7   : > { %v879_v7 = vpack.c.bf16 %v450_v2, %v447_v0  ;;  %v442_v8 = vadd.f32 %v793_v58, %v441_v4  ;;  %v899_v10 = vpack.c.bf16 %v1126_v3, %v1124_v62  ;;  %v474_v11 = vadd.f32 %v793_v58, %v473_v6 }
  0xf8   : > { %v963_v9 = vpop.f32.mrf.mxu0  ;;  %v971_v12 = vpop.f32.mrf.mxu1  ;;  %v526_v24 = vmul.f32 %v450_v2, %v450_v2 }
  0xf9   : > { %918 = vst [vmem:[%s1132_s30 + $0x8] sm:$0xff] %v879_v7   ;;  %v501_v14 = vadd.f32 %v442_v8, %v439_v1  ;;  %v524_v15 = vmul.f32 %v442_v8, %v442_v8  ;;  %v874_v16 = vpack.c.bf16 %v442_v8, %v439_v1  ;;  %922 = vst [vmem:[%s1132_s30 + $0x28] sm:$0xff] %v899_v10  }
  0xfa   : > { %v454_v17 = vpop.f32.mrf.mxu0  ;;  %v894_v18 = vpack.c.bf16 %v474_v11, %v471_v5  ;;  %v486_v19 = vpop.f32.mrf.mxu1  ;;  %v495_v26 = vadd.f32 %v971_v12, %v793_v58  ;;  %v463_v29 = vadd.f32 %v963_v9, %v793_v58 }
  0xfb   : > { %v502_v21 = vadd.f32 %v501_v14, %v447_v0  ;;  %v539_v22 = vadd.f32 %v524_v15, %v523_v13  ;;  %875 = vst [vmem:[%s1132_s30] sm:$0xff] %v874_v16   ;;  %v455_v23 = vadd.f32 %v793_v58, %v454_v17  ;;  %v487_v33 = vadd.f32 %v793_v58, %v486_v19 }
  0xfc   : > { %v964_v25 = vpop.f32.mrf.mxu0  ;;  %921 = vst [vmem:[%s1132_s30 + $0x20] sm:$0xff] %v894_v18   ;;  %v972_v27 = vpop.f32.mrf.mxu1  ;;  %v529_v48 = vmul.f32 %v463_v29, %v463_v29  ;;  %v534_v0 = vmul.f32 %v1126_v3, %v1126_v3  ;;  %v537_v10 = vmul.f32 %v495_v26, %v495_v26 }
  0xfd   : > { %v540_v28 = vadd.f32 %v539_v22, %v525_v20  ;;  %v503_v30 = vadd.f32 %v502_v21, %v450_v2  ;;  %v466_v31 = vadd.f32 %v964_v25, %v793_v58  ;;  %v498_v34 = vadd.f32 %v972_v27, %v793_v58 }
  0xfe   : > { %v457_v32 = vpop.f32.mrf.mxu0  ;;  %v489_v35 = vpop.f32.mrf.mxu1  ;;  %v527_v37 = vmul.f32 %v455_v23, %v455_v23  ;;  %v535_v6 = vmul.f32 %v487_v33, %v487_v33 }
  0xff   : > { %v504_v36 = vadd.f32 %v503_v30, %v455_v23  ;;  %v541_v38 = vadd.f32 %v540_v28, %v526_v24  ;;  %v889_v39 = vpack.c.bf16 %v466_v31, %v463_v29  ;;  %v458_v40 = vadd.f32 %v793_v58, %v457_v32 }
 0x100   : > { %v909_v41 = vpack.c.bf16 %v498_v34, %v495_v26  ;;  %v490_v42 = vadd.f32 %v793_v58, %v489_v35  ;;  %v530_v51 = vmul.f32 %v466_v31, %v466_v31  ;;  %v532_v58 = vmul.f32 %v474_v11, %v474_v11 }
 0x101   : > { %v542_v43 = vadd.f32 %v541_v38, %v527_v37  ;;  %920 = vst [vmem:[%s1132_s30 + $0x18] sm:$0xff] %v889_v39   ;;  %v505_v44 = vadd.f32 %v504_v36, %v458_v40  ;;  %v528_v45 = vmul.f32 %v458_v40, %v458_v40  ;;  %v884_v46 = vpack.c.bf16 %v458_v40, %v455_v23 }
 0x102   : > { %924 = vst [vmem:[%s1132_s30 + $0x38] sm:$0xff] %v909_v41   ;;  %v904_v47 = vpack.c.bf16 %v490_v42, %v487_v33  ;;  %v536_v9 = vmul.f32 %v490_v42, %v490_v42  ;;  %v538_v13 = vmul.f32 %v498_v34, %v498_v34 }
 0x103   : > { %v506_v49 = vadd.f32 %v505_v44, %v463_v29  ;;  %v543_v50 = vadd.f32 %v542_v43, %v528_v45  ;;  %919 = vst [vmem:[%s1132_s30 + $0x10] sm:$0xff] %v884_v46  }
 0x104   : > { %923 = vst [vmem:[%s1132_s30 + $0x30] sm:$0xff] %v904_v47  }
 0x105   : > { %v544_v52 = vadd.f32 %v543_v50, %v529_v48  ;;  %v507_v53 = vadd.f32 %v506_v49, %v466_v31 }
 0x107   : > { %v508_v55 = vadd.f32 %v507_v53, %v471_v5  ;;  %v545_v56 = vadd.f32 %v544_v52, %v530_v51 }
 0x109   : > { %v509_v57 = vadd.f32 %v508_v55, %v474_v11  ;;  %v546_v59 = vadd.f32 %v545_v56, %v531_v54 }
 0x10b   : > { %v510_v61 = vadd.f32 %v509_v57, %v1124_v62  ;;  %v547_v63 = vadd.f32 %v546_v59, %v532_v58 }
 0x10d   : > { %v548_v1 = vadd.f32 %v547_v63, %v533_v60  ;;  %v511_v2 = vadd.f32 %v510_v61, %v1126_v3 }
 0x10f   : > { %v512_v4 = vadd.f32 %v511_v2, %v487_v33  ;;  %v549_v7 = vadd.f32 %v548_v1, %v534_v0 }
 0x111   : > { %v550_v5 = vadd.f32 %v549_v7, %v535_v6  ;;  %v513_v8 = vadd.f32 %v512_v4, %v490_v42 }
 0x113   : > { %v514_v11 = vadd.f32 %v513_v8, %v495_v26  ;;  %v551_v12 = vadd.f32 %v550_v5, %v536_v9 }
 0x115   : > { %v515_v14 = vadd.f32 %v514_v11, %v498_v34  ;;  %v552_v62 = vadd.f32 %v551_v12, %v537_v10 }
 0x117   : > { %v516_v15 = vrot.slane %v515_v14, 4  ;;  %v553_v16 = vadd.f32 %v552_v62, %v538_v13 }
 0x119   : > { %v517_v17 = vadd.f32 %v516_v15, %v515_v14  ;;  %v554_v18 = vrot.slane %v553_v16, 4 }
 0x11b   : > { %v518_v19 = vrot.slane %v517_v17, 2  ;;  %v555_v20 = vadd.f32 %v554_v18, %v553_v16 }
 0x11d   : > { %v519_v3 = vadd.f32 %v518_v19, %v517_v17  ;;  %v556_v21 = vrot.slane %v555_v20, 2 }
 0x11f   : > { %v520_v22 = vrot.slane %v519_v3, 1  ;;  %v557_v23 = vadd.f32 %v556_v21, %v555_v20 }
 0x121   : > { %v521_v24 = vadd.f32 %v520_v22, %v519_v3  ;;  %v558_v25 = vrot.slane %v557_v23, 1 }
 0x123   : > { %522 = vst [vmem:[%s275_s8] sm:$0x1] %v521_v24  ;;  %v559_v26 = vadd.f32 %v558_v25, %v557_v23 }
 0x125   : > { %560 = vst [vmem:[%s275_s8 + $0x1] sm:$0x1] %v559_v26 }
 0x126 PF: > { %s15_s17 = sadd.s32 1, %s1043_s17   ;;  %s1168_s15 = smov %s1039_s16 }
 0x127   : > { %p12_p5 = scmp.ge.s32.totalorder %s15_s17, 6   ;;  %s1169_s16 = smov %s1171_s18 }
 0x129   :  { %14 = sbr.rel (!%p12_p5) target bundleno = 2 (0x2), region = 77 }

// kernel: _lambda_.19
= control target key start
LH: loop header
LB: loop body
LE: loop exit
PB: predicated region body
PF: predicated region fallthrough
CT: control target
= control target key end

     0   :  { %s1635_s12 = smov 0   ;;  %s1637_s13 = smov 0   ;;  %s1883_s0 = inlined_call_operand.vmem [shape: bf16[4,512,64], index: 0, kind: input, shape index: {}]   ;;  %s1884_s1 = inlined_call_operand.vmem [shape: bf16[4,64,128], index: 1, kind: input, shape index: {}]   ;;  %s1885_s2 = inlined_call_operand.vmem [shape: f32[1,128], index: 2, kind: input, shape index: {}]   ;;  %s1886_s3 = inlined_call_operand.vmem [shape: f32[4,512,128], index: 3, kind: output, shape index: {}]  }
   0x1   :  { %s1639_s14 = smov 0  }
   0x2 LB: > { %s25_s15 = sadd.s32 1, %s1609_s13  ;;  %p1111_p0 = scmp.ge.s32.totalorder %s1613_s14, 1  ;;  %s1613_s14 = sphi %s1639_s14, %s13_s14   ;;  %s1609_s13 = sphi %s1637_s13, %s1888_s13   ;;  %s1605_s12 = sphi %s1635_s12, %s1887_s12  }
   0x3   : > { %p27_p1 = scmp.ge.s32.totalorder %s25_s15, 4  ;;  %p168_p2 = scmp.lt.s32.totalorder %s1613_s14, 5 }
   0x5   : > { %s1890_s15 = smov (%p27_p1, %s25_s15), 0  ;;  %p169_p3 = pnand %p1111_p0, %p168_p2 }
   0x6   : > { %p206_p4 = scmp.lt.s32.totalorder (!%p169_p3), %s1605_s12, 3 }
   0x7   : > { %172 = sbr.rel (%p169_p3) target bundleno = 305 (0x131), region = 32 }
   0xc   : > { %s1892_s12 = smov (!%p206_p4, %s1605_s12), 3  ;;  %vm494_vm0 = vcmask 523264  }
   0xd   : > { %s1157_s16 = sshll.u32 %s1892_s12, 8  ;;  %s1158_s17 = sshll.u32 %s1892_s12, 5 }
   0xe   : > { %s1660_s20 = scalar_lea.vmem %s1884_s1, %s1158_s17  ;;  %s1666_s23 = scalar_lea.vmem %s1883_s0, %s1157_s16 }
   0xf   : > { %v1459_v0 = vld [vmem:[%s1660_s20 + $0x18] sm:$0xff]   ;;  %v1460_v1 = vld [vmem:[%s1660_s20 + $0x10] sm:$0xff]   ;;  %v1461_v2 = vld [vmem:[%s1660_s20 + $0x8] sm:$0xff]   ;;  %s1159_s26 = sshll.u32 %s1892_s12, 9 }
  0x10   : > { %1355 = vmatprep.subr.bf16.mxu0 %v1459_v0  ;;  %1427 = vmatprep.subr.bf16.mxu1 %v1459_v0  ;;  %v1161_v3 = vld [vmem:[%s1666_s23] sm:$0xff]   ;;  %v1288_v5 = vld [vmem:[%s1666_s23 + $0x8] sm:$0xff]   ;;  %v1289_v15 = vld [vmem:[%s1666_s23 + $0x10] sm:$0xff]   ;;  %s1758_s29 = scalar_lea.vmem %s1886_s3, %s1159_s26 }
  0x11   : > { %1356 = vmatpush3.bf16.msra.mxu0 %v1459_v0  ;;  %1431 = vmatpush3.bf16.msra.mxu1 %v1459_v0  ;;  %v1303_v4 = vld [vmem:[%s1666_s23 + $0x80] sm:$0xff]   ;;  %v1162_v6 = vunpack.c.l.bf16 %v1161_v3  ;;  %v1163_v7 = vunpack.c.h.bf16 %v1161_v3  ;;  %v1304_v10 = vld [vmem:[%s1666_s23 + $0x88] sm:$0xff]   ;;  %v1166_v11 = vunpack.c.l.bf16 %v1288_v5  ;;  %v1167_v12 = vunpack.c.h.bf16 %v1288_v5  ;;  %v1305_v20 = vld [vmem:[%s1666_s23 + $0x90] sm:$0xff]  }
  0x12   : > { %1357 = vmatprep.subr.bf16.mxu0 %v1460_v1  ;;  %1428 = vmatprep.subr.bf16.mxu1 %v1460_v1  ;;  %v1226_v8 = vunpack.c.l.bf16 %v1303_v4  ;;  %v1227_v9 = vunpack.c.h.bf16 %v1303_v4  ;;  %v1230_v13 = vunpack.c.l.bf16 %v1304_v10  ;;  %v1231_v14 = vunpack.c.h.bf16 %v1304_v10  ;;  %v1462_v21 = vld [vmem:[%s1660_s20] sm:$0xff]   ;;  %v1290_v32 = vld [vmem:[%s1666_s23 + $0x18] sm:$0xff]   ;;  %v1292_v58 = vld [vmem:[%s1666_s23 + $0x28] sm:$0xff]  }
  0x13   : > { %v359_v16 = vmax.f32 %v1162_v6, 0.0  ;;  %v360_v17 = vmax.f32 %v1163_v7, 0.0  ;;  %v361_v22 = vmax.f32 %v1166_v11, 0.0  ;;  %v362_v23 = vmax.f32 %v1167_v12, 0.0  ;;  %v1306_v35 = vld [vmem:[%s1666_s23 + $0x98] sm:$0xff]   ;;  %v1291_v36 = vld [vmem:[%s1666_s23 + $0x20] sm:$0xff]  }
  0x14   : > { %v391_v18 = vmax.f32 %v1226_v8, 0.0  ;;  %v392_v19 = vmax.f32 %v1227_v9, 0.0  ;;  %v393_v24 = vmax.f32 %v1230_v13, 0.0  ;;  %v394_v25 = vmax.f32 %v1231_v14, 0.0  ;;  %v1307_v39 = vld [vmem:[%s1666_s23 + $0xa0] sm:$0xff]   ;;  %v1308_v59 = vld [vmem:[%s1666_s23 + $0xa8] sm:$0xff]  }
  0x15   : > { %1358 = vmatpush3.bf16.msra.mxu0 %v1460_v1  ;;  %1432 = vmatpush3.bf16.msra.mxu1 %v1460_v1  ;;  %v423_v26 = vpack.c.bf16 %v360_v17, %v359_v16  ;;  %v1170_v28 = vunpack.c.l.bf16 %v1289_v15  ;;  %v1171_v29 = vunpack.c.h.bf16 %v1289_v15  ;;  %v1234_v30 = vunpack.c.l.bf16 %v1305_v20  ;;  %v1293_v62 = vld [vmem:[%s1666_s23 + $0x30] sm:$0xff]   ;;  %v1294_v16 = vld [vmem:[%s1666_s23 + $0x38] sm:$0xff]  }
  0x16   : > { %1359 = vmatprep.subr.bf16.mxu0 %v1461_v2  ;;  %1429 = vmatprep.subr.bf16.mxu1 %v1461_v2  ;;  %v439_v27 = vpack.c.bf16 %v392_v19, %v391_v18  ;;  %v1235_v31 = vunpack.c.h.bf16 %v1305_v20  ;;  %v424_v40 = vpack.c.bf16 %v362_v23, %v361_v22  ;;  %v440_v41 = vpack.c.bf16 %v394_v25, %v393_v24  ;;  %v1309_v63 = vld [vmem:[%s1666_s23 + $0xb0] sm:$0xff]   ;;  %v1295_v22 = vld [vmem:[%s1666_s23 + $0x40] sm:$0xff]  }
  0x17   : > { %v363_v33 = vmax.f32 %v1170_v28, 0.0  ;;  %v364_v34 = vmax.f32 %v1171_v29, 0.0  ;;  %v395_v37 = vmax.f32 %v1234_v30, 0.0  ;;  %1363 = vmatprep.mubr.msk.bf16.mxu0 %vm494_vm0, %v423_v26  ;;  %v1174_v42 = vunpack.c.l.bf16 %v1290_v32  ;;  %v1311_v23 = vld [vmem:[%s1666_s23 + $0xc0] sm:$0xff]  }
  0x18   : > { %v396_v38 = vmax.f32 %v1235_v31, 0.0  ;;  %1395 = vmatprep.mubr.msk.bf16.mxu1 %vm494_vm0, %v439_v27  ;;  %v1175_v43 = vunpack.c.h.bf16 %v1290_v32  ;;  %v1238_v44 = vunpack.c.l.bf16 %v1306_v35  ;;  %v1239_v45 = vunpack.c.h.bf16 %v1306_v35 }
  0x19   : > { %1360 = vmatpush3.bf16.msra.mxu0 %v1461_v2  ;;  %1433 = vmatpush3.bf16.msra.mxu1 %v1461_v2  ;;  %v1178_v46 = vunpack.c.l.bf16 %v1291_v36  ;;  %v1179_v47 = vunpack.c.h.bf16 %v1291_v36  ;;  %v425_v48 = vpack.c.bf16 %v364_v34, %v363_v33  ;;  %v1242_v50 = vunpack.c.l.bf16 %v1307_v39 }
  0x1a   : > { %1361 = vmatprep.subr.bf16.mxu0 %v1462_v21  ;;  %1430 = vmatprep.subr.bf16.mxu1 %v1462_v21  ;;  %v441_v49 = vpack.c.bf16 %v396_v38, %v395_v37  ;;  %v1243_v51 = vunpack.c.h.bf16 %v1307_v39  ;;  %v365_v52 = vmax.f32 %v1174_v42, 0.0  ;;  %v366_v53 = vmax.f32 %v1175_v43, 0.0  ;;  %v1296_v42 = vld [vmem:[%s1666_s23 + $0x48] sm:$0xff]  }
  0x1b   : > { %v397_v54 = vmax.f32 %v1238_v44, 0.0  ;;  %v398_v55 = vmax.f32 %v1239_v45, 0.0  ;;  %v367_v56 = vmax.f32 %v1178_v46, 0.0  ;;  %v368_v57 = vmax.f32 %v1179_v47, 0.0  ;;  %v1312_v43 = vld [vmem:[%s1666_s23 + $0xc8] sm:$0xff]   ;;  %v1297_v46 = vld [vmem:[%s1666_s23 + $0x50] sm:$0xff]  }
  0x1c   : > { %v399_v60 = vmax.f32 %v1242_v50, 0.0  ;;  %v400_v61 = vmax.f32 %v1243_v51, 0.0  ;;  %v1182_v0 = vunpack.c.l.bf16 %v1292_v58  ;;  %v1183_v1 = vunpack.c.h.bf16 %v1292_v58  ;;  %v1313_v47 = vld [vmem:[%s1666_s23 + $0xd0] sm:$0xff]  }
  0x1d   : > { %1362 = vmatpush3.bf16.msra.mxu0 %v1462_v21  ;;  %1434 = vmatpush3.bf16.msra.mxu1 %v1462_v21  ;;  %v1246_v2 = vunpack.c.l.bf16 %v1308_v59  ;;  %v1247_v3 = vunpack.c.h.bf16 %v1308_v59  ;;  %v426_v4 = vpack.c.bf16 %v366_v53, %v365_v52  ;;  %v442_v5 = vpack.c.bf16 %v398_v55, %v397_v54  ;;  %v1310_v21 = vld [vmem:[%s1666_s23 + $0xb8] sm:$0xff]  }
  0x1e   : > { %v427_v6 = vpack.c.bf16 %v368_v57, %v367_v56  ;;  %v1186_v7 = vunpack.c.l.bf16 %v1293_v62  ;;  %v443_v8 = vpack.c.bf16 %v400_v61, %v399_v60  ;;  %v1187_v9 = vunpack.c.h.bf16 %v1293_v62 }
  0x1f   : > { %v1250_v10 = vunpack.c.l.bf16 %v1309_v63  ;;  %v1251_v11 = vunpack.c.h.bf16 %v1309_v63  ;;  %v369_v12 = vmax.f32 %v1182_v0, 0.0  ;;  %v370_v13 = vmax.f32 %v1183_v1, 0.0  ;;  %v1298_v0 = vld [vmem:[%s1666_s23 + $0x58] sm:$0xff]  }
  0x20   : > { %1364 = vmatmul.mubr.msk.bf16.vlgmr.msra.gmra.mxu0 %vm494_vm0, %v424_v40  ;;  %1396 = vmatmul.mubr.msk.bf16.vlgmr.msra.gmra.mxu1 %vm494_vm0, %v440_v41  ;;  %v401_v14 = vmax.f32 %v1246_v2, 0.0  ;;  %v402_v15 = vmax.f32 %v1247_v3, 0.0  ;;  %v371_v17 = vmax.f32 %v1186_v7, 0.0  ;;  %v372_v18 = vmax.f32 %v1187_v9, 0.0  ;;  %v1315_v7 = vld [vmem:[%s1666_s23 + $0xe0] sm:$0xff]  }
  0x21   : > { %1367 = vmatprep.mubr.msk.bf16.mxu0 %vm494_vm0, %v425_v48  ;;  %1399 = vmatprep.mubr.msk.bf16.mxu1 %vm494_vm0, %v441_v49  ;;  %v403_v19 = vmax.f32 %v1250_v10, 0.0  ;;  %v404_v20 = vmax.f32 %v1251_v11, 0.0  ;;  %v428_v24 = vpack.c.bf16 %v370_v13, %v369_v12  ;;  %v1190_v26 = vunpack.c.l.bf16 %v1294_v16 }
  0x22   : > { %v444_v25 = vpack.c.bf16 %v402_v15, %v401_v14  ;;  %v1191_v27 = vunpack.c.h.bf16 %v1294_v16  ;;  %v1254_v28 = vunpack.c.l.bf16 %v1310_v21  ;;  %v1255_v29 = vunpack.c.h.bf16 %v1310_v21 }
  0x23   : > { %v1194_v30 = vunpack.c.l.bf16 %v1295_v22  ;;  %v1195_v31 = vunpack.c.h.bf16 %v1295_v22  ;;  %v429_v32 = vpack.c.bf16 %v372_v18, %v371_v17  ;;  %v445_v33 = vpack.c.bf16 %v404_v20, %v403_v19 }
  0x24   : > { %v1258_v34 = vunpack.c.l.bf16 %v1311_v23  ;;  %v1259_v35 = vunpack.c.h.bf16 %v1311_v23  ;;  %v373_v36 = vmax.f32 %v1190_v26, 0.0  ;;  %v374_v37 = vmax.f32 %v1191_v27, 0.0  ;;  %v1300_v26 = vld [vmem:[%s1666_s23 + $0x68] sm:$0xff]  }
  0x25   : > { %v405_v38 = vmax.f32 %v1254_v28, 0.0  ;;  %v406_v39 = vmax.f32 %v1255_v29, 0.0  ;;  %v375_v40 = vmax.f32 %v1194_v30, 0.0  ;;  %v376_v41 = vmax.f32 %v1195_v31, 0.0  ;;  %v1316_v27 = vld [vmem:[%s1666_s23 + $0xe8] sm:$0xff]   ;;  %v1301_v30 = vld [vmem:[%s1666_s23 + $0x70] sm:$0xff]  }
  0x26   : > { %v407_v44 = vmax.f32 %v1258_v34, 0.0  ;;  %v408_v45 = vmax.f32 %v1259_v35, 0.0  ;;  %v1198_v48 = vunpack.c.l.bf16 %v1296_v42  ;;  %v1199_v49 = vunpack.c.h.bf16 %v1296_v42  ;;  %v1317_v31 = vld [vmem:[%s1666_s23 + $0xf0] sm:$0xff]  }
  0x27   : > { %v1262_v50 = vunpack.c.l.bf16 %v1312_v43  ;;  %v1263_v51 = vunpack.c.h.bf16 %v1312_v43  ;;  %v430_v52 = vpack.c.bf16 %v374_v37, %v373_v36  ;;  %v446_v53 = vpack.c.bf16 %v406_v39, %v405_v38 }
  0x28   : > { %1368 = vmatmul.mubr.msk.bf16.gmra.mxu0 %vm494_vm0, %v426_v4  ;;  %1400 = vmatmul.mubr.msk.bf16.gmra.mxu1 %vm494_vm0, %v442_v5  ;;  %v431_v54 = vpack.c.bf16 %v376_v41, %v375_v40  ;;  %v1202_v55 = vunpack.c.l.bf16 %v1297_v46  ;;  %v447_v56 = vpack.c.bf16 %v408_v45, %v407_v44  ;;  %v1203_v57 = vunpack.c.h.bf16 %v1297_v46  ;;  %v1314_v5 = vld [vmem:[%s1666_s23 + $0xd8] sm:$0xff]  }
  0x29   : > { %1371 = vmatprep.mubr.msk.bf16.mxu0 %vm494_vm0, %v427_v6  ;;  %1403 = vmatprep.mubr.msk.bf16.mxu1 %vm494_vm0, %v443_v8  ;;  %v1266_v58 = vunpack.c.l.bf16 %v1313_v47  ;;  %v1267_v59 = vunpack.c.h.bf16 %v1313_v47  ;;  %v377_v60 = vmax.f32 %v1198_v48, 0.0  ;;  %v378_v61 = vmax.f32 %v1199_v49, 0.0  ;;  %v1299_v6 = vld [vmem:[%s1666_s23 + $0x60] sm:$0xff]  }
  0x2a   : > { %v409_v62 = vmax.f32 %v1262_v50, 0.0  ;;  %v410_v63 = vmax.f32 %v1263_v51, 0.0  ;;  %v379_v1 = vmax.f32 %v1202_v55, 0.0  ;;  %v380_v2 = vmax.f32 %v1203_v57, 0.0 }
  0x2b   : > { %v411_v3 = vmax.f32 %v1266_v58, 0.0  ;;  %v412_v4 = vmax.f32 %v1267_v59, 0.0  ;;  %v432_v8 = vpack.c.bf16 %v378_v61, %v377_v60  ;;  %v1206_v10 = vunpack.c.l.bf16 %v1298_v0 }
  0x2c   : > { %v448_v9 = vpack.c.bf16 %v410_v63, %v409_v62  ;;  %v1207_v11 = vunpack.c.h.bf16 %v1298_v0  ;;  %v1270_v12 = vunpack.c.l.bf16 %v1314_v5  ;;  %v1271_v13 = vunpack.c.h.bf16 %v1314_v5 }
  0x2d   : > { %v1210_v14 = vunpack.c.l.bf16 %v1299_v6  ;;  %v1211_v15 = vunpack.c.h.bf16 %v1299_v6  ;;  %v433_v16 = vpack.c.bf16 %v380_v2, %v379_v1  ;;  %v449_v17 = vpack.c.bf16 %v412_v4, %v411_v3  ;;  %v1738_v4 = vld [vmem:[%s1885_s2] ss:$0 sm:$0xff] }
  0x2e   : > { %v1274_v18 = vunpack.c.l.bf16 %v1315_v7  ;;  %v1275_v19 = vunpack.c.h.bf16 %v1315_v7  ;;  %v381_v20 = vmax.f32 %v1206_v10, 0.0  ;;  %v382_v21 = vmax.f32 %v1207_v11, 0.0 }
  0x2f   : > { %v413_v22 = vmax.f32 %v1270_v12, 0.0  ;;  %v414_v23 = vmax.f32 %v1271_v13, 0.0  ;;  %v1278_v34 = vunpack.c.l.bf16 %v1316_v27  ;;  %v1279_v35 = vunpack.c.h.bf16 %v1316_v27 }
  0x30   : > { %1372 = vmatmul.mubr.msk.bf16.gmra.mxu0 %vm494_vm0, %v428_v24  ;;  %1404 = vmatmul.mubr.msk.bf16.gmra.mxu1 %vm494_vm0, %v444_v25  ;;  %v383_v24 = vmax.f32 %v1210_v14, 0.0  ;;  %v384_v25 = vmax.f32 %v1211_v15, 0.0  ;;  %v415_v28 = vmax.f32 %v1274_v18, 0.0  ;;  %v416_v29 = vmax.f32 %v1275_v19, 0.0 }
  0x31   : > { %1375 = vmatprep.mubr.msk.bf16.mxu0 %vm494_vm0, %v429_v32  ;;  %1407 = vmatprep.mubr.msk.bf16.mxu1 %vm494_vm0, %v445_v33  ;;  %v1214_v32 = vunpack.c.l.bf16 %v1300_v26  ;;  %v1215_v33 = vunpack.c.h.bf16 %v1300_v26  ;;  %v434_v36 = vpack.c.bf16 %v382_v21, %v381_v20  ;;  %v450_v37 = vpack.c.bf16 %v414_v23, %v413_v22 }
  0x32   : > { %v435_v38 = vpack.c.bf16 %v384_v25, %v383_v24  ;;  %v1218_v39 = vunpack.c.l.bf16 %v1301_v30  ;;  %v451_v40 = vpack.c.bf16 %v416_v29, %v415_v28  ;;  %v1219_v41 = vunpack.c.h.bf16 %v1301_v30 }
  0x33   : > { %v1282_v42 = vunpack.c.l.bf16 %v1317_v31  ;;  %v1283_v43 = vunpack.c.h.bf16 %v1317_v31  ;;  %v385_v44 = vmax.f32 %v1214_v32, 0.0  ;;  %v386_v45 = vmax.f32 %v1215_v33, 0.0 }
  0x34   : > { %v417_v46 = vmax.f32 %v1278_v34, 0.0  ;;  %v418_v47 = vmax.f32 %v1279_v35, 0.0  ;;  %v387_v48 = vmax.f32 %v1218_v39, 0.0  ;;  %v388_v49 = vmax.f32 %v1219_v41, 0.0 }
  0x35   : > { %v419_v50 = vmax.f32 %v1282_v42, 0.0  ;;  %v420_v51 = vmax.f32 %v1283_v43, 0.0 }
  0x36   : > { %v452_v55 = vpack.c.bf16 %v418_v47, %v417_v46  ;;  %v437_v60 = vpack.c.bf16 %v388_v49, %v387_v48 }
  0x37   : > { %v453_v61 = vpack.c.bf16 %v420_v51, %v419_v50 }
  0x38   : > { %1376 = vmatmul.mubr.msk.bf16.gmra.mxu0 %vm494_vm0, %v430_v52  ;;  %1408 = vmatmul.mubr.msk.bf16.gmra.mxu1 %vm494_vm0, %v446_v53  ;;  %v1302_v52 = vld [vmem:[%s1666_s23 + $0x78] sm:$0xff]  }
  0x39   : > { %1379 = vmatprep.mubr.msk.bf16.mxu0 %vm494_vm0, %v431_v54  ;;  %1411 = vmatprep.mubr.msk.bf16.mxu1 %vm494_vm0, %v447_v56  ;;  %v1318_v53 = vld [vmem:[%s1666_s23 + $0xf8] sm:$0xff]   ;;  %v436_v54 = vpack.c.bf16 %v386_v45, %v385_v44  ;;  %v1222_v56 = vunpack.c.l.bf16 %v1302_v52  ;;  %v1223_v57 = vunpack.c.h.bf16 %v1302_v52 }
  0x3a   : > { %v1286_v58 = vunpack.c.l.bf16 %v1318_v53  ;;  %v1287_v59 = vunpack.c.h.bf16 %v1318_v53 }
  0x3b   : > { %v389_v62 = vmax.f32 %v1222_v56, 0.0  ;;  %v390_v63 = vmax.f32 %v1223_v57, 0.0 }
  0x3c   : > { %v421_v0 = vmax.f32 %v1286_v58, 0.0  ;;  %v422_v1 = vmax.f32 %v1287_v59, 0.0 }
  0x3d   : > { %v438_v2 = vpack.c.bf16 %v390_v63, %v389_v62 }
  0x3e   : > { %v454_v3 = vpack.c.bf16 %v422_v1, %v421_v0 }
  0x40   : > { %1380 = vmatmul.mubr.msk.bf16.gmra.mxu0 %vm494_vm0, %v432_v8  ;;  %1412 = vmatmul.mubr.msk.bf16.gmra.mxu1 %vm494_vm0, %v448_v9 }
  0x41   : > { %1383 = vmatprep.mubr.msk.bf16.mxu0 %vm494_vm0, %v433_v16  ;;  %1415 = vmatprep.mubr.msk.bf16.mxu1 %vm494_vm0, %v449_v17 }
  0x48   : > { %1384 = vmatmul.mubr.msk.bf16.gmra.mxu0 %vm494_vm0, %v434_v36  ;;  %1416 = vmatmul.mubr.msk.bf16.gmra.mxu1 %vm494_vm0, %v450_v37 }
  0x49   : > { %1387 = vmatprep.mubr.msk.bf16.mxu0 %vm494_vm0, %v435_v38  ;;  %1419 = vmatprep.mubr.msk.bf16.mxu1 %vm494_vm0, %v451_v40 }
  0x50   : > { %1388 = vmatmul.mubr.msk.bf16.gmra.mxu0 %vm494_vm0, %v436_v54  ;;  %1420 = vmatmul.mubr.msk.bf16.gmra.mxu1 %vm494_vm0, %v452_v55 }
  0x51   : > { %1391 = vmatprep.mubr.msk.bf16.mxu0 %vm494_vm0, %v437_v60  ;;  %1423 = vmatprep.mubr.msk.bf16.mxu1 %vm494_vm0, %v453_v61 }
  0x58   : > { %1392 = vmatmul.mubr.msk.bf16.gmra.mxu0 %vm494_vm0, %v438_v2  ;;  %1424 = vmatmul.mubr.msk.bf16.gmra.mxu1 %vm494_vm0, %v454_v3 }
  0xe0   : > { %v1365_v5 = vpop.f32.mrf.mxu0  ;;  %v1397_v6 = vpop.f32.mrf.mxu1 }
  0xe1   : > { %v634_v7 = vadd.f32 %v1365_v5, %v1738_v4  ;;  %v762_v8 = vadd.f32 %v1397_v6, %v1738_v4 }
  0xe2   : > { %v625_v9 = vpop.f32.mrf.mxu0  ;;  %v753_v10 = vpop.f32.mrf.mxu1 }
  0xe3   : > { %1463 = vtanh.f32 %v634_v7  ;;  %v626_v11 = vadd.f32 %v1738_v4, %v625_v9  ;;  %v754_v12 = vadd.f32 %v1738_v4, %v753_v10 }
  0xe4   : > { %1465 = vtanh.f32 %v762_v8  ;;  %v1366_v13 = vpop.f32.mrf.mxu0  ;;  %v1398_v14 = vpop.f32.mrf.mxu1 }
  0xe5   : > { %1467 = vtanh.f32 %v626_v11  ;;  %v637_v15 = vadd.f32 %v1366_v13, %v1738_v4  ;;  %v765_v16 = vadd.f32 %v1398_v14, %v1738_v4 }
  0xe6   : > { %1469 = vtanh.f32 %v754_v12  ;;  %v628_v17 = vpop.f32.mrf.mxu0  ;;  %v756_v18 = vpop.f32.mrf.mxu1 }
  0xe7   : > { %1471 = vtanh.f32 %v637_v15  ;;  %v629_v19 = vadd.f32 %v1738_v4, %v628_v17  ;;  %v757_v20 = vadd.f32 %v1738_v4, %v756_v18 }
  0xe8   : > { %1473 = vtanh.f32 %v765_v16  ;;  %v1369_v21 = vpop.f32.mrf.mxu0  ;;  %v1401_v22 = vpop.f32.mrf.mxu1 }
  0xe9   : > { %1475 = vtanh.f32 %v629_v19  ;;  %v650_v23 = vadd.f32 %v1369_v21, %v1738_v4  ;;  %v778_v24 = vadd.f32 %v1401_v22, %v1738_v4 }
  0xea   : > { %1477 = vtanh.f32 %v757_v20  ;;  %v641_v25 = vpop.f32.mrf.mxu0  ;;  %v769_v26 = vpop.f32.mrf.mxu1 }
  0xeb   : > { %1479 = vtanh.f32 %v650_v23  ;;  %v642_v27 = vadd.f32 %v1738_v4, %v641_v25  ;;  %v770_v28 = vadd.f32 %v1738_v4, %v769_v26 }
  0xec   : > { %1481 = vtanh.f32 %v778_v24  ;;  %v1370_v29 = vpop.f32.mrf.mxu0  ;;  %v1402_v30 = vpop.f32.mrf.mxu1 }
  0xed   : > { %1483 = vtanh.f32 %v642_v27  ;;  %v653_v31 = vadd.f32 %v1370_v29, %v1738_v4  ;;  %v781_v32 = vadd.f32 %v1402_v30, %v1738_v4 }
  0xee   : > { %1485 = vtanh.f32 %v770_v28  ;;  %v644_v33 = vpop.f32.mrf.mxu0  ;;  %v772_v34 = vpop.f32.mrf.mxu1 }
  0xef   : > { %1487 = vtanh.f32 %v653_v31  ;;  %v645_v35 = vadd.f32 %v1738_v4, %v644_v33  ;;  %v773_v36 = vadd.f32 %v1738_v4, %v772_v34 }
  0xf0   : > { %v1464_v37 = vpop.eup %1463  ;;  %1489 = vtanh.f32 %v781_v32  ;;  %v1373_v38 = vpop.f32.mrf.mxu0 }
  0xf1   : > { %v1405_v39 = vpop.f32.mrf.mxu1  ;;  %v1466_v40 = vpop.eup %1465  ;;  %946 = vst [vmem:[%s1758_s29 + $0x10] sm:$0xff] %v1464_v37  ;;  %1491 = vtanh.f32 %v645_v35  ;;  %v666_v41 = vadd.f32 %v1373_v38, %v1738_v4 }
  0xf2   : > { %v794_v42 = vadd.f32 %v1405_v39, %v1738_v4  ;;  %v1468_v43 = vpop.eup %1467  ;;  %978 = vst [vmem:[%s1758_s29 + $0x110] sm:$0xff] %v1466_v40  ;;  %1493 = vtanh.f32 %v773_v36  ;;  %v657_v44 = vpop.f32.mrf.mxu0 }
  0xf3   : > { %v785_v45 = vpop.f32.mrf.mxu1  ;;  %v1470_v46 = vpop.eup %1469  ;;  %944 = vst [vmem:[%s1758_s29] sm:$0xff] %v1468_v43  ;;  %1495 = vtanh.f32 %v666_v41  ;;  %v658_v47 = vadd.f32 %v1738_v4, %v657_v44 }
  0xf4   : > { %v786_v48 = vadd.f32 %v1738_v4, %v785_v45  ;;  %v1472_v49 = vpop.eup %1471  ;;  %976 = vst [vmem:[%s1758_s29 + $0x100] sm:$0xff] %v1470_v46  ;;  %1497 = vtanh.f32 %v794_v42  ;;  %v1374_v50 = vpop.f32.mrf.mxu0 }
  0xf5   : > { %v1406_v51 = vpop.f32.mrf.mxu1  ;;  %v1474_v52 = vpop.eup %1473  ;;  %947 = vst [vmem:[%s1758_s29 + $0x18] sm:$0xff] %v1472_v49  ;;  %1499 = vtanh.f32 %v658_v47  ;;  %v669_v53 = vadd.f32 %v1374_v50, %v1738_v4 }
  0xf6   : > { %v797_v54 = vadd.f32 %v1406_v51, %v1738_v4  ;;  %v1476_v55 = vpop.eup %1475  ;;  %979 = vst [vmem:[%s1758_s29 + $0x118] sm:$0xff] %v1474_v52  ;;  %1501 = vtanh.f32 %v786_v48  ;;  %v660_v56 = vpop.f32.mrf.mxu0 }
  0xf7   : > { %v788_v57 = vpop.f32.mrf.mxu1  ;;  %v1478_v58 = vpop.eup %1477  ;;  %945 = vst [vmem:[%s1758_s29 + $0x8] sm:$0xff] %v1476_v55  ;;  %1503 = vtanh.f32 %v669_v53  ;;  %v661_v59 = vadd.f32 %v1738_v4, %v660_v56 }
  0xf8   : > { %v789_v60 = vadd.f32 %v1738_v4, %v788_v57  ;;  %v1480_v61 = vpop.eup %1479  ;;  %977 = vst [vmem:[%s1758_s29 + $0x108] sm:$0xff] %v1478_v58  ;;  %1505 = vtanh.f32 %v797_v54  ;;  %v1377_v62 = vpop.f32.mrf.mxu0 }
  0xf9   : > { %v1409_v63 = vpop.f32.mrf.mxu1  ;;  %v1482_v0 = vpop.eup %1481  ;;  %950 = vst [vmem:[%s1758_s29 + $0x30] sm:$0xff] %v1480_v61  ;;  %1507 = vtanh.f32 %v661_v59  ;;  %v682_v1 = vadd.f32 %v1377_v62, %v1738_v4 }
  0xfa   : > { %v810_v2 = vadd.f32 %v1409_v63, %v1738_v4  ;;  %v1484_v3 = vpop.eup %1483  ;;  %982 = vst [vmem:[%s1758_s29 + $0x130] sm:$0xff] %v1482_v0  ;;  %1509 = vtanh.f32 %v789_v60  ;;  %v673_v5 = vpop.f32.mrf.mxu0 }
  0xfb   : > { %v801_v6 = vpop.f32.mrf.mxu1  ;;  %v1486_v7 = vpop.eup %1485  ;;  %948 = vst [vmem:[%s1758_s29 + $0x20] sm:$0xff] %v1484_v3  ;;  %1511 = vtanh.f32 %v682_v1  ;;  %v674_v8 = vadd.f32 %v1738_v4, %v673_v5 }
  0xfc   : > { %v802_v9 = vadd.f32 %v1738_v4, %v801_v6  ;;  %v1488_v10 = vpop.eup %1487  ;;  %980 = vst [vmem:[%s1758_s29 + $0x120] sm:$0xff] %v1486_v7  ;;  %1513 = vtanh.f32 %v810_v2  ;;  %v1378_v11 = vpop.f32.mrf.mxu0 }
  0xfd   : > { %v1410_v12 = vpop.f32.mrf.mxu1  ;;  %v1490_v13 = vpop.eup %1489  ;;  %951 = vst [vmem:[%s1758_s29 + $0x38] sm:$0xff] %v1488_v10  ;;  %1515 = vtanh.f32 %v674_v8  ;;  %v685_v14 = vadd.f32 %v1378_v11, %v1738_v4 }
  0xfe   : > { %v813_v15 = vadd.f32 %v1410_v12, %v1738_v4  ;;  %v1492_v16 = vpop.eup %1491  ;;  %983 = vst [vmem:[%s1758_s29 + $0x138] sm:$0xff] %v1490_v13  ;;  %1517 = vtanh.f32 %v802_v9  ;;  %v676_v17 = vpop.f32.mrf.mxu0 }
  0xff   : > { %v804_v18 = vpop.f32.mrf.mxu1  ;;  %v1494_v19 = vpop.eup %1493  ;;  %949 = vst [vmem:[%s1758_s29 + $0x28] sm:$0xff] %v1492_v16  ;;  %1519 = vtanh.f32 %v685_v14  ;;  %v677_v20 = vadd.f32 %v1738_v4, %v676_v17 }
 0x100   : > { %v805_v21 = vadd.f32 %v1738_v4, %v804_v18  ;;  %v1496_v22 = vpop.eup %1495  ;;  %981 = vst [vmem:[%s1758_s29 + $0x128] sm:$0xff] %v1494_v19  ;;  %1521 = vtanh.f32 %v813_v15  ;;  %v1381_v23 = vpop.f32.mrf.mxu0 }
 0x101   : > { %v1413_v24 = vpop.f32.mrf.mxu1  ;;  %v1498_v25 = vpop.eup %1497  ;;  %954 = vst [vmem:[%s1758_s29 + $0x50] sm:$0xff] %v1496_v22  ;;  %1523 = vtanh.f32 %v677_v20  ;;  %v698_v26 = vadd.f32 %v1381_v23, %v1738_v4 }
 0x102   : > { %v826_v27 = vadd.f32 %v1413_v24, %v1738_v4  ;;  %v1500_v28 = vpop.eup %1499  ;;  %986 = vst [vmem:[%s1758_s29 + $0x150] sm:$0xff] %v1498_v25  ;;  %1525 = vtanh.f32 %v805_v21  ;;  %v689_v29 = vpop.f32.mrf.mxu0 }
 0x103   : > { %v817_v30 = vpop.f32.mrf.mxu1  ;;  %v1502_v31 = vpop.eup %1501  ;;  %952 = vst [vmem:[%s1758_s29 + $0x40] sm:$0xff] %v1500_v28  ;;  %1527 = vtanh.f32 %v698_v26  ;;  %v690_v32 = vadd.f32 %v1738_v4, %v689_v29 }
 0x104   : > { %v818_v33 = vadd.f32 %v1738_v4, %v817_v30  ;;  %v1504_v34 = vpop.eup %1503  ;;  %984 = vst [vmem:[%s1758_s29 + $0x140] sm:$0xff] %v1502_v31  ;;  %1529 = vtanh.f32 %v826_v27  ;;  %v1382_v35 = vpop.f32.mrf.mxu0 }
 0x105   : > { %v1414_v36 = vpop.f32.mrf.mxu1  ;;  %v1506_v37 = vpop.eup %1505  ;;  %955 = vst [vmem:[%s1758_s29 + $0x58] sm:$0xff] %v1504_v34  ;;  %1531 = vtanh.f32 %v690_v32  ;;  %v701_v38 = vadd.f32 %v1382_v35, %v1738_v4 }
 0x106   : > { %v829_v39 = vadd.f32 %v1414_v36, %v1738_v4  ;;  %v1508_v40 = vpop.eup %1507  ;;  %987 = vst [vmem:[%s1758_s29 + $0x158] sm:$0xff] %v1506_v37  ;;  %1533 = vtanh.f32 %v818_v33  ;;  %v692_v41 = vpop.f32.mrf.mxu0 }
 0x107   : > { %v820_v42 = vpop.f32.mrf.mxu1  ;;  %v1510_v43 = vpop.eup %1509  ;;  %953 = vst [vmem:[%s1758_s29 + $0x48] sm:$0xff] %v1508_v40  ;;  %1535 = vtanh.f32 %v701_v38  ;;  %v693_v44 = vadd.f32 %v1738_v4, %v692_v41 }
 0x108   : > { %v821_v45 = vadd.f32 %v1738_v4, %v820_v42  ;;  %v1512_v46 = vpop.eup %1511  ;;  %985 = vst [vmem:[%s1758_s29 + $0x148] sm:$0xff] %v1510_v43  ;;  %1537 = vtanh.f32 %v829_v39  ;;  %v1385_v47 = vpop.f32.mrf.mxu0 }
 0x109   : > { %v1417_v48 = vpop.f32.mrf.mxu1  ;;  %v1514_v49 = vpop.eup %1513  ;;  %958 = vst [vmem:[%s1758_s29 + $0x70] sm:$0xff] %v1512_v46  ;;  %1539 = vtanh.f32 %v693_v44  ;;  %v714_v50 = vadd.f32 %v1385_v47, %v1738_v4 }
 0x10a   : > { %v842_v51 = vadd.f32 %v1417_v48, %v1738_v4  ;;  %v1516_v52 = vpop.eup %1515  ;;  %990 = vst [vmem:[%s1758_s29 + $0x170] sm:$0xff] %v1514_v49  ;;  %1541 = vtanh.f32 %v821_v45  ;;  %v705_v53 = vpop.f32.mrf.mxu0 }
 0x10b   : > { %v833_v54 = vpop.f32.mrf.mxu1  ;;  %v1518_v55 = vpop.eup %1517  ;;  %956 = vst [vmem:[%s1758_s29 + $0x60] sm:$0xff] %v1516_v52  ;;  %1543 = vtanh.f32 %v714_v50  ;;  %v706_v56 = vadd.f32 %v1738_v4, %v705_v53 }
 0x10c   : > { %v834_v57 = vadd.f32 %v1738_v4, %v833_v54  ;;  %v1520_v58 = vpop.eup %1519  ;;  %988 = vst [vmem:[%s1758_s29 + $0x160] sm:$0xff] %v1518_v55  ;;  %1545 = vtanh.f32 %v842_v51  ;;  %v1386_v59 = vpop.f32.mrf.mxu0 }
 0x10d   : > { %v1418_v60 = vpop.f32.mrf.mxu1  ;;  %v1522_v61 = vpop.eup %1521  ;;  %959 = vst [vmem:[%s1758_s29 + $0x78] sm:$0xff] %v1520_v58  ;;  %1547 = vtanh.f32 %v706_v56  ;;  %v717_v62 = vadd.f32 %v1386_v59, %v1738_v4 }
 0x10e   : > { %v845_v63 = vadd.f32 %v1418_v60, %v1738_v4  ;;  %v1524_v0 = vpop.eup %1523  ;;  %991 = vst [vmem:[%s1758_s29 + $0x178] sm:$0xff] %v1522_v61  ;;  %1549 = vtanh.f32 %v834_v57  ;;  %v708_v1 = vpop.f32.mrf.mxu0 }
 0x10f   : > { %v836_v2 = vpop.f32.mrf.mxu1  ;;  %v1526_v3 = vpop.eup %1525  ;;  %957 = vst [vmem:[%s1758_s29 + $0x68] sm:$0xff] %v1524_v0  ;;  %1551 = vtanh.f32 %v717_v62  ;;  %v709_v5 = vadd.f32 %v1738_v4, %v708_v1 }
 0x110   : > { %v837_v6 = vadd.f32 %v1738_v4, %v836_v2  ;;  %v1528_v7 = vpop.eup %1527  ;;  %989 = vst [vmem:[%s1758_s29 + $0x168] sm:$0xff] %v1526_v3  ;;  %1553 = vtanh.f32 %v845_v63  ;;  %v1389_v8 = vpop.f32.mrf.mxu0 }
 0x111   : > { %v1421_v9 = vpop.f32.mrf.mxu1  ;;  %v1530_v10 = vpop.eup %1529  ;;  %962 = vst [vmem:[%s1758_s29 + $0x90] sm:$0xff] %v1528_v7  ;;  %1555 = vtanh.f32 %v709_v5  ;;  %v730_v11 = vadd.f32 %v1389_v8, %v1738_v4 }
 0x112   : > { %v858_v12 = vadd.f32 %v1421_v9, %v1738_v4  ;;  %v1532_v13 = vpop.eup %1531  ;;  %994 = vst [vmem:[%s1758_s29 + $0x190] sm:$0xff] %v1530_v10  ;;  %1557 = vtanh.f32 %v837_v6  ;;  %v721_v14 = vpop.f32.mrf.mxu0 }
 0x113   : > { %v849_v15 = vpop.f32.mrf.mxu1  ;;  %v1534_v16 = vpop.eup %1533  ;;  %960 = vst [vmem:[%s1758_s29 + $0x80] sm:$0xff] %v1532_v13  ;;  %1559 = vtanh.f32 %v730_v11  ;;  %v722_v17 = vadd.f32 %v1738_v4, %v721_v14 }
 0x114   : > { %v850_v18 = vadd.f32 %v1738_v4, %v849_v15  ;;  %v1536_v19 = vpop.eup %1535  ;;  %992 = vst [vmem:[%s1758_s29 + $0x180] sm:$0xff] %v1534_v16  ;;  %1561 = vtanh.f32 %v858_v12  ;;  %v1390_v20 = vpop.f32.mrf.mxu0 }
 0x115   : > { %v1422_v21 = vpop.f32.mrf.mxu1  ;;  %v1538_v22 = vpop.eup %1537  ;;  %963 = vst [vmem:[%s1758_s29 + $0x98] sm:$0xff] %v1536_v19  ;;  %1563 = vtanh.f32 %v722_v17  ;;  %v733_v23 = vadd.f32 %v1390_v20, %v1738_v4 }
 0x116   : > { %v861_v24 = vadd.f32 %v1422_v21, %v1738_v4  ;;  %v1540_v25 = vpop.eup %1539  ;;  %995 = vst [vmem:[%s1758_s29 + $0x198] sm:$0xff] %v1538_v22  ;;  %1565 = vtanh.f32 %v850_v18  ;;  %v724_v26 = vpop.f32.mrf.mxu0 }
 0x117   : > { %v852_v27 = vpop.f32.mrf.mxu1  ;;  %v1542_v28 = vpop.eup %1541  ;;  %961 = vst [vmem:[%s1758_s29 + $0x88] sm:$0xff] %v1540_v25  ;;  %1567 = vtanh.f32 %v733_v23  ;;  %v725_v29 = vadd.f32 %v1738_v4, %v724_v26 }
 0x118   : > { %v853_v30 = vadd.f32 %v1738_v4, %v852_v27  ;;  %v1544_v31 = vpop.eup %1543  ;;  %993 = vst [vmem:[%s1758_s29 + $0x188] sm:$0xff] %v1542_v28  ;;  %1569 = vtanh.f32 %v861_v24  ;;  %v1393_v32 = vpop.f32.mrf.mxu0 }
 0x119   : > { %v1425_v33 = vpop.f32.mrf.mxu1  ;;  %v1546_v34 = vpop.eup %1545  ;;  %966 = vst [vmem:[%s1758_s29 + $0xb0] sm:$0xff] %v1544_v31  ;;  %1571 = vtanh.f32 %v725_v29  ;;  %v746_v35 = vadd.f32 %v1393_v32, %v1738_v4 }
 0x11a   : > { %v874_v36 = vadd.f32 %v1425_v33, %v1738_v4  ;;  %v1548_v37 = vpop.eup %1547  ;;  %998 = vst [vmem:[%s1758_s29 + $0x1b0] sm:$0xff] %v1546_v34  ;;  %1573 = vtanh.f32 %v853_v30  ;;  %v737_v38 = vpop.f32.mrf.mxu0 }
 0x11b   : > { %v865_v39 = vpop.f32.mrf.mxu1  ;;  %v1550_v40 = vpop.eup %1549  ;;  %964 = vst [vmem:[%s1758_s29 + $0xa0] sm:$0xff] %v1548_v37  ;;  %1575 = vtanh.f32 %v746_v35  ;;  %v738_v41 = vadd.f32 %v1738_v4, %v737_v38 }
 0x11c   : > { %v866_v42 = vadd.f32 %v1738_v4, %v865_v39  ;;  %v1552_v43 = vpop.eup %1551  ;;  %996 = vst [vmem:[%s1758_s29 + $0x1a0] sm:$0xff] %v1550_v40  ;;  %1577 = vtanh.f32 %v874_v36  ;;  %v1394_v44 = vpop.f32.mrf.mxu0 }
 0x11d   : > { %v1426_v45 = vpop.f32.mrf.mxu1  ;;  %v1554_v46 = vpop.eup %1553  ;;  %967 = vst [vmem:[%s1758_s29 + $0xb8] sm:$0xff] %v1552_v43  ;;  %1579 = vtanh.f32 %v738_v41  ;;  %v749_v47 = vadd.f32 %v1394_v44, %v1738_v4 }
 0x11e   : > { %v877_v48 = vadd.f32 %v1426_v45, %v1738_v4  ;;  %v1556_v49 = vpop.eup %1555  ;;  %999 = vst [vmem:[%s1758_s29 + $0x1b8] sm:$0xff] %v1554_v46  ;;  %1581 = vtanh.f32 %v866_v42  ;;  %v740_v50 = vpop.f32.mrf.mxu0 }
 0x11f   : > { %v868_v51 = vpop.f32.mrf.mxu1  ;;  %v1558_v52 = vpop.eup %1557  ;;  %965 = vst [vmem:[%s1758_s29 + $0xa8] sm:$0xff] %v1556_v49  ;;  %1583 = vtanh.f32 %v749_v47  ;;  %v741_v53 = vadd.f32 %v1738_v4, %v740_v50 }
 0x120   : > { %v869_v54 = vadd.f32 %v1738_v4, %v868_v51  ;;  %v1560_v55 = vpop.eup %1559  ;;  %997 = vst [vmem:[%s1758_s29 + $0x1a8] sm:$0xff] %v1558_v52  ;;  %1585 = vtanh.f32 %v877_v48 }
 0x121   : > { %v1562_v56 = vpop.eup %1561  ;;  %970 = vst [vmem:[%s1758_s29 + $0xd0] sm:$0xff] %v1560_v55  ;;  %1587 = vtanh.f32 %v741_v53 }
 0x122   : > { %v1564_v57 = vpop.eup %1563  ;;  %1002 = vst [vmem:[%s1758_s29 + $0x1d0] sm:$0xff] %v1562_v56  ;;  %1589 = vtanh.f32 %v869_v54 }
 0x123   : > { %v1566_v58 = vpop.eup %1565  ;;  %968 = vst [vmem:[%s1758_s29 + $0xc0] sm:$0xff] %v1564_v57 }
 0x124   : > { %v1568_v59 = vpop.eup %1567  ;;  %1000 = vst [vmem:[%s1758_s29 + $0x1c0] sm:$0xff] %v1566_v58 }
 0x125   : > { %v1570_v4 = vpop.eup %1569  ;;  %971 = vst [vmem:[%s1758_s29 + $0xd8] sm:$0xff] %v1568_v59 }
 0x126   : > { %v1572_v60 = vpop.eup %1571  ;;  %1003 = vst [vmem:[%s1758_s29 + $0x1d8] sm:$0xff] %v1570_v4 }
 0x127   : > { %v1574_v61 = vpop.eup %1573  ;;  %969 = vst [vmem:[%s1758_s29 + $0xc8] sm:$0xff] %v1572_v60 }
 0x128   : > { %v1576_v62 = vpop.eup %1575  ;;  %1001 = vst [vmem:[%s1758_s29 + $0x1c8] sm:$0xff] %v1574_v61 }
 0x129   : > { %v1578_v63 = vpop.eup %1577  ;;  %974 = vst [vmem:[%s1758_s29 + $0xf0] sm:$0xff] %v1576_v62 }
 0x12a   : > { %v1580_v0 = vpop.eup %1579  ;;  %1006 = vst [vmem:[%s1758_s29 + $0x1f0] sm:$0xff] %v1578_v63 }
 0x12b   : > { %v1582_v1 = vpop.eup %1581  ;;  %972 = vst [vmem:[%s1758_s29 + $0xe0] sm:$0xff] %v1580_v0 }
 0x12c   : > { %v1584_v2 = vpop.eup %1583  ;;  %1004 = vst [vmem:[%s1758_s29 + $0x1e0] sm:$0xff] %v1582_v1 }
 0x12d   : > { %v1586_v3 = vpop.eup %1585  ;;  %975 = vst [vmem:[%s1758_s29 + $0xf8] sm:$0xff] %v1584_v2 }
 0x12e   : > { %v1588_v5 = vpop.eup %1587  ;;  %1007 = vst [vmem:[%s1758_s29 + $0x1f8] sm:$0xff] %v1586_v3 }
 0x12f   : > { %v1590_v6 = vpop.eup %1589  ;;  %973 = vst [vmem:[%s1758_s29 + $0xe8] sm:$0xff] %v1588_v5 }
 0x130   : > { %1005 = vst [vmem:[%s1758_s29 + $0x1e8] sm:$0xff] %v1590_v6 }
 0x131 PF: > { %s13_s14 = sadd.s32 1, %s1613_s14   ;;  %s1887_s12 = smov %s1609_s13 }
 0x132   : > { %p10_p5 = scmp.ge.s32.totalorder %s13_s14, 6   ;;  %s1888_s13 = smov %s1890_s15 }
 0x134   :  { %12 = sbr.rel (!%p10_p5) target bundleno = 2 (0x2), region = 65 }

</bundles_post_ra>
